<compile_context>
chip_gen: v6e
topology: v6e:2x2x1
jax: 0.10.0
libtpu: 0.0.40
codegen_flags: <defaults>
</compile_context>

<pallas_src>
import math
import functools

import jax
import jax.numpy as jnp
from jax import lax
from jax.experimental import pallas as pl
from jax.experimental.pallas import tpu as pltpu


# ----------------------------- in-kernel helpers ----------------------------

def _nt_matmul(x, w):
    """x: (M, K) contracted with w: (N, K) -> (M, N), f32 accumulation.

    Contract dim 1 of both operands (PyTorch nn.Linear weight layout) so no
    transpose is materialized inside the kernel.
    """
    return lax.dot_general(
        x, w,
        dimension_numbers=(((1,), (1,)), ((), ())),
        preferred_element_type=jnp.float32)


def _layer_norm(x, g, b, eps):
    mu = jnp.mean(x, axis=-1, keepdims=True)
    var = jnp.mean(jnp.square(x - mu), axis=-1, keepdims=True)
    return (x - mu) * lax.rsqrt(var + eps) * g + b


def _erf(x):
    # Abramowitz & Stegun 7.1.26 rational approximation (|err| < 1.5e-7).
    # Uses only exp / mul / add / where so it lowers on v5e/v6e/v7x.
    a1, a2, a3, a4, a5 = (0.254829592, -0.284496736, 1.421413741,
                          -1.453152027, 1.061405429)
    p = 0.3275911
    ax = jnp.abs(x)
    t = 1.0 / (1.0 + p * ax)
    poly = ((((a5 * t + a4) * t + a3) * t + a2) * t + a1) * t
    y = 1.0 - poly * jnp.exp(-ax * ax)
    return jnp.where(x >= 0.0, y, -y)


def _gelu(x):
    # exact (erf) GELU, matching PyTorch activation='gelu' / nn.GELU()
    return 0.5 * x * (1.0 + _erf(x * (1.0 / math.sqrt(2.0))))


# ------------------------------ fused kernel --------------------------------

def _fused_forward_kernel(
        x_ref, pw_ref, pb_ref, pe_ref, bmask_ref, hmask_ref,
        ln1g_ref, ln1b_ref, wq_ref, wk_ref, wv_ref, bq_ref, bk_ref, bv_ref,
        wo_ref, bo_ref, ln2g_ref, ln2b_ref, w1_ref, b1_ref, w2_ref, b2_ref,
        lnfg_ref, lnfb_ref, w1a_ref, w1m_ref, ob1_ref, w2o_ref, ob2_ref,
        o_ref, *, B, P, nhead, d_model, num_layers, eps):
    """Whole TransformerEncoder forward, VMEM/register resident."""
    Dh = d_model // nhead
    scale = 1.0 / math.sqrt(Dh)
    bmask = bmask_ref[...]                       # (M, M): 0 same-sample, -1e30 cross

    # ---------------- stem: patch embedding + 2-D positional encoding -------
    h = _nt_matmul(x_ref[...].astype(jnp.bfloat16), pw_ref[...]) + pb_ref[...]
    # (P, d) PE tiled over the batch inside the kernel (sublane concat).
    h = h + jnp.concatenate([pe_ref[...]] * B, axis=0)          # (M, d) f32

    # ------------- encoder layers (norm_first), statically unrolled ---------
    for l in range(num_layers):
        # -- self-attention block --
        xn = _layer_norm(h, ln1g_ref[l], ln1b_ref[l], eps)
        xb = xn.astype(jnp.bfloat16)
        q = _nt_matmul(xb, wq_ref[l]) + bq_ref[l]               # (M, d) f32
        k = _nt_matmul(xb, wk_ref[l]) + bk_ref[l]
        v = _nt_matmul(xb, wv_ref[l]) + bv_ref[l]
        qb = q.astype(jnp.bfloat16)

        o = jnp.zeros(q.shape, jnp.float32)                     # head-merged acc
        for hh in range(nhead):
            hm = hmask_ref[hh]                                  # (1, d) one-hot head cols
            # head isolation via column mask -> full-width bf16 MXU matmuls,
            # no 8-lane slices, no lane concatenate.
            km = (k * hm).astype(jnp.bfloat16)
            s = _nt_matmul(qb, km) * scale + bmask              # (M, M) f32
            mx = jnp.max(s, axis=-1, keepdims=True)
            p = jnp.exp(s - mx)
            p = p * pl.reciprocal(jnp.sum(p, axis=-1, keepdims=True), approx=True)
            vm = (v * hm).astype(jnp.bfloat16)
            o = o + jnp.dot(p.astype(jnp.bfloat16), vm,
                            preferred_element_type=jnp.float32)

        attn = _nt_matmul(o.astype(jnp.bfloat16), wo_ref[l]) + bo_ref[l]
        h = h + attn                                            # dropout = identity

        # -- feed-forward block --
        xn2 = _layer_norm(h, ln2g_ref[l], ln2b_ref[l], eps)
        z = _nt_matmul(xn2.astype(jnp.bfloat16), w1_ref[l]) + b1_ref[l]
        z = _gelu(z)                                            # exact erf GELU, f32
        z = _nt_matmul(z.astype(jnp.bfloat16), w2_ref[l]) + b2_ref[l]
        h = h + z

    # ------------- epilogue: final LN + avg/max pool + projection -----------
    hn = _layer_norm(h, lnfg_ref[...], lnfb_ref[...], eps)
    rows = []
    for b in range(B):
        blk = hn[b * P:(b + 1) * P, :]                          # sublane-aligned slice
        avg = jnp.mean(blk, axis=0, keepdims=True)              # (1, d)
        mx = jnp.max(blk, axis=0, keepdims=True)                # (1, d)
        # concat([avg, max]) @ W1^T folded as avg @ W1a^T + max @ W1m^T.
        z = (_nt_matmul(avg.astype(jnp.bfloat16), w1a_ref[...])
             + _nt_matmul(mx.astype(jnp.bfloat16), w1m_ref[...]) + ob1_ref[...])
        z = _gelu(z)
        rows.append(_nt_matmul(z.astype(jnp.bfloat16), w2o_ref[...]) + ob2_ref[...])
    o_ref[...] = jnp.concatenate(rows, axis=0)                  # single (B, d) store


# ----------------------------- wrapper / forward -----------------------------

def transformer_encoder_forward(x, params, *, d_model, nhead, patch_size, eps=1e-5):
    B, C, T = x.shape
    P = T // patch_size
    M = B * P
    num_layers = len(params["layers"])
    dff = params["layers"][0]["ff1_w"].shape[0]

    # --- layout plumbing outside the kernel (cheap, runs once per call) ---
    # unfold(2, ps, ps) -> (B, C, P, ps); permute -> (B, P, C, ps); flatten rows.
    x_flat = (x.reshape(B, C, P, patch_size)
               .transpose(0, 2, 1, 3)
               .reshape(M, C * patch_size))

    # combined PE: temporal + mean-over-channels spatial, a single (P, d) block.
    pe = params["pe_temporal"] + jnp.mean(params["pe_spatial"], axis=0)[None, :]

    # additive mask killing cross-sample attention (rows ordered (b, p)).
    seg = jnp.repeat(jnp.arange(B, dtype=jnp.int32), P)
    bmask = jnp.where(seg[:, None] == seg[None, :], 0.0, -1e30).astype(jnp.float32)

    # one-hot head-column masks, (H, 1, d).
    Dh = d_model // nhead
    col = jnp.arange(d_model, dtype=jnp.int32)
    hmask = (col[None, :] // Dh == jnp.arange(nhead, dtype=jnp.int32)[:, None]
             ).astype(jnp.float32).reshape(nhead, 1, d_model)

    # stack per-layer weights along a leading layer axis (static unroll in-kernel).
    def stack(key):
        return jnp.stack([lyr[key] for lyr in params["layers"]])

    in_proj_w = stack("in_proj_w")                                  # (L, 3d, d) bf16
    in_proj_b = stack("in_proj_b")                                  # (L, 3d) f32
    wq = in_proj_w[:, :d_model]
    wk = in_proj_w[:, d_model:2 * d_model]
    wv = in_proj_w[:, 2 * d_model:]
    bq = in_proj_b[:, :d_model].reshape(num_layers, 1, d_model)
    bk = in_proj_b[:, d_model:2 * d_model].reshape(num_layers, 1, d_model)
    bv = in_proj_b[:, 2 * d_model:].reshape(num_layers, 1, d_model)

    args = (
        x_flat,
        params["patch_w"], params["patch_b"].reshape(1, d_model), pe,
        bmask, hmask,
        stack("ln1_g").reshape(num_layers, 1, d_model),
        stack("ln1_b").reshape(num_layers, 1, d_model),
        wq, wk, wv, bq, bk, bv,
        stack("out_proj_w"), stack("out_proj_b").reshape(num_layers, 1, d_model),
        stack("ln2_g").reshape(num_layers, 1, d_model),
        stack("ln2_b").reshape(num_layers, 1, d_model),
        stack("ff1_w"), stack("ff1_b").reshape(num_layers, 1, dff),
        stack("ff2_w"), stack("ff2_b").reshape(num_layers, 1, d_model),
        params["lnf_g"].reshape(1, d_model), params["lnf_b"].reshape(1, d_model),
        params["op1_w"][:, :d_model], params["op1_w"][:, d_model:],
        params["op1_b"].reshape(1, d_model),
        params["op2_w"], params["op2_b"].reshape(1, d_model),
    )

    kern = functools.partial(_fused_forward_kernel, B=B, P=P, nhead=nhead,
                             d_model=d_model, num_layers=num_layers, eps=eps)

    # Advisory cost hint for XLA scheduling around the single fused call.
    flops = (2 * M * d_model * C * patch_size
             + num_layers * (2 * M * d_model * (4 * d_model + 2 * dff)
                             + 4 * nhead * M * M * d_model)
             + 2 * B * d_model * (2 * d_model + d_model))
    transcendentals = num_layers * (nhead * M * M + M * dff) + B * d_model
    bytes_accessed = (4 * M * C * patch_size + 4 * B * d_model
                      + 2 * num_layers * (4 * d_model * d_model
                                          + 2 * dff * d_model)
                      + 4 * (M * M + num_layers * (8 * d_model + dff)))

    return pl.pallas_call(
        kern,
        in_specs=[pl.BlockSpec(memory_space=pltpu.MemorySpace.VMEM)
                  for _ in range(len(args))],
        out_specs=pl.BlockSpec(memory_space=pltpu.MemorySpace.VMEM),
        out_shape=jax.ShapeDtypeStruct((B, d_model), jnp.float32),
        cost_estimate=pl.CostEstimate(flops=flops,
                                      transcendentals=transcendentals,
                                      bytes_accessed=bytes_accessed),
    )(*args)


# ----------------------------- model definition ------------------------------

def sinusoidal_pe(length, d_model):
    position = jnp.arange(length, dtype=jnp.float32)[:, None]
    div_term = jnp.exp(jnp.arange(0, d_model, 2, dtype=jnp.float32)
                       * (-math.log(10000.0) / d_model))
    pe = jnp.zeros((length, d_model), jnp.float32)
    pe = pe.at[:, 0::2].set(jnp.sin(position * div_term))
    pe = pe.at[:, 1::2].set(jnp.cos(position * div_term))
    return pe


def init_params(key, *, n_channels, d_model, nhead, num_layers, patch_size,
                n_patches):
    keys = iter(jax.random.split(key, 8 + 8 * num_layers))

    def w(shape):
        # Matmul weights stored bf16 (MXU-native); f32 accumulation in-kernel.
        return (jax.random.normal(next(keys), shape, jnp.float32) * 0.02
                ).astype(jnp.bfloat16)

    params = {
        "patch_w": w((d_model, n_channels * patch_size)),
        "patch_b": jnp.zeros((d_model,), jnp.float32),
        "lnf_g": jnp.ones((d_model,), jnp.float32),
        "lnf_b": jnp.zeros((d_model,), jnp.float32),
        "op1_w": w((d_model, 2 * d_model)),
        "op1_b": jnp.zeros((d_model,), jnp.float32),
        "op2_w": w((d_model, d_model)),
        "op2_b": jnp.zeros((d_model,), jnp.float32),
        "pe_temporal": sinusoidal_pe(n_patches, d_model),
        "pe_spatial": sinusoidal_pe(n_channels, d_model),
        "layers": [],
    }
    dff = 4 * d_model
    for _ in range(num_layers):
        params["layers"].append({
            "ln1_g": jnp.ones((d_model,), jnp.float32),
            "ln1_b": jnp.zeros((d_model,), jnp.float32),
            "in_proj_w": w((3 * d_model, d_model)),
            "in_proj_b": jnp.zeros((3 * d_model,), jnp.float32),
            "out_proj_w": w((d_model, d_model)),
            "out_proj_b": jnp.zeros((d_model,), jnp.float32),
            "ln2_g": jnp.ones((d_model,), jnp.float32),
            "ln2_b": jnp.zeros((d_model,), jnp.float32),
            "ff1_w": w((dff, d_model)),
            "ff1_b": jnp.zeros((dff,), jnp.float32),
            "ff2_w": w((d_model, dff)),
            "ff2_b": jnp.zeros((d_model,), jnp.float32),
        })
    return params


# --------------------------------- main --------------------------------------

if __name__ == "__main__":
    # Small shapes consistent with the module's forward.
    B, n_channels, n_times = 2, 4, 128
    d_model, nhead, num_layers, patch_size = 32, 4, 2, 16
    n_patches = n_times // patch_size

    key = jax.random.PRNGKey(0)
    k_params, k_x = jax.random.split(key)
    params = init_params(k_params, n_channels=n_channels, d_model=d_model,
                         nhead=nhead, num_layers=num_layers,
                         patch_size=patch_size, n_patches=n_patches)
    x = jax.random.normal(k_x, (B, n_channels, n_times), dtype=jnp.float32)

    fwd = jax.jit(functools.partial(transformer_encoder_forward,
                                    d_model=d_model, nhead=nhead,
                                    patch_size=patch_size))
    out = jax.block_until_ready(fwd(x, params))
    assert out.shape == (B, d_model), out.shape
    assert bool(jnp.all(jnp.isfinite(out)))
    print("KERNEL_OK")
</pallas_src>

<mosaic_0001>
module attributes {stable_mosaic.version = 11 : i64} {
  func.func @_fused_forward_kernel(%arg0: memref<16x64xf32, #tpu.memory_space<vmem>>, %arg1: memref<32x64xbf16, #tpu.memory_space<vmem>>, %arg2: memref<1x32xf32, #tpu.memory_space<vmem>>, %arg3: memref<8x32xf32, #tpu.memory_space<vmem>>, %arg4: memref<16x16xf32, #tpu.memory_space<vmem>>, %arg5: memref<4x1x32xf32, #tpu.memory_space<vmem>>, %arg6: memref<2x1x32xf32, #tpu.memory_space<vmem>>, %arg7: memref<2x1x32xf32, #tpu.memory_space<vmem>>, %arg8: memref<2x32x32xbf16, #tpu.memory_space<vmem>>, %arg9: memref<2x32x32xbf16, #tpu.memory_space<vmem>>, %arg10: memref<2x32x32xbf16, #tpu.memory_space<vmem>>, %arg11: memref<2x1x32xf32, #tpu.memory_space<vmem>>, %arg12: memref<2x1x32xf32, #tpu.memory_space<vmem>>, %arg13: memref<2x1x32xf32, #tpu.memory_space<vmem>>, %arg14: memref<2x32x32xbf16, #tpu.memory_space<vmem>>, %arg15: memref<2x1x32xf32, #tpu.memory_space<vmem>>, %arg16: memref<2x1x32xf32, #tpu.memory_space<vmem>>, %arg17: memref<2x1x32xf32, #tpu.memory_space<vmem>>, %arg18: memref<2x128x32xbf16, #tpu.memory_space<vmem>>, %arg19: memref<2x1x128xf32, #tpu.memory_space<vmem>>, %arg20: memref<2x32x128xbf16, #tpu.memory_space<vmem>>, %arg21: memref<2x1x32xf32, #tpu.memory_space<vmem>>, %arg22: memref<1x32xf32, #tpu.memory_space<vmem>>, %arg23: memref<1x32xf32, #tpu.memory_space<vmem>>, %arg24: memref<32x32xbf16, #tpu.memory_space<vmem>>, %arg25: memref<32x32xbf16, #tpu.memory_space<vmem>>, %arg26: memref<1x32xf32, #tpu.memory_space<vmem>>, %arg27: memref<32x32xbf16, #tpu.memory_space<vmem>>, %arg28: memref<1x32xf32, #tpu.memory_space<vmem>>, %arg29: memref<2x32xf32, #tpu.memory_space<vmem>>) attributes {dimension_semantics = [], scalar_prefetch = 0 : i64, scratch_operands = 0 : i64, tpu.core_type = #tpu.core_type<tc>} {
    %c0 = arith.constant 0 : index
    %c0_0 = arith.constant 0 : index
    %0 = vector.load %arg4[%c0, %c0_0] : memref<16x16xf32, #tpu.memory_space<vmem>>, vector<16x16xf32>
    %c0_1 = arith.constant 0 : index
    %c0_2 = arith.constant 0 : index
    %1 = vector.load %arg0[%c0_1, %c0_2] : memref<16x64xf32, #tpu.memory_space<vmem>>, vector<16x64xf32>
    %2 = arith.truncf %1 : vector<16x64xf32> to vector<16x64xbf16>
    %c0_3 = arith.constant 0 : index
    %c0_4 = arith.constant 0 : index
    %3 = vector.load %arg1[%c0_3, %c0_4] : memref<32x64xbf16, #tpu.memory_space<vmem>>, vector<32x64xbf16>
    %cst = arith.constant dense<0.000000e+00> : vector<16x32xf32>
    %4 = tpu.matmul %2, %3, %cst {dimension_numbers = #tpu.dot_dimension_numbers<[1], [1], [0], [0], [0, 0, 1, 0], [], []>} : vector<16x64xbf16>, vector<32x64xbf16>, vector<16x32xf32> -> vector<16x32xf32>
    %c0_5 = arith.constant 0 : index
    %c0_6 = arith.constant 0 : index
    %5 = vector.load %arg2[%c0_5, %c0_6] : memref<1x32xf32, #tpu.memory_space<vmem>>, vector<1x32xf32>
    %6 = vector.broadcast %5 : vector<1x32xf32> to vector<16x32xf32>
    %7 = arith.addf %4, %6 : vector<16x32xf32>
    %c0_7 = arith.constant 0 : index
    %c0_8 = arith.constant 0 : index
    %8 = vector.load %arg3[%c0_7, %c0_8] : memref<8x32xf32, #tpu.memory_space<vmem>>, vector<8x32xf32>
    %9 = tpu.concatenate %8, %8 in 0 : vector<8x32xf32>, vector<8x32xf32> -> vector<16x32xf32>
    %10 = arith.addf %7, %9 : vector<16x32xf32>
    %c0_9 = arith.constant 0 : index
    %c0_10 = arith.constant 0 : index
    %c0_11 = arith.constant 0 : index
    %11 = vector.load %arg6[%c0_9, %c0_10, %c0_11] : memref<2x1x32xf32, #tpu.memory_space<vmem>>, vector<1x1x32xf32>
    %12 = vector.shape_cast %11 : vector<1x1x32xf32> to vector<1x32xf32>
    %c0_12 = arith.constant 0 : index
    %c0_13 = arith.constant 0 : index
    %c0_14 = arith.constant 0 : index
    %13 = vector.load %arg7[%c0_12, %c0_13, %c0_14] : memref<2x1x32xf32, #tpu.memory_space<vmem>>, vector<1x1x32xf32>
    %14 = vector.shape_cast %13 : vector<1x1x32xf32> to vector<1x32xf32>
    %cst_15 = arith.constant dense<0.000000e+00> : vector<16xf32>
    %15 = vector.multi_reduction <add>, %10, %cst_15 [1] : vector<16x32xf32> to vector<16xf32>
    %16 = vector.shape_cast %15 : vector<16xf32> to vector<16x1xf32>
    %cst_16 = arith.constant 3.200000e+01 : f32
    %17 = vector.broadcast %cst_16 : f32 to vector<16x1xf32>
    %18 = arith.divf %16, %17 : vector<16x1xf32>
    %19 = vector.broadcast %18 : vector<16x1xf32> to vector<16x32xf32>
    %20 = arith.subf %10, %19 : vector<16x32xf32>
    %21 = arith.mulf %20, %20 : vector<16x32xf32>
    %cst_17 = arith.constant dense<0.000000e+00> : vector<16xf32>
    %22 = vector.multi_reduction <add>, %21, %cst_17 [1] : vector<16x32xf32> to vector<16xf32>
    %23 = vector.shape_cast %22 : vector<16xf32> to vector<16x1xf32>
    %cst_18 = arith.constant 3.200000e+01 : f32
    %24 = vector.broadcast %cst_18 : f32 to vector<16x1xf32>
    %25 = arith.divf %23, %24 : vector<16x1xf32>
    %26 = vector.broadcast %18 : vector<16x1xf32> to vector<16x32xf32>
    %27 = arith.subf %10, %26 : vector<16x32xf32>
    %cst_19 = arith.constant 9.99999974E-6 : f32
    %28 = vector.broadcast %cst_19 : f32 to vector<16x1xf32>
    %29 = arith.addf %25, %28 : vector<16x1xf32>
    %30 = math.rsqrt %29 : vector<16x1xf32>
    %31 = vector.broadcast %30 : vector<16x1xf32> to vector<16x32xf32>
    %32 = arith.mulf %27, %31 : vector<16x32xf32>
    %33 = vector.broadcast %12 : vector<1x32xf32> to vector<16x32xf32>
    %34 = arith.mulf %32, %33 : vector<16x32xf32>
    %35 = vector.broadcast %14 : vector<1x32xf32> to vector<16x32xf32>
    %36 = arith.addf %34, %35 : vector<16x32xf32>
    %37 = arith.truncf %36 : vector<16x32xf32> to vector<16x32xbf16>
    %c0_20 = arith.constant 0 : index
    %c0_21 = arith.constant 0 : index
    %c0_22 = arith.constant 0 : index
    %38 = vector.load %arg8[%c0_20, %c0_21, %c0_22] : memref<2x32x32xbf16, #tpu.memory_space<vmem>>, vector<1x32x32xbf16>
    %39 = vector.shape_cast %38 : vector<1x32x32xbf16> to vector<32x32xbf16>
    %cst_23 = arith.constant dense<0.000000e+00> : vector<16x32xf32>
    %40 = tpu.matmul %37, %39, %cst_23 {dimension_numbers = #tpu.dot_dimension_numbers<[1], [1], [0], [0], [0, 0, 1, 0], [], []>} : vector<16x32xbf16>, vector<32x32xbf16>, vector<16x32xf32> -> vector<16x32xf32>
    %c0_24 = arith.constant 0 : index
    %c0_25 = arith.constant 0 : index
    %c0_26 = arith.constant 0 : index
    %41 = vector.load %arg11[%c0_24, %c0_25, %c0_26] : memref<2x1x32xf32, #tpu.memory_space<vmem>>, vector<1x1x32xf32>
    %42 = vector.shape_cast %41 : vector<1x1x32xf32> to vector<1x32xf32>
    %43 = vector.broadcast %42 : vector<1x32xf32> to vector<16x32xf32>
    %44 = arith.addf %40, %43 : vector<16x32xf32>
    %c0_27 = arith.constant 0 : index
    %c0_28 = arith.constant 0 : index
    %c0_29 = arith.constant 0 : index
    %45 = vector.load %arg9[%c0_27, %c0_28, %c0_29] : memref<2x32x32xbf16, #tpu.memory_space<vmem>>, vector<1x32x32xbf16>
    %46 = vector.shape_cast %45 : vector<1x32x32xbf16> to vector<32x32xbf16>
    %cst_30 = arith.constant dense<0.000000e+00> : vector<16x32xf32>
    %47 = tpu.matmul %37, %46, %cst_30 {dimension_numbers = #tpu.dot_dimension_numbers<[1], [1], [0], [0], [0, 0, 1, 0], [], []>} : vector<16x32xbf16>, vector<32x32xbf16>, vector<16x32xf32> -> vector<16x32xf32>
    %c0_31 = arith.constant 0 : index
    %c0_32 = arith.constant 0 : index
    %c0_33 = arith.constant 0 : index
    %48 = vector.load %arg12[%c0_31, %c0_32, %c0_33] : memref<2x1x32xf32, #tpu.memory_space<vmem>>, vector<1x1x32xf32>
    %49 = vector.shape_cast %48 : vector<1x1x32xf32> to vector<1x32xf32>
    %50 = vector.broadcast %49 : vector<1x32xf32> to vector<16x32xf32>
    %51 = arith.addf %47, %50 : vector<16x32xf32>
    %c0_34 = arith.constant 0 : index
    %c0_35 = arith.constant 0 : index
    %c0_36 = arith.constant 0 : index
    %52 = vector.load %arg10[%c0_34, %c0_35, %c0_36] : memref<2x32x32xbf16, #tpu.memory_space<vmem>>, vector<1x32x32xbf16>
    %53 = vector.shape_cast %52 : vector<1x32x32xbf16> to vector<32x32xbf16>
    %cst_37 = arith.constant dense<0.000000e+00> : vector<16x32xf32>
    %54 = tpu.matmul %37, %53, %cst_37 {dimension_numbers = #tpu.dot_dimension_numbers<[1], [1], [0], [0], [0, 0, 1, 0], [], []>} : vector<16x32xbf16>, vector<32x32xbf16>, vector<16x32xf32> -> vector<16x32xf32>
    %c0_38 = arith.constant 0 : index
    %c0_39 = arith.constant 0 : index
    %c0_40 = arith.constant 0 : index
    %55 = vector.load %arg13[%c0_38, %c0_39, %c0_40] : memref<2x1x32xf32, #tpu.memory_space<vmem>>, vector<1x1x32xf32>
    %56 = vector.shape_cast %55 : vector<1x1x32xf32> to vector<1x32xf32>
    %57 = vector.broadcast %56 : vector<1x32xf32> to vector<16x32xf32>
    %58 = arith.addf %54, %57 : vector<16x32xf32>
    %59 = arith.truncf %44 : vector<16x32xf32> to vector<16x32xbf16>
    %cst_41 = arith.constant 0.000000e+00 : f32
    %60 = vector.broadcast %cst_41 : f32 to vector<16x32xf32>
    %c0_42 = arith.constant 0 : index
    %c0_43 = arith.constant 0 : index
    %c0_44 = arith.constant 0 : index
    %61 = vector.load %arg5[%c0_42, %c0_43, %c0_44] : memref<4x1x32xf32, #tpu.memory_space<vmem>>, vector<1x1x32xf32>
    %62 = vector.shape_cast %61 : vector<1x1x32xf32> to vector<1x32xf32>
    %63 = vector.broadcast %62 : vector<1x32xf32> to vector<16x32xf32>
    %64 = arith.mulf %51, %63 : vector<16x32xf32>
    %65 = arith.truncf %64 : vector<16x32xf32> to vector<16x32xbf16>
    %cst_45 = arith.constant dense<0.000000e+00> : vector<16x16xf32>
    %66 = tpu.matmul %59, %65, %cst_45 {dimension_numbers = #tpu.dot_dimension_numbers<[1], [1], [0], [0], [0, 0, 1, 0], [], []>} : vector<16x32xbf16>, vector<16x32xbf16>, vector<16x16xf32> -> vector<16x16xf32>
    %cst_46 = arith.constant 0.353553385 : f32
    %67 = vector.broadcast %cst_46 : f32 to vector<16x16xf32>
    %68 = arith.mulf %66, %67 : vector<16x16xf32>
    %69 = arith.addf %68, %0 : vector<16x16xf32>
    %cst_47 = arith.constant dense<0xFF800000> : vector<16xf32>
    %70 = vector.multi_reduction <maximumf>, %69, %cst_47 [1] : vector<16x16xf32> to vector<16xf32>
    %71 = vector.shape_cast %70 : vector<16xf32> to vector<16x1xf32>
    %72 = vector.broadcast %71 : vector<16x1xf32> to vector<16x16xf32>
    %73 = arith.subf %69, %72 : vector<16x16xf32>
    %74 = math.exp %73 : vector<16x16xf32>
    %cst_48 = arith.constant dense<0.000000e+00> : vector<16xf32>
    %75 = vector.multi_reduction <add>, %74, %cst_48 [1] : vector<16x16xf32> to vector<16xf32>
    %76 = vector.shape_cast %75 : vector<16xf32> to vector<16x1xf32>
    %77 = tpu.reciprocal %76 {approx = true} : vector<16x1xf32> -> vector<16x1xf32>
    %78 = vector.broadcast %77 : vector<16x1xf32> to vector<16x16xf32>
    %79 = arith.mulf %74, %78 : vector<16x16xf32>
    %80 = vector.broadcast %62 : vector<1x32xf32> to vector<16x32xf32>
    %81 = arith.mulf %58, %80 : vector<16x32xf32>
    %82 = arith.truncf %81 : vector<16x32xf32> to vector<16x32xbf16>
    %83 = arith.truncf %79 : vector<16x16xf32> to vector<16x16xbf16>
    %cst_49 = arith.constant dense<0.000000e+00> : vector<16x32xf32>
    %84 = tpu.matmul %83, %82, %cst_49 {dimension_numbers = #tpu.dot_dimension_numbers<[1], [0], [0], [1], [0, 0, 1, 1], [], []>} : vector<16x16xbf16>, vector<16x32xbf16>, vector<16x32xf32> -> vector<16x32xf32>
    %85 = arith.addf %60, %84 : vector<16x32xf32>
    %c1 = arith.constant 1 : index
    %c0_50 = arith.constant 0 : index
    %c0_51 = arith.constant 0 : index
    %86 = vector.load %arg5[%c1, %c0_50, %c0_51] : memref<4x1x32xf32, #tpu.memory_space<vmem>>, vector<1x1x32xf32>
    %87 = vector.shape_cast %86 : vector<1x1x32xf32> to vector<1x32xf32>
    %88 = vector.broadcast %87 : vector<1x32xf32> to vector<16x32xf32>
    %89 = arith.mulf %51, %88 : vector<16x32xf32>
    %90 = arith.truncf %89 : vector<16x32xf32> to vector<16x32xbf16>
    %cst_52 = arith.constant dense<0.000000e+00> : vector<16x16xf32>
    %91 = tpu.matmul %59, %90, %cst_52 {dimension_numbers = #tpu.dot_dimension_numbers<[1], [1], [0], [0], [0, 0, 1, 0], [], []>} : vector<16x32xbf16>, vector<16x32xbf16>, vector<16x16xf32> -> vector<16x16xf32>
    %cst_53 = arith.constant 0.353553385 : f32
    %92 = vector.broadcast %cst_53 : f32 to vector<16x16xf32>
    %93 = arith.mulf %91, %92 : vector<16x16xf32>
    %94 = arith.addf %93, %0 : vector<16x16xf32>
    %cst_54 = arith.constant dense<0xFF800000> : vector<16xf32>
    %95 = vector.multi_reduction <maximumf>, %94, %cst_54 [1] : vector<16x16xf32> to vector<16xf32>
    %96 = vector.shape_cast %95 : vector<16xf32> to vector<16x1xf32>
    %97 = vector.broadcast %96 : vector<16x1xf32> to vector<16x16xf32>
    %98 = arith.subf %94, %97 : vector<16x16xf32>
    %99 = math.exp %98 : vector<16x16xf32>
    %cst_55 = arith.constant dense<0.000000e+00> : vector<16xf32>
    %100 = vector.multi_reduction <add>, %99, %cst_55 [1] : vector<16x16xf32> to vector<16xf32>
    %101 = vector.shape_cast %100 : vector<16xf32> to vector<16x1xf32>
    %102 = tpu.reciprocal %101 {approx = true} : vector<16x1xf32> -> vector<16x1xf32>
    %103 = vector.broadcast %102 : vector<16x1xf32> to vector<16x16xf32>
    %104 = arith.mulf %99, %103 : vector<16x16xf32>
    %105 = vector.broadcast %87 : vector<1x32xf32> to vector<16x32xf32>
    %106 = arith.mulf %58, %105 : vector<16x32xf32>
    %107 = arith.truncf %106 : vector<16x32xf32> to vector<16x32xbf16>
    %108 = arith.truncf %104 : vector<16x16xf32> to vector<16x16xbf16>
    %cst_56 = arith.constant dense<0.000000e+00> : vector<16x32xf32>
    %109 = tpu.matmul %108, %107, %cst_56 {dimension_numbers = #tpu.dot_dimension_numbers<[1], [0], [0], [1], [0, 0, 1, 1], [], []>} : vector<16x16xbf16>, vector<16x32xbf16>, vector<16x32xf32> -> vector<16x32xf32>
    %110 = arith.addf %85, %109 : vector<16x32xf32>
    %c2 = arith.constant 2 : index
    %c0_57 = arith.constant 0 : index
    %c0_58 = arith.constant 0 : index
    %111 = vector.load %arg5[%c2, %c0_57, %c0_58] : memref<4x1x32xf32, #tpu.memory_space<vmem>>, vector<1x1x32xf32>
    %112 = vector.shape_cast %111 : vector<1x1x32xf32> to vector<1x32xf32>
    %113 = vector.broadcast %112 : vector<1x32xf32> to vector<16x32xf32>
    %114 = arith.mulf %51, %113 : vector<16x32xf32>
    %115 = arith.truncf %114 : vector<16x32xf32> to vector<16x32xbf16>
    %cst_59 = arith.constant dense<0.000000e+00> : vector<16x16xf32>
    %116 = tpu.matmul %59, %115, %cst_59 {dimension_numbers = #tpu.dot_dimension_numbers<[1], [1], [0], [0], [0, 0, 1, 0], [], []>} : vector<16x32xbf16>, vector<16x32xbf16>, vector<16x16xf32> -> vector<16x16xf32>
    %cst_60 = arith.constant 0.353553385 : f32
    %117 = vector.broadcast %cst_60 : f32 to vector<16x16xf32>
    %118 = arith.mulf %116, %117 : vector<16x16xf32>
    %119 = arith.addf %118, %0 : vector<16x16xf32>
    %cst_61 = arith.constant dense<0xFF800000> : vector<16xf32>
    %120 = vector.multi_reduction <maximumf>, %119, %cst_61 [1] : vector<16x16xf32> to vector<16xf32>
    %121 = vector.shape_cast %120 : vector<16xf32> to vector<16x1xf32>
    %122 = vector.broadcast %121 : vector<16x1xf32> to vector<16x16xf32>
    %123 = arith.subf %119, %122 : vector<16x16xf32>
    %124 = math.exp %123 : vector<16x16xf32>
    %cst_62 = arith.constant dense<0.000000e+00> : vector<16xf32>
    %125 = vector.multi_reduction <add>, %124, %cst_62 [1] : vector<16x16xf32> to vector<16xf32>
    %126 = vector.shape_cast %125 : vector<16xf32> to vector<16x1xf32>
    %127 = tpu.reciprocal %126 {approx = true} : vector<16x1xf32> -> vector<16x1xf32>
    %128 = vector.broadcast %127 : vector<16x1xf32> to vector<16x16xf32>
    %129 = arith.mulf %124, %128 : vector<16x16xf32>
    %130 = vector.broadcast %112 : vector<1x32xf32> to vector<16x32xf32>
    %131 = arith.mulf %58, %130 : vector<16x32xf32>
    %132 = arith.truncf %131 : vector<16x32xf32> to vector<16x32xbf16>
    %133 = arith.truncf %129 : vector<16x16xf32> to vector<16x16xbf16>
    %cst_63 = arith.constant dense<0.000000e+00> : vector<16x32xf32>
    %134 = tpu.matmul %133, %132, %cst_63 {dimension_numbers = #tpu.dot_dimension_numbers<[1], [0], [0], [1], [0, 0, 1, 1], [], []>} : vector<16x16xbf16>, vector<16x32xbf16>, vector<16x32xf32> -> vector<16x32xf32>
    %135 = arith.addf %110, %134 : vector<16x32xf32>
    %c3 = arith.constant 3 : index
    %c0_64 = arith.constant 0 : index
    %c0_65 = arith.constant 0 : index
    %136 = vector.load %arg5[%c3, %c0_64, %c0_65] : memref<4x1x32xf32, #tpu.memory_space<vmem>>, vector<1x1x32xf32>
    %137 = vector.shape_cast %136 : vector<1x1x32xf32> to vector<1x32xf32>
    %138 = vector.broadcast %137 : vector<1x32xf32> to vector<16x32xf32>
    %139 = arith.mulf %51, %138 : vector<16x32xf32>
    %140 = arith.truncf %139 : vector<16x32xf32> to vector<16x32xbf16>
    %cst_66 = arith.constant dense<0.000000e+00> : vector<16x16xf32>
    %141 = tpu.matmul %59, %140, %cst_66 {dimension_numbers = #tpu.dot_dimension_numbers<[1], [1], [0], [0], [0, 0, 1, 0], [], []>} : vector<16x32xbf16>, vector<16x32xbf16>, vector<16x16xf32> -> vector<16x16xf32>
    %cst_67 = arith.constant 0.353553385 : f32
    %142 = vector.broadcast %cst_67 : f32 to vector<16x16xf32>
    %143 = arith.mulf %141, %142 : vector<16x16xf32>
    %144 = arith.addf %143, %0 : vector<16x16xf32>
    %cst_68 = arith.constant dense<0xFF800000> : vector<16xf32>
    %145 = vector.multi_reduction <maximumf>, %144, %cst_68 [1] : vector<16x16xf32> to vector<16xf32>
    %146 = vector.shape_cast %145 : vector<16xf32> to vector<16x1xf32>
    %147 = vector.broadcast %146 : vector<16x1xf32> to vector<16x16xf32>
    %148 = arith.subf %144, %147 : vector<16x16xf32>
    %149 = math.exp %148 : vector<16x16xf32>
    %cst_69 = arith.constant dense<0.000000e+00> : vector<16xf32>
    %150 = vector.multi_reduction <add>, %149, %cst_69 [1] : vector<16x16xf32> to vector<16xf32>
    %151 = vector.shape_cast %150 : vector<16xf32> to vector<16x1xf32>
    %152 = tpu.reciprocal %151 {approx = true} : vector<16x1xf32> -> vector<16x1xf32>
    %153 = vector.broadcast %152 : vector<16x1xf32> to vector<16x16xf32>
    %154 = arith.mulf %149, %153 : vector<16x16xf32>
    %155 = vector.broadcast %137 : vector<1x32xf32> to vector<16x32xf32>
    %156 = arith.mulf %58, %155 : vector<16x32xf32>
    %157 = arith.truncf %156 : vector<16x32xf32> to vector<16x32xbf16>
    %158 = arith.truncf %154 : vector<16x16xf32> to vector<16x16xbf16>
    %cst_70 = arith.constant dense<0.000000e+00> : vector<16x32xf32>
    %159 = tpu.matmul %158, %157, %cst_70 {dimension_numbers = #tpu.dot_dimension_numbers<[1], [0], [0], [1], [0, 0, 1, 1], [], []>} : vector<16x16xbf16>, vector<16x32xbf16>, vector<16x32xf32> -> vector<16x32xf32>
    %160 = arith.addf %135, %159 : vector<16x32xf32>
    %161 = arith.truncf %160 : vector<16x32xf32> to vector<16x32xbf16>
    %c0_71 = arith.constant 0 : index
    %c0_72 = arith.constant 0 : index
    %c0_73 = arith.constant 0 : index
    %162 = vector.load %arg14[%c0_71, %c0_72, %c0_73] : memref<2x32x32xbf16, #tpu.memory_space<vmem>>, vector<1x32x32xbf16>
    %163 = vector.shape_cast %162 : vector<1x32x32xbf16> to vector<32x32xbf16>
    %cst_74 = arith.constant dense<0.000000e+00> : vector<16x32xf32>
    %164 = tpu.matmul %161, %163, %cst_74 {dimension_numbers = #tpu.dot_dimension_numbers<[1], [1], [0], [0], [0, 0, 1, 0], [], []>} : vector<16x32xbf16>, vector<32x32xbf16>, vector<16x32xf32> -> vector<16x32xf32>
    %c0_75 = arith.constant 0 : index
    %c0_76 = arith.constant 0 : index
    %c0_77 = arith.constant 0 : index
    %165 = vector.load %arg15[%c0_75, %c0_76, %c0_77] : memref<2x1x32xf32, #tpu.memory_space<vmem>>, vector<1x1x32xf32>
    %166 = vector.shape_cast %165 : vector<1x1x32xf32> to vector<1x32xf32>
    %167 = vector.broadcast %166 : vector<1x32xf32> to vector<16x32xf32>
    %168 = arith.addf %164, %167 : vector<16x32xf32>
    %169 = arith.addf %10, %168 : vector<16x32xf32>
    %c0_78 = arith.constant 0 : index
    %c0_79 = arith.constant 0 : index
    %c0_80 = arith.constant 0 : index
    %170 = vector.load %arg16[%c0_78, %c0_79, %c0_80] : memref<2x1x32xf32, #tpu.memory_space<vmem>>, vector<1x1x32xf32>
    %171 = vector.shape_cast %170 : vector<1x1x32xf32> to vector<1x32xf32>
    %c0_81 = arith.constant 0 : index
    %c0_82 = arith.constant 0 : index
    %c0_83 = arith.constant 0 : index
    %172 = vector.load %arg17[%c0_81, %c0_82, %c0_83] : memref<2x1x32xf32, #tpu.memory_space<vmem>>, vector<1x1x32xf32>
    %173 = vector.shape_cast %172 : vector<1x1x32xf32> to vector<1x32xf32>
    %cst_84 = arith.constant dense<0.000000e+00> : vector<16xf32>
    %174 = vector.multi_reduction <add>, %169, %cst_84 [1] : vector<16x32xf32> to vector<16xf32>
    %175 = vector.shape_cast %174 : vector<16xf32> to vector<16x1xf32>
    %cst_85 = arith.constant 3.200000e+01 : f32
    %176 = vector.broadcast %cst_85 : f32 to vector<16x1xf32>
    %177 = arith.divf %175, %176 : vector<16x1xf32>
    %178 = vector.broadcast %177 : vector<16x1xf32> to vector<16x32xf32>
    %179 = arith.subf %169, %178 : vector<16x32xf32>
    %180 = arith.mulf %179, %179 : vector<16x32xf32>
    %cst_86 = arith.constant dense<0.000000e+00> : vector<16xf32>
    %181 = vector.multi_reduction <add>, %180, %cst_86 [1] : vector<16x32xf32> to vector<16xf32>
    %182 = vector.shape_cast %181 : vector<16xf32> to vector<16x1xf32>
    %cst_87 = arith.constant 3.200000e+01 : f32
    %183 = vector.broadcast %cst_87 : f32 to vector<16x1xf32>
    %184 = arith.divf %182, %183 : vector<16x1xf32>
    %185 = vector.broadcast %177 : vector<16x1xf32> to vector<16x32xf32>
    %186 = arith.subf %169, %185 : vector<16x32xf32>
    %cst_88 = arith.constant 9.99999974E-6 : f32
    %187 = vector.broadcast %cst_88 : f32 to vector<16x1xf32>
    %188 = arith.addf %184, %187 : vector<16x1xf32>
    %189 = math.rsqrt %188 : vector<16x1xf32>
    %190 = vector.broadcast %189 : vector<16x1xf32> to vector<16x32xf32>
    %191 = arith.mulf %186, %190 : vector<16x32xf32>
    %192 = vector.broadcast %171 : vector<1x32xf32> to vector<16x32xf32>
    %193 = arith.mulf %191, %192 : vector<16x32xf32>
    %194 = vector.broadcast %173 : vector<1x32xf32> to vector<16x32xf32>
    %195 = arith.addf %193, %194 : vector<16x32xf32>
    %196 = arith.truncf %195 : vector<16x32xf32> to vector<16x32xbf16>
    %c0_89 = arith.constant 0 : index
    %c0_90 = arith.constant 0 : index
    %c0_91 = arith.constant 0 : index
    %197 = vector.load %arg18[%c0_89, %c0_90, %c0_91] : memref<2x128x32xbf16, #tpu.memory_space<vmem>>, vector<1x128x32xbf16>
    %198 = vector.shape_cast %197 : vector<1x128x32xbf16> to vector<128x32xbf16>
    %cst_92 = arith.constant dense<0.000000e+00> : vector<16x128xf32>
    %199 = tpu.matmul %196, %198, %cst_92 {dimension_numbers = #tpu.dot_dimension_numbers<[1], [1], [0], [0], [0, 0, 1, 0], [], []>} : vector<16x32xbf16>, vector<128x32xbf16>, vector<16x128xf32> -> vector<16x128xf32>
    %c0_93 = arith.constant 0 : index
    %c0_94 = arith.constant 0 : index
    %c0_95 = arith.constant 0 : index
    %200 = vector.load %arg19[%c0_93, %c0_94, %c0_95] : memref<2x1x128xf32, #tpu.memory_space<vmem>>, vector<1x1x128xf32>
    %201 = vector.shape_cast %200 : vector<1x1x128xf32> to vector<1x128xf32>
    %202 = vector.broadcast %201 : vector<1x128xf32> to vector<16x128xf32>
    %203 = arith.addf %199, %202 : vector<16x128xf32>
    %cst_96 = arith.constant 5.000000e-01 : f32
    %204 = vector.broadcast %cst_96 : f32 to vector<16x128xf32>
    %205 = arith.mulf %204, %203 : vector<16x128xf32>
    %cst_97 = arith.constant 0.707106769 : f32
    %206 = vector.broadcast %cst_97 : f32 to vector<16x128xf32>
    %207 = arith.mulf %203, %206 : vector<16x128xf32>
    %208 = math.absf %207 : vector<16x128xf32>
    %cst_98 = arith.constant 0.327591091 : f32
    %209 = vector.broadcast %cst_98 : f32 to vector<16x128xf32>
    %210 = arith.mulf %209, %208 : vector<16x128xf32>
    %cst_99 = arith.constant 1.000000e+00 : f32
    %211 = vector.broadcast %cst_99 : f32 to vector<16x128xf32>
    %212 = arith.addf %211, %210 : vector<16x128xf32>
    %cst_100 = arith.constant 1.000000e+00 : f32
    %213 = vector.broadcast %cst_100 : f32 to vector<16x128xf32>
    %214 = arith.divf %213, %212 : vector<16x128xf32>
    %cst_101 = arith.constant 1.06140542 : f32
    %215 = vector.broadcast %cst_101 : f32 to vector<16x128xf32>
    %216 = arith.mulf %215, %214 : vector<16x128xf32>
    %cst_102 = arith.constant -1.45315206 : f32
    %217 = vector.broadcast %cst_102 : f32 to vector<16x128xf32>
    %218 = arith.addf %216, %217 : vector<16x128xf32>
    %219 = arith.mulf %218, %214 : vector<16x128xf32>
    %cst_103 = arith.constant 1.42141378 : f32
    %220 = vector.broadcast %cst_103 : f32 to vector<16x128xf32>
    %221 = arith.addf %219, %220 : vector<16x128xf32>
    %222 = arith.mulf %221, %214 : vector<16x128xf32>
    %cst_104 = arith.constant -0.284496725 : f32
    %223 = vector.broadcast %cst_104 : f32 to vector<16x128xf32>
    %224 = arith.addf %222, %223 : vector<16x128xf32>
    %225 = arith.mulf %224, %214 : vector<16x128xf32>
    %cst_105 = arith.constant 0.254829586 : f32
    %226 = vector.broadcast %cst_105 : f32 to vector<16x128xf32>
    %227 = arith.addf %225, %226 : vector<16x128xf32>
    %228 = arith.mulf %227, %214 : vector<16x128xf32>
    %cst_106 = arith.constant 0.000000e+00 : f32
    %229 = vector.broadcast %cst_106 : f32 to vector<16x128xf32>
    %230 = arith.subf %229, %208 : vector<16x128xf32>
    %231 = arith.mulf %230, %208 : vector<16x128xf32>
    %232 = math.exp %231 : vector<16x128xf32>
    %233 = arith.mulf %228, %232 : vector<16x128xf32>
    %cst_107 = arith.constant 1.000000e+00 : f32
    %234 = vector.broadcast %cst_107 : f32 to vector<16x128xf32>
    %235 = arith.subf %234, %233 : vector<16x128xf32>
    %cst_108 = arith.constant 0.000000e+00 : f32
    %236 = vector.broadcast %cst_108 : f32 to vector<16x128xf32>
    %237 = arith.cmpf oge, %207, %236 : vector<16x128xf32>
    %cst_109 = arith.constant 0.000000e+00 : f32
    %238 = vector.broadcast %cst_109 : f32 to vector<16x128xf32>
    %239 = arith.subf %238, %235 : vector<16x128xf32>
    %240 = arith.select %237, %235, %239 : vector<16x128xi1>, vector<16x128xf32>
    %cst_110 = arith.constant 1.000000e+00 : f32
    %241 = vector.broadcast %cst_110 : f32 to vector<16x128xf32>
    %242 = arith.addf %241, %240 : vector<16x128xf32>
    %243 = arith.mulf %205, %242 : vector<16x128xf32>
    %244 = arith.truncf %243 : vector<16x128xf32> to vector<16x128xbf16>
    %c0_111 = arith.constant 0 : index
    %c0_112 = arith.constant 0 : index
    %c0_113 = arith.constant 0 : index
    %245 = vector.load %arg20[%c0_111, %c0_112, %c0_113] : memref<2x32x128xbf16, #tpu.memory_space<vmem>>, vector<1x32x128xbf16>
    %246 = vector.shape_cast %245 : vector<1x32x128xbf16> to vector<32x128xbf16>
    %cst_114 = arith.constant dense<0.000000e+00> : vector<16x32xf32>
    %247 = tpu.matmul %244, %246, %cst_114 {dimension_numbers = #tpu.dot_dimension_numbers<[1], [1], [0], [0], [0, 0, 1, 0], [], []>} : vector<16x128xbf16>, vector<32x128xbf16>, vector<16x32xf32> -> vector<16x32xf32>
    %c0_115 = arith.constant 0 : index
    %c0_116 = arith.constant 0 : index
    %c0_117 = arith.constant 0 : index
    %248 = vector.load %arg21[%c0_115, %c0_116, %c0_117] : memref<2x1x32xf32, #tpu.memory_space<vmem>>, vector<1x1x32xf32>
    %249 = vector.shape_cast %248 : vector<1x1x32xf32> to vector<1x32xf32>
    %250 = vector.broadcast %249 : vector<1x32xf32> to vector<16x32xf32>
    %251 = arith.addf %247, %250 : vector<16x32xf32>
    %252 = arith.addf %169, %251 : vector<16x32xf32>
    %c1_118 = arith.constant 1 : index
    %c0_119 = arith.constant 0 : index
    %c0_120 = arith.constant 0 : index
    %253 = vector.load %arg6[%c1_118, %c0_119, %c0_120] : memref<2x1x32xf32, #tpu.memory_space<vmem>>, vector<1x1x32xf32>
    %254 = vector.shape_cast %253 : vector<1x1x32xf32> to vector<1x32xf32>
    %c1_121 = arith.constant 1 : index
    %c0_122 = arith.constant 0 : index
    %c0_123 = arith.constant 0 : index
    %255 = vector.load %arg7[%c1_121, %c0_122, %c0_123] : memref<2x1x32xf32, #tpu.memory_space<vmem>>, vector<1x1x32xf32>
    %256 = vector.shape_cast %255 : vector<1x1x32xf32> to vector<1x32xf32>
    %cst_124 = arith.constant dense<0.000000e+00> : vector<16xf32>
    %257 = vector.multi_reduction <add>, %252, %cst_124 [1] : vector<16x32xf32> to vector<16xf32>
    %258 = vector.shape_cast %257 : vector<16xf32> to vector<16x1xf32>
    %cst_125 = arith.constant 3.200000e+01 : f32
    %259 = vector.broadcast %cst_125 : f32 to vector<16x1xf32>
    %260 = arith.divf %258, %259 : vector<16x1xf32>
    %261 = vector.broadcast %260 : vector<16x1xf32> to vector<16x32xf32>
    %262 = arith.subf %252, %261 : vector<16x32xf32>
    %263 = arith.mulf %262, %262 : vector<16x32xf32>
    %cst_126 = arith.constant dense<0.000000e+00> : vector<16xf32>
    %264 = vector.multi_reduction <add>, %263, %cst_126 [1] : vector<16x32xf32> to vector<16xf32>
    %265 = vector.shape_cast %264 : vector<16xf32> to vector<16x1xf32>
    %cst_127 = arith.constant 3.200000e+01 : f32
    %266 = vector.broadcast %cst_127 : f32 to vector<16x1xf32>
    %267 = arith.divf %265, %266 : vector<16x1xf32>
    %268 = vector.broadcast %260 : vector<16x1xf32> to vector<16x32xf32>
    %269 = arith.subf %252, %268 : vector<16x32xf32>
    %cst_128 = arith.constant 9.99999974E-6 : f32
    %270 = vector.broadcast %cst_128 : f32 to vector<16x1xf32>
    %271 = arith.addf %267, %270 : vector<16x1xf32>
    %272 = math.rsqrt %271 : vector<16x1xf32>
    %273 = vector.broadcast %272 : vector<16x1xf32> to vector<16x32xf32>
    %274 = arith.mulf %269, %273 : vector<16x32xf32>
    %275 = vector.broadcast %254 : vector<1x32xf32> to vector<16x32xf32>
    %276 = arith.mulf %274, %275 : vector<16x32xf32>
    %277 = vector.broadcast %256 : vector<1x32xf32> to vector<16x32xf32>
    %278 = arith.addf %276, %277 : vector<16x32xf32>
    %279 = arith.truncf %278 : vector<16x32xf32> to vector<16x32xbf16>
    %c1_129 = arith.constant 1 : index
    %c0_130 = arith.constant 0 : index
    %c0_131 = arith.constant 0 : index
    %280 = vector.load %arg8[%c1_129, %c0_130, %c0_131] : memref<2x32x32xbf16, #tpu.memory_space<vmem>>, vector<1x32x32xbf16>
    %281 = vector.shape_cast %280 : vector<1x32x32xbf16> to vector<32x32xbf16>
    %cst_132 = arith.constant dense<0.000000e+00> : vector<16x32xf32>
    %282 = tpu.matmul %279, %281, %cst_132 {dimension_numbers = #tpu.dot_dimension_numbers<[1], [1], [0], [0], [0, 0, 1, 0], [], []>} : vector<16x32xbf16>, vector<32x32xbf16>, vector<16x32xf32> -> vector<16x32xf32>
    %c1_133 = arith.constant 1 : index
    %c0_134 = arith.constant 0 : index
    %c0_135 = arith.constant 0 : index
    %283 = vector.load %arg11[%c1_133, %c0_134, %c0_135] : memref<2x1x32xf32, #tpu.memory_space<vmem>>, vector<1x1x32xf32>
    %284 = vector.shape_cast %283 : vector<1x1x32xf32> to vector<1x32xf32>
    %285 = vector.broadcast %284 : vector<1x32xf32> to vector<16x32xf32>
    %286 = arith.addf %282, %285 : vector<16x32xf32>
    %c1_136 = arith.constant 1 : index
    %c0_137 = arith.constant 0 : index
    %c0_138 = arith.constant 0 : index
    %287 = vector.load %arg9[%c1_136, %c0_137, %c0_138] : memref<2x32x32xbf16, #tpu.memory_space<vmem>>, vector<1x32x32xbf16>
    %288 = vector.shape_cast %287 : vector<1x32x32xbf16> to vector<32x32xbf16>
    %cst_139 = arith.constant dense<0.000000e+00> : vector<16x32xf32>
    %289 = tpu.matmul %279, %288, %cst_139 {dimension_numbers = #tpu.dot_dimension_numbers<[1], [1], [0], [0], [0, 0, 1, 0], [], []>} : vector<16x32xbf16>, vector<32x32xbf16>, vector<16x32xf32> -> vector<16x32xf32>
    %c1_140 = arith.constant 1 : index
    %c0_141 = arith.constant 0 : index
    %c0_142 = arith.constant 0 : index
    %290 = vector.load %arg12[%c1_140, %c0_141, %c0_142] : memref<2x1x32xf32, #tpu.memory_space<vmem>>, vector<1x1x32xf32>
    %291 = vector.shape_cast %290 : vector<1x1x32xf32> to vector<1x32xf32>
    %292 = vector.broadcast %291 : vector<1x32xf32> to vector<16x32xf32>
    %293 = arith.addf %289, %292 : vector<16x32xf32>
    %c1_143 = arith.constant 1 : index
    %c0_144 = arith.constant 0 : index
    %c0_145 = arith.constant 0 : index
    %294 = vector.load %arg10[%c1_143, %c0_144, %c0_145] : memref<2x32x32xbf16, #tpu.memory_space<vmem>>, vector<1x32x32xbf16>
    %295 = vector.shape_cast %294 : vector<1x32x32xbf16> to vector<32x32xbf16>
    %cst_146 = arith.constant dense<0.000000e+00> : vector<16x32xf32>
    %296 = tpu.matmul %279, %295, %cst_146 {dimension_numbers = #tpu.dot_dimension_numbers<[1], [1], [0], [0], [0, 0, 1, 0], [], []>} : vector<16x32xbf16>, vector<32x32xbf16>, vector<16x32xf32> -> vector<16x32xf32>
    %c1_147 = arith.constant 1 : index
    %c0_148 = arith.constant 0 : index
    %c0_149 = arith.constant 0 : index
    %297 = vector.load %arg13[%c1_147, %c0_148, %c0_149] : memref<2x1x32xf32, #tpu.memory_space<vmem>>, vector<1x1x32xf32>
    %298 = vector.shape_cast %297 : vector<1x1x32xf32> to vector<1x32xf32>
    %299 = vector.broadcast %298 : vector<1x32xf32> to vector<16x32xf32>
    %300 = arith.addf %296, %299 : vector<16x32xf32>
    %301 = arith.truncf %286 : vector<16x32xf32> to vector<16x32xbf16>
    %cst_150 = arith.constant 0.000000e+00 : f32
    %302 = vector.broadcast %cst_150 : f32 to vector<16x32xf32>
    %c0_151 = arith.constant 0 : index
    %c0_152 = arith.constant 0 : index
    %c0_153 = arith.constant 0 : index
    %303 = vector.load %arg5[%c0_151, %c0_152, %c0_153] : memref<4x1x32xf32, #tpu.memory_space<vmem>>, vector<1x1x32xf32>
    %304 = vector.shape_cast %303 : vector<1x1x32xf32> to vector<1x32xf32>
    %305 = vector.broadcast %304 : vector<1x32xf32> to vector<16x32xf32>
    %306 = arith.mulf %293, %305 : vector<16x32xf32>
    %307 = arith.truncf %306 : vector<16x32xf32> to vector<16x32xbf16>
    %cst_154 = arith.constant dense<0.000000e+00> : vector<16x16xf32>
    %308 = tpu.matmul %301, %307, %cst_154 {dimension_numbers = #tpu.dot_dimension_numbers<[1], [1], [0], [0], [0, 0, 1, 0], [], []>} : vector<16x32xbf16>, vector<16x32xbf16>, vector<16x16xf32> -> vector<16x16xf32>
    %cst_155 = arith.constant 0.353553385 : f32
    %309 = vector.broadcast %cst_155 : f32 to vector<16x16xf32>
    %310 = arith.mulf %308, %309 : vector<16x16xf32>
    %311 = arith.addf %310, %0 : vector<16x16xf32>
    %cst_156 = arith.constant dense<0xFF800000> : vector<16xf32>
    %312 = vector.multi_reduction <maximumf>, %311, %cst_156 [1] : vector<16x16xf32> to vector<16xf32>
    %313 = vector.shape_cast %312 : vector<16xf32> to vector<16x1xf32>
    %314 = vector.broadcast %313 : vector<16x1xf32> to vector<16x16xf32>
    %315 = arith.subf %311, %314 : vector<16x16xf32>
    %316 = math.exp %315 : vector<16x16xf32>
    %cst_157 = arith.constant dense<0.000000e+00> : vector<16xf32>
    %317 = vector.multi_reduction <add>, %316, %cst_157 [1] : vector<16x16xf32> to vector<16xf32>
    %318 = vector.shape_cast %317 : vector<16xf32> to vector<16x1xf32>
    %319 = tpu.reciprocal %318 {approx = true} : vector<16x1xf32> -> vector<16x1xf32>
    %320 = vector.broadcast %319 : vector<16x1xf32> to vector<16x16xf32>
    %321 = arith.mulf %316, %320 : vector<16x16xf32>
    %322 = vector.broadcast %304 : vector<1x32xf32> to vector<16x32xf32>
    %323 = arith.mulf %300, %322 : vector<16x32xf32>
    %324 = arith.truncf %323 : vector<16x32xf32> to vector<16x32xbf16>
    %325 = arith.truncf %321 : vector<16x16xf32> to vector<16x16xbf16>
    %cst_158 = arith.constant dense<0.000000e+00> : vector<16x32xf32>
    %326 = tpu.matmul %325, %324, %cst_158 {dimension_numbers = #tpu.dot_dimension_numbers<[1], [0], [0], [1], [0, 0, 1, 1], [], []>} : vector<16x16xbf16>, vector<16x32xbf16>, vector<16x32xf32> -> vector<16x32xf32>
    %327 = arith.addf %302, %326 : vector<16x32xf32>
    %c1_159 = arith.constant 1 : index
    %c0_160 = arith.constant 0 : index
    %c0_161 = arith.constant 0 : index
    %328 = vector.load %arg5[%c1_159, %c0_160, %c0_161] : memref<4x1x32xf32, #tpu.memory_space<vmem>>, vector<1x1x32xf32>
    %329 = vector.shape_cast %328 : vector<1x1x32xf32> to vector<1x32xf32>
    %330 = vector.broadcast %329 : vector<1x32xf32> to vector<16x32xf32>
    %331 = arith.mulf %293, %330 : vector<16x32xf32>
    %332 = arith.truncf %331 : vector<16x32xf32> to vector<16x32xbf16>
    %cst_162 = arith.constant dense<0.000000e+00> : vector<16x16xf32>
    %333 = tpu.matmul %301, %332, %cst_162 {dimension_numbers = #tpu.dot_dimension_numbers<[1], [1], [0], [0], [0, 0, 1, 0], [], []>} : vector<16x32xbf16>, vector<16x32xbf16>, vector<16x16xf32> -> vector<16x16xf32>
    %cst_163 = arith.constant 0.353553385 : f32
    %334 = vector.broadcast %cst_163 : f32 to vector<16x16xf32>
    %335 = arith.mulf %333, %334 : vector<16x16xf32>
    %336 = arith.addf %335, %0 : vector<16x16xf32>
    %cst_164 = arith.constant dense<0xFF800000> : vector<16xf32>
    %337 = vector.multi_reduction <maximumf>, %336, %cst_164 [1] : vector<16x16xf32> to vector<16xf32>
    %338 = vector.shape_cast %337 : vector<16xf32> to vector<16x1xf32>
    %339 = vector.broadcast %338 : vector<16x1xf32> to vector<16x16xf32>
    %340 = arith.subf %336, %339 : vector<16x16xf32>
    %341 = math.exp %340 : vector<16x16xf32>
    %cst_165 = arith.constant dense<0.000000e+00> : vector<16xf32>
    %342 = vector.multi_reduction <add>, %341, %cst_165 [1] : vector<16x16xf32> to vector<16xf32>
    %343 = vector.shape_cast %342 : vector<16xf32> to vector<16x1xf32>
    %344 = tpu.reciprocal %343 {approx = true} : vector<16x1xf32> -> vector<16x1xf32>
    %345 = vector.broadcast %344 : vector<16x1xf32> to vector<16x16xf32>
    %346 = arith.mulf %341, %345 : vector<16x16xf32>
    %347 = vector.broadcast %329 : vector<1x32xf32> to vector<16x32xf32>
    %348 = arith.mulf %300, %347 : vector<16x32xf32>
    %349 = arith.truncf %348 : vector<16x32xf32> to vector<16x32xbf16>
    %350 = arith.truncf %346 : vector<16x16xf32> to vector<16x16xbf16>
    %cst_166 = arith.constant dense<0.000000e+00> : vector<16x32xf32>
    %351 = tpu.matmul %350, %349, %cst_166 {dimension_numbers = #tpu.dot_dimension_numbers<[1], [0], [0], [1], [0, 0, 1, 1], [], []>} : vector<16x16xbf16>, vector<16x32xbf16>, vector<16x32xf32> -> vector<16x32xf32>
    %352 = arith.addf %327, %351 : vector<16x32xf32>
    %c2_167 = arith.constant 2 : index
    %c0_168 = arith.constant 0 : index
    %c0_169 = arith.constant 0 : index
    %353 = vector.load %arg5[%c2_167, %c0_168, %c0_169] : memref<4x1x32xf32, #tpu.memory_space<vmem>>, vector<1x1x32xf32>
    %354 = vector.shape_cast %353 : vector<1x1x32xf32> to vector<1x32xf32>
    %355 = vector.broadcast %354 : vector<1x32xf32> to vector<16x32xf32>
    %356 = arith.mulf %293, %355 : vector<16x32xf32>
    %357 = arith.truncf %356 : vector<16x32xf32> to vector<16x32xbf16>
    %cst_170 = arith.constant dense<0.000000e+00> : vector<16x16xf32>
    %358 = tpu.matmul %301, %357, %cst_170 {dimension_numbers = #tpu.dot_dimension_numbers<[1], [1], [0], [0], [0, 0, 1, 0], [], []>} : vector<16x32xbf16>, vector<16x32xbf16>, vector<16x16xf32> -> vector<16x16xf32>
    %cst_171 = arith.constant 0.353553385 : f32
    %359 = vector.broadcast %cst_171 : f32 to vector<16x16xf32>
    %360 = arith.mulf %358, %359 : vector<16x16xf32>
    %361 = arith.addf %360, %0 : vector<16x16xf32>
    %cst_172 = arith.constant dense<0xFF800000> : vector<16xf32>
    %362 = vector.multi_reduction <maximumf>, %361, %cst_172 [1] : vector<16x16xf32> to vector<16xf32>
    %363 = vector.shape_cast %362 : vector<16xf32> to vector<16x1xf32>
    %364 = vector.broadcast %363 : vector<16x1xf32> to vector<16x16xf32>
    %365 = arith.subf %361, %364 : vector<16x16xf32>
    %366 = math.exp %365 : vector<16x16xf32>
    %cst_173 = arith.constant dense<0.000000e+00> : vector<16xf32>
    %367 = vector.multi_reduction <add>, %366, %cst_173 [1] : vector<16x16xf32> to vector<16xf32>
    %368 = vector.shape_cast %367 : vector<16xf32> to vector<16x1xf32>
    %369 = tpu.reciprocal %368 {approx = true} : vector<16x1xf32> -> vector<16x1xf32>
    %370 = vector.broadcast %369 : vector<16x1xf32> to vector<16x16xf32>
    %371 = arith.mulf %366, %370 : vector<16x16xf32>
    %372 = vector.broadcast %354 : vector<1x32xf32> to vector<16x32xf32>
    %373 = arith.mulf %300, %372 : vector<16x32xf32>
    %374 = arith.truncf %373 : vector<16x32xf32> to vector<16x32xbf16>
    %375 = arith.truncf %371 : vector<16x16xf32> to vector<16x16xbf16>
    %cst_174 = arith.constant dense<0.000000e+00> : vector<16x32xf32>
    %376 = tpu.matmul %375, %374, %cst_174 {dimension_numbers = #tpu.dot_dimension_numbers<[1], [0], [0], [1], [0, 0, 1, 1], [], []>} : vector<16x16xbf16>, vector<16x32xbf16>, vector<16x32xf32> -> vector<16x32xf32>
    %377 = arith.addf %352, %376 : vector<16x32xf32>
    %c3_175 = arith.constant 3 : index
    %c0_176 = arith.constant 0 : index
    %c0_177 = arith.constant 0 : index
    %378 = vector.load %arg5[%c3_175, %c0_176, %c0_177] : memref<4x1x32xf32, #tpu.memory_space<vmem>>, vector<1x1x32xf32>
    %379 = vector.shape_cast %378 : vector<1x1x32xf32> to vector<1x32xf32>
    %380 = vector.broadcast %379 : vector<1x32xf32> to vector<16x32xf32>
    %381 = arith.mulf %293, %380 : vector<16x32xf32>
    %382 = arith.truncf %381 : vector<16x32xf32> to vector<16x32xbf16>
    %cst_178 = arith.constant dense<0.000000e+00> : vector<16x16xf32>
    %383 = tpu.matmul %301, %382, %cst_178 {dimension_numbers = #tpu.dot_dimension_numbers<[1], [1], [0], [0], [0, 0, 1, 0], [], []>} : vector<16x32xbf16>, vector<16x32xbf16>, vector<16x16xf32> -> vector<16x16xf32>
    %cst_179 = arith.constant 0.353553385 : f32
    %384 = vector.broadcast %cst_179 : f32 to vector<16x16xf32>
    %385 = arith.mulf %383, %384 : vector<16x16xf32>
    %386 = arith.addf %385, %0 : vector<16x16xf32>
    %cst_180 = arith.constant dense<0xFF800000> : vector<16xf32>
    %387 = vector.multi_reduction <maximumf>, %386, %cst_180 [1] : vector<16x16xf32> to vector<16xf32>
    %388 = vector.shape_cast %387 : vector<16xf32> to vector<16x1xf32>
    %389 = vector.broadcast %388 : vector<16x1xf32> to vector<16x16xf32>
    %390 = arith.subf %386, %389 : vector<16x16xf32>
    %391 = math.exp %390 : vector<16x16xf32>
    %cst_181 = arith.constant dense<0.000000e+00> : vector<16xf32>
    %392 = vector.multi_reduction <add>, %391, %cst_181 [1] : vector<16x16xf32> to vector<16xf32>
    %393 = vector.shape_cast %392 : vector<16xf32> to vector<16x1xf32>
    %394 = tpu.reciprocal %393 {approx = true} : vector<16x1xf32> -> vector<16x1xf32>
    %395 = vector.broadcast %394 : vector<16x1xf32> to vector<16x16xf32>
    %396 = arith.mulf %391, %395 : vector<16x16xf32>
    %397 = vector.broadcast %379 : vector<1x32xf32> to vector<16x32xf32>
    %398 = arith.mulf %300, %397 : vector<16x32xf32>
    %399 = arith.truncf %398 : vector<16x32xf32> to vector<16x32xbf16>
    %400 = arith.truncf %396 : vector<16x16xf32> to vector<16x16xbf16>
    %cst_182 = arith.constant dense<0.000000e+00> : vector<16x32xf32>
    %401 = tpu.matmul %400, %399, %cst_182 {dimension_numbers = #tpu.dot_dimension_numbers<[1], [0], [0], [1], [0, 0, 1, 1], [], []>} : vector<16x16xbf16>, vector<16x32xbf16>, vector<16x32xf32> -> vector<16x32xf32>
    %402 = arith.addf %377, %401 : vector<16x32xf32>
    %403 = arith.truncf %402 : vector<16x32xf32> to vector<16x32xbf16>
    %c1_183 = arith.constant 1 : index
    %c0_184 = arith.constant 0 : index
    %c0_185 = arith.constant 0 : index
    %404 = vector.load %arg14[%c1_183, %c0_184, %c0_185] : memref<2x32x32xbf16, #tpu.memory_space<vmem>>, vector<1x32x32xbf16>
    %405 = vector.shape_cast %404 : vector<1x32x32xbf16> to vector<32x32xbf16>
    %cst_186 = arith.constant dense<0.000000e+00> : vector<16x32xf32>
    %406 = tpu.matmul %403, %405, %cst_186 {dimension_numbers = #tpu.dot_dimension_numbers<[1], [1], [0], [0], [0, 0, 1, 0], [], []>} : vector<16x32xbf16>, vector<32x32xbf16>, vector<16x32xf32> -> vector<16x32xf32>
    %c1_187 = arith.constant 1 : index
    %c0_188 = arith.constant 0 : index
    %c0_189 = arith.constant 0 : index
    %407 = vector.load %arg15[%c1_187, %c0_188, %c0_189] : memref<2x1x32xf32, #tpu.memory_space<vmem>>, vector<1x1x32xf32>
    %408 = vector.shape_cast %407 : vector<1x1x32xf32> to vector<1x32xf32>
    %409 = vector.broadcast %408 : vector<1x32xf32> to vector<16x32xf32>
    %410 = arith.addf %406, %409 : vector<16x32xf32>
    %411 = arith.addf %252, %410 : vector<16x32xf32>
    %c1_190 = arith.constant 1 : index
    %c0_191 = arith.constant 0 : index
    %c0_192 = arith.constant 0 : index
    %412 = vector.load %arg16[%c1_190, %c0_191, %c0_192] : memref<2x1x32xf32, #tpu.memory_space<vmem>>, vector<1x1x32xf32>
    %413 = vector.shape_cast %412 : vector<1x1x32xf32> to vector<1x32xf32>
    %c1_193 = arith.constant 1 : index
    %c0_194 = arith.constant 0 : index
    %c0_195 = arith.constant 0 : index
    %414 = vector.load %arg17[%c1_193, %c0_194, %c0_195] : memref<2x1x32xf32, #tpu.memory_space<vmem>>, vector<1x1x32xf32>
    %415 = vector.shape_cast %414 : vector<1x1x32xf32> to vector<1x32xf32>
    %cst_196 = arith.constant dense<0.000000e+00> : vector<16xf32>
    %416 = vector.multi_reduction <add>, %411, %cst_196 [1] : vector<16x32xf32> to vector<16xf32>
    %417 = vector.shape_cast %416 : vector<16xf32> to vector<16x1xf32>
    %cst_197 = arith.constant 3.200000e+01 : f32
    %418 = vector.broadcast %cst_197 : f32 to vector<16x1xf32>
    %419 = arith.divf %417, %418 : vector<16x1xf32>
    %420 = vector.broadcast %419 : vector<16x1xf32> to vector<16x32xf32>
    %421 = arith.subf %411, %420 : vector<16x32xf32>
    %422 = arith.mulf %421, %421 : vector<16x32xf32>
    %cst_198 = arith.constant dense<0.000000e+00> : vector<16xf32>
    %423 = vector.multi_reduction <add>, %422, %cst_198 [1] : vector<16x32xf32> to vector<16xf32>
    %424 = vector.shape_cast %423 : vector<16xf32> to vector<16x1xf32>
    %cst_199 = arith.constant 3.200000e+01 : f32
    %425 = vector.broadcast %cst_199 : f32 to vector<16x1xf32>
    %426 = arith.divf %424, %425 : vector<16x1xf32>
    %427 = vector.broadcast %419 : vector<16x1xf32> to vector<16x32xf32>
    %428 = arith.subf %411, %427 : vector<16x32xf32>
    %cst_200 = arith.constant 9.99999974E-6 : f32
    %429 = vector.broadcast %cst_200 : f32 to vector<16x1xf32>
    %430 = arith.addf %426, %429 : vector<16x1xf32>
    %431 = math.rsqrt %430 : vector<16x1xf32>
    %432 = vector.broadcast %431 : vector<16x1xf32> to vector<16x32xf32>
    %433 = arith.mulf %428, %432 : vector<16x32xf32>
    %434 = vector.broadcast %413 : vector<1x32xf32> to vector<16x32xf32>
    %435 = arith.mulf %433, %434 : vector<16x32xf32>
    %436 = vector.broadcast %415 : vector<1x32xf32> to vector<16x32xf32>
    %437 = arith.addf %435, %436 : vector<16x32xf32>
    %438 = arith.truncf %437 : vector<16x32xf32> to vector<16x32xbf16>
    %c1_201 = arith.constant 1 : index
    %c0_202 = arith.constant 0 : index
    %c0_203 = arith.constant 0 : index
    %439 = vector.load %arg18[%c1_201, %c0_202, %c0_203] : memref<2x128x32xbf16, #tpu.memory_space<vmem>>, vector<1x128x32xbf16>
    %440 = vector.shape_cast %439 : vector<1x128x32xbf16> to vector<128x32xbf16>
    %cst_204 = arith.constant dense<0.000000e+00> : vector<16x128xf32>
    %441 = tpu.matmul %438, %440, %cst_204 {dimension_numbers = #tpu.dot_dimension_numbers<[1], [1], [0], [0], [0, 0, 1, 0], [], []>} : vector<16x32xbf16>, vector<128x32xbf16>, vector<16x128xf32> -> vector<16x128xf32>
    %c1_205 = arith.constant 1 : index
    %c0_206 = arith.constant 0 : index
    %c0_207 = arith.constant 0 : index
    %442 = vector.load %arg19[%c1_205, %c0_206, %c0_207] : memref<2x1x128xf32, #tpu.memory_space<vmem>>, vector<1x1x128xf32>
    %443 = vector.shape_cast %442 : vector<1x1x128xf32> to vector<1x128xf32>
    %444 = vector.broadcast %443 : vector<1x128xf32> to vector<16x128xf32>
    %445 = arith.addf %441, %444 : vector<16x128xf32>
    %cst_208 = arith.constant 5.000000e-01 : f32
    %446 = vector.broadcast %cst_208 : f32 to vector<16x128xf32>
    %447 = arith.mulf %446, %445 : vector<16x128xf32>
    %cst_209 = arith.constant 0.707106769 : f32
    %448 = vector.broadcast %cst_209 : f32 to vector<16x128xf32>
    %449 = arith.mulf %445, %448 : vector<16x128xf32>
    %450 = math.absf %449 : vector<16x128xf32>
    %cst_210 = arith.constant 0.327591091 : f32
    %451 = vector.broadcast %cst_210 : f32 to vector<16x128xf32>
    %452 = arith.mulf %451, %450 : vector<16x128xf32>
    %cst_211 = arith.constant 1.000000e+00 : f32
    %453 = vector.broadcast %cst_211 : f32 to vector<16x128xf32>
    %454 = arith.addf %453, %452 : vector<16x128xf32>
    %cst_212 = arith.constant 1.000000e+00 : f32
    %455 = vector.broadcast %cst_212 : f32 to vector<16x128xf32>
    %456 = arith.divf %455, %454 : vector<16x128xf32>
    %cst_213 = arith.constant 1.06140542 : f32
    %457 = vector.broadcast %cst_213 : f32 to vector<16x128xf32>
    %458 = arith.mulf %457, %456 : vector<16x128xf32>
    %cst_214 = arith.constant -1.45315206 : f32
    %459 = vector.broadcast %cst_214 : f32 to vector<16x128xf32>
    %460 = arith.addf %458, %459 : vector<16x128xf32>
    %461 = arith.mulf %460, %456 : vector<16x128xf32>
    %cst_215 = arith.constant 1.42141378 : f32
    %462 = vector.broadcast %cst_215 : f32 to vector<16x128xf32>
    %463 = arith.addf %461, %462 : vector<16x128xf32>
    %464 = arith.mulf %463, %456 : vector<16x128xf32>
    %cst_216 = arith.constant -0.284496725 : f32
    %465 = vector.broadcast %cst_216 : f32 to vector<16x128xf32>
    %466 = arith.addf %464, %465 : vector<16x128xf32>
    %467 = arith.mulf %466, %456 : vector<16x128xf32>
    %cst_217 = arith.constant 0.254829586 : f32
    %468 = vector.broadcast %cst_217 : f32 to vector<16x128xf32>
    %469 = arith.addf %467, %468 : vector<16x128xf32>
    %470 = arith.mulf %469, %456 : vector<16x128xf32>
    %cst_218 = arith.constant 0.000000e+00 : f32
    %471 = vector.broadcast %cst_218 : f32 to vector<16x128xf32>
    %472 = arith.subf %471, %450 : vector<16x128xf32>
    %473 = arith.mulf %472, %450 : vector<16x128xf32>
    %474 = math.exp %473 : vector<16x128xf32>
    %475 = arith.mulf %470, %474 : vector<16x128xf32>
    %cst_219 = arith.constant 1.000000e+00 : f32
    %476 = vector.broadcast %cst_219 : f32 to vector<16x128xf32>
    %477 = arith.subf %476, %475 : vector<16x128xf32>
    %cst_220 = arith.constant 0.000000e+00 : f32
    %478 = vector.broadcast %cst_220 : f32 to vector<16x128xf32>
    %479 = arith.cmpf oge, %449, %478 : vector<16x128xf32>
    %cst_221 = arith.constant 0.000000e+00 : f32
    %480 = vector.broadcast %cst_221 : f32 to vector<16x128xf32>
    %481 = arith.subf %480, %477 : vector<16x128xf32>
    %482 = arith.select %479, %477, %481 : vector<16x128xi1>, vector<16x128xf32>
    %cst_222 = arith.constant 1.000000e+00 : f32
    %483 = vector.broadcast %cst_222 : f32 to vector<16x128xf32>
    %484 = arith.addf %483, %482 : vector<16x128xf32>
    %485 = arith.mulf %447, %484 : vector<16x128xf32>
    %486 = arith.truncf %485 : vector<16x128xf32> to vector<16x128xbf16>
    %c1_223 = arith.constant 1 : index
    %c0_224 = arith.constant 0 : index
    %c0_225 = arith.constant 0 : index
    %487 = vector.load %arg20[%c1_223, %c0_224, %c0_225] : memref<2x32x128xbf16, #tpu.memory_space<vmem>>, vector<1x32x128xbf16>
    %488 = vector.shape_cast %487 : vector<1x32x128xbf16> to vector<32x128xbf16>
    %cst_226 = arith.constant dense<0.000000e+00> : vector<16x32xf32>
    %489 = tpu.matmul %486, %488, %cst_226 {dimension_numbers = #tpu.dot_dimension_numbers<[1], [1], [0], [0], [0, 0, 1, 0], [], []>} : vector<16x128xbf16>, vector<32x128xbf16>, vector<16x32xf32> -> vector<16x32xf32>
    %c1_227 = arith.constant 1 : index
    %c0_228 = arith.constant 0 : index
    %c0_229 = arith.constant 0 : index
    %490 = vector.load %arg21[%c1_227, %c0_228, %c0_229] : memref<2x1x32xf32, #tpu.memory_space<vmem>>, vector<1x1x32xf32>
    %491 = vector.shape_cast %490 : vector<1x1x32xf32> to vector<1x32xf32>
    %492 = vector.broadcast %491 : vector<1x32xf32> to vector<16x32xf32>
    %493 = arith.addf %489, %492 : vector<16x32xf32>
    %494 = arith.addf %411, %493 : vector<16x32xf32>
    %c0_230 = arith.constant 0 : index
    %c0_231 = arith.constant 0 : index
    %495 = vector.load %arg22[%c0_230, %c0_231] : memref<1x32xf32, #tpu.memory_space<vmem>>, vector<1x32xf32>
    %c0_232 = arith.constant 0 : index
    %c0_233 = arith.constant 0 : index
    %496 = vector.load %arg23[%c0_232, %c0_233] : memref<1x32xf32, #tpu.memory_space<vmem>>, vector<1x32xf32>
    %cst_234 = arith.constant dense<0.000000e+00> : vector<16xf32>
    %497 = vector.multi_reduction <add>, %494, %cst_234 [1] : vector<16x32xf32> to vector<16xf32>
    %498 = vector.shape_cast %497 : vector<16xf32> to vector<16x1xf32>
    %cst_235 = arith.constant 3.200000e+01 : f32
    %499 = vector.broadcast %cst_235 : f32 to vector<16x1xf32>
    %500 = arith.divf %498, %499 : vector<16x1xf32>
    %501 = vector.broadcast %500 : vector<16x1xf32> to vector<16x32xf32>
    %502 = arith.subf %494, %501 : vector<16x32xf32>
    %503 = arith.mulf %502, %502 : vector<16x32xf32>
    %cst_236 = arith.constant dense<0.000000e+00> : vector<16xf32>
    %504 = vector.multi_reduction <add>, %503, %cst_236 [1] : vector<16x32xf32> to vector<16xf32>
    %505 = vector.shape_cast %504 : vector<16xf32> to vector<16x1xf32>
    %cst_237 = arith.constant 3.200000e+01 : f32
    %506 = vector.broadcast %cst_237 : f32 to vector<16x1xf32>
    %507 = arith.divf %505, %506 : vector<16x1xf32>
    %508 = vector.broadcast %500 : vector<16x1xf32> to vector<16x32xf32>
    %509 = arith.subf %494, %508 : vector<16x32xf32>
    %cst_238 = arith.constant 9.99999974E-6 : f32
    %510 = vector.broadcast %cst_238 : f32 to vector<16x1xf32>
    %511 = arith.addf %507, %510 : vector<16x1xf32>
    %512 = math.rsqrt %511 : vector<16x1xf32>
    %513 = vector.broadcast %512 : vector<16x1xf32> to vector<16x32xf32>
    %514 = arith.mulf %509, %513 : vector<16x32xf32>
    %515 = vector.broadcast %495 : vector<1x32xf32> to vector<16x32xf32>
    %516 = arith.mulf %514, %515 : vector<16x32xf32>
    %517 = vector.broadcast %496 : vector<1x32xf32> to vector<16x32xf32>
    %518 = arith.addf %516, %517 : vector<16x32xf32>
    %519 = vector.extract_strided_slice %518 {offsets = [0, 0], sizes = [8, 32], strides = [1, 1]} : vector<16x32xf32> to vector<8x32xf32>
    %cst_239 = arith.constant dense<0.000000e+00> : vector<32xf32>
    %520 = vector.multi_reduction <add>, %519, %cst_239 [0] : vector<8x32xf32> to vector<32xf32>
    %521 = vector.shape_cast %520 : vector<32xf32> to vector<1x32xf32>
    %cst_240 = arith.constant 8.000000e+00 : f32
    %522 = vector.broadcast %cst_240 : f32 to vector<1x32xf32>
    %523 = arith.divf %521, %522 : vector<1x32xf32>
    %cst_241 = arith.constant dense<0xFF800000> : vector<32xf32>
    %524 = vector.multi_reduction <maximumf>, %519, %cst_241 [0] : vector<8x32xf32> to vector<32xf32>
    %525 = vector.shape_cast %524 : vector<32xf32> to vector<1x32xf32>
    %526 = arith.truncf %523 : vector<1x32xf32> to vector<1x32xbf16>
    %c0_242 = arith.constant 0 : index
    %c0_243 = arith.constant 0 : index
    %527 = vector.load %arg24[%c0_242, %c0_243] : memref<32x32xbf16, #tpu.memory_space<vmem>>, vector<32x32xbf16>
    %cst_244 = arith.constant dense<0.000000e+00> : vector<1x32xf32>
    %528 = tpu.matmul %526, %527, %cst_244 {dimension_numbers = #tpu.dot_dimension_numbers<[1], [1], [0], [0], [0, 0, 1, 0], [], []>} : vector<1x32xbf16>, vector<32x32xbf16>, vector<1x32xf32> -> vector<1x32xf32>
    %529 = arith.truncf %525 : vector<1x32xf32> to vector<1x32xbf16>
    %c0_245 = arith.constant 0 : index
    %c0_246 = arith.constant 0 : index
    %530 = vector.load %arg25[%c0_245, %c0_246] : memref<32x32xbf16, #tpu.memory_space<vmem>>, vector<32x32xbf16>
    %cst_247 = arith.constant dense<0.000000e+00> : vector<1x32xf32>
    %531 = tpu.matmul %529, %530, %cst_247 {dimension_numbers = #tpu.dot_dimension_numbers<[1], [1], [0], [0], [0, 0, 1, 0], [], []>} : vector<1x32xbf16>, vector<32x32xbf16>, vector<1x32xf32> -> vector<1x32xf32>
    %532 = arith.addf %528, %531 : vector<1x32xf32>
    %c0_248 = arith.constant 0 : index
    %c0_249 = arith.constant 0 : index
    %533 = vector.load %arg26[%c0_248, %c0_249] : memref<1x32xf32, #tpu.memory_space<vmem>>, vector<1x32xf32>
    %534 = arith.addf %532, %533 : vector<1x32xf32>
    %cst_250 = arith.constant 5.000000e-01 : f32
    %535 = vector.broadcast %cst_250 : f32 to vector<1x32xf32>
    %536 = arith.mulf %535, %534 : vector<1x32xf32>
    %cst_251 = arith.constant 0.707106769 : f32
    %537 = vector.broadcast %cst_251 : f32 to vector<1x32xf32>
    %538 = arith.mulf %534, %537 : vector<1x32xf32>
    %539 = math.absf %538 : vector<1x32xf32>
    %cst_252 = arith.constant 0.327591091 : f32
    %540 = vector.broadcast %cst_252 : f32 to vector<1x32xf32>
    %541 = arith.mulf %540, %539 : vector<1x32xf32>
    %cst_253 = arith.constant 1.000000e+00 : f32
    %542 = vector.broadcast %cst_253 : f32 to vector<1x32xf32>
    %543 = arith.addf %542, %541 : vector<1x32xf32>
    %cst_254 = arith.constant 1.000000e+00 : f32
    %544 = vector.broadcast %cst_254 : f32 to vector<1x32xf32>
    %545 = arith.divf %544, %543 : vector<1x32xf32>
    %cst_255 = arith.constant 1.06140542 : f32
    %546 = vector.broadcast %cst_255 : f32 to vector<1x32xf32>
    %547 = arith.mulf %546, %545 : vector<1x32xf32>
    %cst_256 = arith.constant -1.45315206 : f32
    %548 = vector.broadcast %cst_256 : f32 to vector<1x32xf32>
    %549 = arith.addf %547, %548 : vector<1x32xf32>
    %550 = arith.mulf %549, %545 : vector<1x32xf32>
    %cst_257 = arith.constant 1.42141378 : f32
    %551 = vector.broadcast %cst_257 : f32 to vector<1x32xf32>
    %552 = arith.addf %550, %551 : vector<1x32xf32>
    %553 = arith.mulf %552, %545 : vector<1x32xf32>
    %cst_258 = arith.constant -0.284496725 : f32
    %554 = vector.broadcast %cst_258 : f32 to vector<1x32xf32>
    %555 = arith.addf %553, %554 : vector<1x32xf32>
    %556 = arith.mulf %555, %545 : vector<1x32xf32>
    %cst_259 = arith.constant 0.254829586 : f32
    %557 = vector.broadcast %cst_259 : f32 to vector<1x32xf32>
    %558 = arith.addf %556, %557 : vector<1x32xf32>
    %559 = arith.mulf %558, %545 : vector<1x32xf32>
    %cst_260 = arith.constant 0.000000e+00 : f32
    %560 = vector.broadcast %cst_260 : f32 to vector<1x32xf32>
    %561 = arith.subf %560, %539 : vector<1x32xf32>
    %562 = arith.mulf %561, %539 : vector<1x32xf32>
    %563 = math.exp %562 : vector<1x32xf32>
    %564 = arith.mulf %559, %563 : vector<1x32xf32>
    %cst_261 = arith.constant 1.000000e+00 : f32
    %565 = vector.broadcast %cst_261 : f32 to vector<1x32xf32>
    %566 = arith.subf %565, %564 : vector<1x32xf32>
    %cst_262 = arith.constant 0.000000e+00 : f32
    %567 = vector.broadcast %cst_262 : f32 to vector<1x32xf32>
    %568 = arith.cmpf oge, %538, %567 : vector<1x32xf32>
    %cst_263 = arith.constant 0.000000e+00 : f32
    %569 = vector.broadcast %cst_263 : f32 to vector<1x32xf32>
    %570 = arith.subf %569, %566 : vector<1x32xf32>
    %571 = arith.select %568, %566, %570 : vector<1x32xi1>, vector<1x32xf32>
    %cst_264 = arith.constant 1.000000e+00 : f32
    %572 = vector.broadcast %cst_264 : f32 to vector<1x32xf32>
    %573 = arith.addf %572, %571 : vector<1x32xf32>
    %574 = arith.mulf %536, %573 : vector<1x32xf32>
    %575 = arith.truncf %574 : vector<1x32xf32> to vector<1x32xbf16>
    %c0_265 = arith.constant 0 : index
    %c0_266 = arith.constant 0 : index
    %576 = vector.load %arg27[%c0_265, %c0_266] : memref<32x32xbf16, #tpu.memory_space<vmem>>, vector<32x32xbf16>
    %cst_267 = arith.constant dense<0.000000e+00> : vector<1x32xf32>
    %577 = tpu.matmul %575, %576, %cst_267 {dimension_numbers = #tpu.dot_dimension_numbers<[1], [1], [0], [0], [0, 0, 1, 0], [], []>} : vector<1x32xbf16>, vector<32x32xbf16>, vector<1x32xf32> -> vector<1x32xf32>
    %c0_268 = arith.constant 0 : index
    %c0_269 = arith.constant 0 : index
    %578 = vector.load %arg28[%c0_268, %c0_269] : memref<1x32xf32, #tpu.memory_space<vmem>>, vector<1x32xf32>
    %579 = arith.addf %577, %578 : vector<1x32xf32>
    %580 = vector.extract_strided_slice %518 {offsets = [8, 0], sizes = [8, 32], strides = [1, 1]} : vector<16x32xf32> to vector<8x32xf32>
    %cst_270 = arith.constant dense<0.000000e+00> : vector<32xf32>
    %581 = vector.multi_reduction <add>, %580, %cst_270 [0] : vector<8x32xf32> to vector<32xf32>
    %582 = vector.shape_cast %581 : vector<32xf32> to vector<1x32xf32>
    %cst_271 = arith.constant 8.000000e+00 : f32
    %583 = vector.broadcast %cst_271 : f32 to vector<1x32xf32>
    %584 = arith.divf %582, %583 : vector<1x32xf32>
    %cst_272 = arith.constant dense<0xFF800000> : vector<32xf32>
    %585 = vector.multi_reduction <maximumf>, %580, %cst_272 [0] : vector<8x32xf32> to vector<32xf32>
    %586 = vector.shape_cast %585 : vector<32xf32> to vector<1x32xf32>
    %587 = arith.truncf %584 : vector<1x32xf32> to vector<1x32xbf16>
    %c0_273 = arith.constant 0 : index
    %c0_274 = arith.constant 0 : index
    %588 = vector.load %arg24[%c0_273, %c0_274] : memref<32x32xbf16, #tpu.memory_space<vmem>>, vector<32x32xbf16>
    %cst_275 = arith.constant dense<0.000000e+00> : vector<1x32xf32>
    %589 = tpu.matmul %587, %588, %cst_275 {dimension_numbers = #tpu.dot_dimension_numbers<[1], [1], [0], [0], [0, 0, 1, 0], [], []>} : vector<1x32xbf16>, vector<32x32xbf16>, vector<1x32xf32> -> vector<1x32xf32>
    %590 = arith.truncf %586 : vector<1x32xf32> to vector<1x32xbf16>
    %c0_276 = arith.constant 0 : index
    %c0_277 = arith.constant 0 : index
    %591 = vector.load %arg25[%c0_276, %c0_277] : memref<32x32xbf16, #tpu.memory_space<vmem>>, vector<32x32xbf16>
    %cst_278 = arith.constant dense<0.000000e+00> : vector<1x32xf32>
    %592 = tpu.matmul %590, %591, %cst_278 {dimension_numbers = #tpu.dot_dimension_numbers<[1], [1], [0], [0], [0, 0, 1, 0], [], []>} : vector<1x32xbf16>, vector<32x32xbf16>, vector<1x32xf32> -> vector<1x32xf32>
    %593 = arith.addf %589, %592 : vector<1x32xf32>
    %c0_279 = arith.constant 0 : index
    %c0_280 = arith.constant 0 : index
    %594 = vector.load %arg26[%c0_279, %c0_280] : memref<1x32xf32, #tpu.memory_space<vmem>>, vector<1x32xf32>
    %595 = arith.addf %593, %594 : vector<1x32xf32>
    %cst_281 = arith.constant 5.000000e-01 : f32
    %596 = vector.broadcast %cst_281 : f32 to vector<1x32xf32>
    %597 = arith.mulf %596, %595 : vector<1x32xf32>
    %cst_282 = arith.constant 0.707106769 : f32
    %598 = vector.broadcast %cst_282 : f32 to vector<1x32xf32>
    %599 = arith.mulf %595, %598 : vector<1x32xf32>
    %600 = math.absf %599 : vector<1x32xf32>
    %cst_283 = arith.constant 0.327591091 : f32
    %601 = vector.broadcast %cst_283 : f32 to vector<1x32xf32>
    %602 = arith.mulf %601, %600 : vector<1x32xf32>
    %cst_284 = arith.constant 1.000000e+00 : f32
    %603 = vector.broadcast %cst_284 : f32 to vector<1x32xf32>
    %604 = arith.addf %603, %602 : vector<1x32xf32>
    %cst_285 = arith.constant 1.000000e+00 : f32
    %605 = vector.broadcast %cst_285 : f32 to vector<1x32xf32>
    %606 = arith.divf %605, %604 : vector<1x32xf32>
    %cst_286 = arith.constant 1.06140542 : f32
    %607 = vector.broadcast %cst_286 : f32 to vector<1x32xf32>
    %608 = arith.mulf %607, %606 : vector<1x32xf32>
    %cst_287 = arith.constant -1.45315206 : f32
    %609 = vector.broadcast %cst_287 : f32 to vector<1x32xf32>
    %610 = arith.addf %608, %609 : vector<1x32xf32>
    %611 = arith.mulf %610, %606 : vector<1x32xf32>
    %cst_288 = arith.constant 1.42141378 : f32
    %612 = vector.broadcast %cst_288 : f32 to vector<1x32xf32>
    %613 = arith.addf %611, %612 : vector<1x32xf32>
    %614 = arith.mulf %613, %606 : vector<1x32xf32>
    %cst_289 = arith.constant -0.284496725 : f32
    %615 = vector.broadcast %cst_289 : f32 to vector<1x32xf32>
    %616 = arith.addf %614, %615 : vector<1x32xf32>
    %617 = arith.mulf %616, %606 : vector<1x32xf32>
    %cst_290 = arith.constant 0.254829586 : f32
    %618 = vector.broadcast %cst_290 : f32 to vector<1x32xf32>
    %619 = arith.addf %617, %618 : vector<1x32xf32>
    %620 = arith.mulf %619, %606 : vector<1x32xf32>
    %cst_291 = arith.constant 0.000000e+00 : f32
    %621 = vector.broadcast %cst_291 : f32 to vector<1x32xf32>
    %622 = arith.subf %621, %600 : vector<1x32xf32>
    %623 = arith.mulf %622, %600 : vector<1x32xf32>
    %624 = math.exp %623 : vector<1x32xf32>
    %625 = arith.mulf %620, %624 : vector<1x32xf32>
    %cst_292 = arith.constant 1.000000e+00 : f32
    %626 = vector.broadcast %cst_292 : f32 to vector<1x32xf32>
    %627 = arith.subf %626, %625 : vector<1x32xf32>
    %cst_293 = arith.constant 0.000000e+00 : f32
    %628 = vector.broadcast %cst_293 : f32 to vector<1x32xf32>
    %629 = arith.cmpf oge, %599, %628 : vector<1x32xf32>
    %cst_294 = arith.constant 0.000000e+00 : f32
    %630 = vector.broadcast %cst_294 : f32 to vector<1x32xf32>
    %631 = arith.subf %630, %627 : vector<1x32xf32>
    %632 = arith.select %629, %627, %631 : vector<1x32xi1>, vector<1x32xf32>
    %cst_295 = arith.constant 1.000000e+00 : f32
    %633 = vector.broadcast %cst_295 : f32 to vector<1x32xf32>
    %634 = arith.addf %633, %632 : vector<1x32xf32>
    %635 = arith.mulf %597, %634 : vector<1x32xf32>
    %636 = arith.truncf %635 : vector<1x32xf32> to vector<1x32xbf16>
    %c0_296 = arith.constant 0 : index
    %c0_297 = arith.constant 0 : index
    %637 = vector.load %arg27[%c0_296, %c0_297] : memref<32x32xbf16, #tpu.memory_space<vmem>>, vector<32x32xbf16>
    %cst_298 = arith.constant dense<0.000000e+00> : vector<1x32xf32>
    %638 = tpu.matmul %636, %637, %cst_298 {dimension_numbers = #tpu.dot_dimension_numbers<[1], [1], [0], [0], [0, 0, 1, 0], [], []>} : vector<1x32xbf16>, vector<32x32xbf16>, vector<1x32xf32> -> vector<1x32xf32>
    %c0_299 = arith.constant 0 : index
    %c0_300 = arith.constant 0 : index
    %639 = vector.load %arg28[%c0_299, %c0_300] : memref<1x32xf32, #tpu.memory_space<vmem>>, vector<1x32xf32>
    %640 = arith.addf %638, %639 : vector<1x32xf32>
    %641 = tpu.concatenate %579, %640 in 0 : vector<1x32xf32>, vector<1x32xf32> -> vector<2x32xf32>
    %c0_301 = arith.constant 0 : index
    %c0_302 = arith.constant 0 : index
    %642 = vector.load %arg29[%c0_301, %c0_302] : memref<2x32xf32, #tpu.memory_space<vmem>>, vector<2x32xf32>
    tpu.vector_store %arg29[%c0_301, %c0_302], %641 {strides = array<i32>} : memref<2x32xf32, #tpu.memory_space<vmem>>, vector<2x32xf32>,
    return
  }
}

</mosaic_0001>

<bundles_post_ra>
// kernel: eq.15
= control target key start
LH: loop header
LB: loop body
LE: loop exit
PB: predicated region body
PF: predicated region fallthrough
CT: control target
= control target key end

     0   :  { %vm8_vm0 = vcmask 64512   ;;  %vm14_vm1 = vcmask 130112   ;;  %s42_s0 = inlined_call_operand.vmem [shape: s32[2,8], index: 0, kind: input, shape index: {}]   ;;  %s43_s1 = inlined_call_operand.vmem [shape: s32[16], index: 1, kind: output, shape index: {}]  }
   0x1   :  { %v5_v0 = vld [vmem:[%s42_s0] sm:$0x3]  ;;  %s25_s0 = smov 8  }
   0x2   :  { %6 = vst [vmem:[#allocation1] sm:$0x3] %v5_v0 }
   0x9   :  { %v11_v1 = vld [vmem:[#allocation1 + $0x1] sm:$0x1]   ;;  %v7_v2 = vld [vmem:[#allocation1] sm:$0x1]  }
   0xa   :  { %12 = vrot.lane.b32.xlu0 %v11_v1, %s25_s0  ;;  %9 = vst.msk [vmem:[#allocation0] sm:$0x1] %vm8_vm0, %v7_v2  }
  0x7c   :  { %v13_v3 = vpop.permute.xlu0 %12  }
  0x7d   :  { %15 = vst.msk [vmem:[#allocation0] sm:$0x1] %vm14_vm1, %v13_v3  }
  0x84   :  { %v20_v4 = vld [vmem:[#allocation0] sm:$0x1] }
  0x85   :  { %23 = vst [vmem:[%s43_s1] sm:$0x1] %v20_v4 }

// kernel: transformer_encoder_forward.1
= control target key start
LH: loop header
LB: loop body
LE: loop exit
PB: predicated region body
PF: predicated region fallthrough
CT: control target
= control target key end

     0   :  { %s3729_s6 = smov 1   ;;  %s3730_s10 = smov 2   ;;  %s4467_s0 = inlined_call_operand.smem [shape: u32[30], index: -1, kind: input, shape index: {}] }
   0x1   :  { %s3769_s5 = sld [smem:[%s4467_s0]]   ;;  %s3731_s14 = smov 3  }
   0x2   :  { %s3774_s9 = sld [smem:[%s4467_s0 + %s3729_s6]]   ;;  %s3732_s18 = smov 4  }
   0x3   :  { %s3779_s13 = sld [smem:[%s4467_s0 + %s3730_s10]]   ;;  %s3733_s22 = smov 5  }
   0x4   :  { %s3784_s17 = sld [smem:[%s4467_s0 + %s3731_s14]]   ;;  %s3734_s26 = smov 6  }
   0x5   :  { %s3789_s21 = sld [smem:[%s4467_s0 + %s3732_s18]]   ;;  %s3735_s30 = smov 7  }
   0x6   :  { %s3794_s25 = sld [smem:[%s4467_s0 + %s3733_s22]]   ;;  %s3736_s4 = smov 8  }
   0x7   :  { %s3799_s29 = sld [smem:[%s4467_s0 + %s3734_s26]]   ;;  %s3737_s10 = smov 9  }
   0x8   :  { %s3804_s3 = sld [smem:[%s4467_s0 + %s3735_s30]]   ;;  %s3738_s15 = smov 10  }
   0x9   :  { %s3809_s8 = sld [smem:[%s4467_s0 + %s3736_s4]]   ;;  %s3739_s20 = smov 11  }
   0xa   :  { %s3814_s14 = sld [smem:[%s4467_s0 + %s3737_s10]]   ;;  %s3740_s26 = smov 12  }
   0xb   :  { %s3819_s19 = sld [smem:[%s4467_s0 + %s3738_s15]]   ;;  %s3741_s1 = smov 13  }
   0xc   :  { %s3824_s24 = sld [smem:[%s4467_s0 + %s3739_s20]]   ;;  %s3742_s7 = smov 14  }
   0xd   :  { %s3829_s30 = sld [smem:[%s4467_s0 + %s3740_s26]]   ;;  %s3743_s15 = smov 15  }
   0xe   :  { %s3834_s6 = sld [smem:[%s4467_s0 + %s3741_s1]]   ;;  %s3744_s22 = smov 16  }
   0xf   :  { %s3839_s12 = sld [smem:[%s4467_s0 + %s3742_s7]]   ;;  %s3745_s28 = smov 17  }
  0x10   :  { %s3844_s20 = sld [smem:[%s4467_s0 + %s3743_s15]]   ;;  %s3746_s7 = smov 18  }
  0x11   :  { %s3849_s27 = sld [smem:[%s4467_s0 + %s3744_s22]]   ;;  %s3747_s15 = smov 19  }
  0x12   :  { %s3854_s4 = sld [smem:[%s4467_s0 + %s3745_s28]]   ;;  %s3748_s22 = smov 20  }
  0x13   :  { %s3749_s28 = smov 21  }
  0x15   :  { %4478 = sst [smem:[#allocation5_spill]] %s3839_s12 }
  0x16   :  { %4479 = sst [smem:[#allocation6_spill]] %s3844_s20 }
  0x17   :  { %4480 = sst [smem:[#allocation7_spill]] %s3849_s27 }
  0x18   :  { %4481 = sst [smem:[#allocation8_spill]] %s3854_s4 }
  0x19   :  { %s3859_s12 = sld [smem:[%s4467_s0 + %s3746_s7]]   ;;  %s3750_s7 = smov 22  }
  0x1a   :  { %s3864_s20 = sld [smem:[%s4467_s0 + %s3747_s15]]   ;;  %s3751_s15 = smov 23  }
  0x1b   :  { %s3869_s27 = sld [smem:[%s4467_s0 + %s3748_s22]]   ;;  %s3752_s22 = smov 24  }
  0x1c   :  { %s3874_s4 = sld [smem:[%s4467_s0 + %s3749_s28]]   ;;  %s3753_s28 = smov 25  }
  0x1f   :  { %4482 = sst [smem:[#allocation9_spill]] %s3859_s12 }
  0x20   :  { %4483 = sst [smem:[#allocation10_spill]] %s3864_s20 }
  0x21   :  { %4484 = sst [smem:[#allocation11_spill]] %s3869_s27 }
  0x22   :  { %4485 = sst [smem:[#allocation12_spill]] %s3874_s4 }
  0x23   :  { %s3879_s12 = sld [smem:[%s4467_s0 + %s3750_s7]]   ;;  %s3754_s7 = smov 26  }
  0x24   :  { %s3884_s20 = sld [smem:[%s4467_s0 + %s3751_s15]]   ;;  %s3755_s15 = smov 27  }
  0x25   :  { %s3889_s27 = sld [smem:[%s4467_s0 + %s3752_s22]]   ;;  %s3756_s22 = smov 28  }
  0x26   :  { %s3894_s4 = sld [smem:[%s4467_s0 + %s3753_s28]]   ;;  %s3757_s28 = smov 29  }
  0x29   :  { %4486 = sst [smem:[#allocation13_spill]] %s3879_s12 }
  0x2a   :  { %4487 = sst [smem:[#allocation14_spill]] %s3884_s20 }
  0x2b   :  { %4488 = sst [smem:[#allocation15_spill]] %s3889_s27 }
  0x2c   :  { %4489 = sst [smem:[#allocation16_spill]] %s3894_s4 }
  0x2d   :  { %s3899_s12 = sld [smem:[%s4467_s0 + %s3754_s7]]  }
  0x2e   :  { %s3904_s20 = sld [smem:[%s4467_s0 + %s3755_s15]]  }
  0x2f   :  { %s3909_s27 = sld [smem:[%s4467_s0 + %s3756_s22]]  }
  0x30   :  { %s3914_s4 = sld [smem:[%s4467_s0 + %s3757_s28]]  }
  0x31   :  { %v3549_v0 = vld [vmem:[%s3774_s9 + $0x8] sm:$0xff]   ;;  %v3758_v1 = vmov 0.0   ;;  %vm150_vm0 = vcmask 523264   ;;  %v3550_v2 = vld [vmem:[%s3774_s9] sm:$0xff]   ;;  %vm3759_vm1 = vmmov 0  }
  0x32   :  { %3245 = vmatprep.subr.bf16.mxu0 %v3758_v1  ;;  %3253 = vmatprep.subr.bf16.mxu1 %v3758_v1  ;;  %v158_v3 = vsel %vm150_vm0, %v3549_v0, 0  ;;  %v155_v4 = vsel %vm150_vm0, %v3550_v2, 0  ;;  %v126_v5 = vld [vmem:[%s3769_s5] sm:$0xff]  ;;  %v127_v6 = vld [vmem:[%s3769_s5 + $0x8] sm:$0xff] }
  0x33   :  { %3246 = vmatpush3.bf16.xpose.msra.mxu0 %v158_v3  ;;  %3249 = vmatprep.mubr.msk.bf16.mxu0 %vm3759_vm1, %v3758_v1  ;;  %v128_v7 = vpack.c.bf16 %v127_v6, %v126_v5 }
  0x34   :  { %3247 = vmatprep.subr.bf16.mxu0 %v3758_v1  ;;  %3257 = vmatprep.mubr.msk.bf16.mxu1 %vm3759_vm1, %v3758_v1 }
  0x3b   :  { %3248 = vmatpush3.bf16.xpose.msra.mxu0 %v155_v4 }
  0x3c   :  { %3261 = vmatprep.subr.bf16.mxu0 %v3758_v1 }
  0x42   :  { %3250 = vmatmul.mubr.msk.bf16.vlgmr.msra.gmra.mxu0 %vm150_vm0, %v128_v7 }
  0x43   :  { %3265 = vmatprep.mubr.msk.bf16.mxu0 %vm3759_vm1, %v3758_v1 }
  0x44   :  { %64 = vsyncpa [#allocation3], 0  ;;  %v2991_v8 = vld [vmem:[%s3779_s13] ss:$0 sm:$0xff]  ;;  %vm206_vm2 = vcmask 261120   ;;  %v3551_v30 = vld [vmem:[%s3809_s8 + $0x8] sm:$0xff]  }
  0x45   :  { %v201_v10 = vld [vmem:[%s3784_s17] sm:$0xff]  ;;  %v3552_v31 = vld [vmem:[%s3814_s14 + $0x8] sm:$0xff]   ;;  %v279_v32 = vsel %vm206_vm2, %v3551_v30, 0  ;;  %vm520_vm3 = vcmask 130048   ;;  %s4490_s0 = sld [smem:[#allocation5_spill]]  ;;  %vm2944_vm10 = vcmask 1040384  }
  0x46   :  { %v347_v33 = vsel %vm206_vm2, %v3552_v31, 0  ;;  %3254 = vmatpush3.bf16.xpose.msra.mxu1 %v279_v32  ;;  %v3553_v34 = vld [vmem:[%s3809_s8] sm:$0xff]   ;;  %v3555_v52 = vld [vmem:[%s3819_s19 + $0x8] sm:$0xff]   ;;  %s4491_s5 = sld [smem:[#allocation6_spill]]  ;;  %vm2946_vm11 = vcmask 254976  }
  0x47   :  { %3262 = vmatpush3.bf16.xpose.msra.mxu0 %v347_v33  ;;  %3255 = vmatprep.subr.bf16.mxu1 %v3758_v1  ;;  %v3554_v35 = vld [vmem:[%s3814_s14] sm:$0xff]   ;;  %v276_v36 = vsel %vm206_vm2, %v3553_v34, 0  ;;  %v415_v56 = vsel %vm206_vm2, %v3555_v52, 0  ;;  %s4492_s9 = sld [smem:[#allocation9_spill]] }
  0x48   :  { %3263 = vmatprep.subr.bf16.mxu0 %v3758_v1  ;;  %v344_v37 = vsel %vm206_vm2, %v3554_v35, 0  ;;  %v2995_v46 = vld [vmem:[%s3799_s29] ss:$0 sm:$0xff]  ;;  %v3978_v3 = vld [vmem:[%s3794_s25 + $0x1] ss:$0 sm:$0xff]  ;;  %s4493_s13 = sld [smem:[#allocation7_spill]] }
  0x49   :  { %v2996_v50 = vld [vmem:[%s3804_s3] ss:$0 sm:$0xff]  ;;  %v3981_v6 = vld [vmem:[%s3794_s25 + $0x2] ss:$0 sm:$0xff]  ;;  %s4494_s17 = sld [smem:[#allocation8_spill]] }
  0x4a   :  { %v3556_v57 = vld [vmem:[%s3819_s19] sm:$0xff]   ;;  %s4495_s7 = sld [smem:[#allocation11_spill]] }
  0x4b   :  { %v412_v58 = vsel %vm206_vm2, %v3556_v57, 0  ;;  %v3001_v59 = vld [vmem:[%s3829_s30] ss:$0 sm:$0xff]  ;;  %s4496_s10 = sld [smem:[#allocation10_spill]] }
  0x4c   :  { %v3975_v2 = vld [vmem:[%s3794_s25] ss:$0 sm:$0xff]  ;;  %s4497_s11 = sld [smem:[#allocation12_spill]] }
  0x4d   :  { %v3005_v30 = vld [vmem:[%s3834_s6] ss:$0 sm:$0xff] }
  0x4e   :  { %3256 = vmatpush3.bf16.xpose.msra.mxu1 %v276_v36  ;;  %v4045_v52 = vld [vmem:[%s3789_s21] sm:$0xff] }
  0x4f   :  { %3264 = vmatpush3.bf16.xpose.msra.mxu0 %v344_v37  ;;  %3269 = vmatprep.subr.bf16.mxu1 %v3758_v1 }
  0x50   :  { %3277 = vmatprep.subr.bf16.mxu0 %v3758_v1 }
 0x102   :  { %v194_v9 = vpop.f32.mrf.mxu0 }
 0x103   :  { %v195_v11 = vadd.f32 %v2991_v8, %v194_v9 }
 0x104   :  { %v3251_v12 = vpop.f32.mrf.mxu0 }
 0x105   :  { %v3932_v13 = vadd.f32 %v201_v10, %v195_v11 }
 0x106   :  { %v197_v14 = vpop.f32.mrf.mxu0 }
 0x107   :  { %v198_v15 = vadd.f32 %v2991_v8, %v197_v14  ;;  %v207_v16 = vsel %vm206_vm2, %v3932_v13, 0.0  ;;  %v3984_v8 = vld [vmem:[%s3794_s25 + $0x3] ss:$0 sm:$0xff] }
 0x108   :  { %208 = vadd.xlane.f32.xlu0 %v207_v16  ;;  %v3252_v17 = vpop.f32.mrf.mxu0 }
 0x109   :  { %v3936_v18 = vadd.f32 %v201_v10, %v198_v15 }
 0x10b   :  { %v210_v19 = vsel %vm206_vm2, %v3936_v18, 0.0 }
 0x10c   :  { %211 = vadd.xlane.f32.xlu0 %v210_v19 }
 0x191   :  { %v209_v20 = vpop.xlane.xlu0 %208 }
 0x192   :  { %v214_v21 = vmul.f32 0.03125, %v209_v20 }
 0x194   :  { %v216_v22 = vsub.f32 %v3932_v13, %v214_v21 }
 0x195   :  { %v212_v23 = vpop.xlane.xlu0 %211 }
 0x196   :  { %v215_v24 = vmul.f32 0.03125, %v212_v23  ;;  %v218_v25 = vmul.f32 %v216_v22, %v216_v22 }
 0x198   :  { %v217_v26 = vsub.f32 %v3936_v18, %v215_v24  ;;  %v220_v27 = vsel %vm206_vm2, %v218_v25, 0.0 }
 0x199   :  { %221 = vadd.xlane.f32.xlu1 %v220_v27  ;;  %v2997_v27 = vld [vmem:[%s3824_s24] ss:$0 sm:$0xff] }
 0x19a   :  { %v219_v28 = vmul.f32 %v217_v26, %v217_v26 }
 0x19c   :  { %v223_v29 = vsel %vm206_vm2, %v219_v28, 0.0 }
 0x19d   :  { %224 = vadd.xlane.f32.xlu1 %v223_v29 }
 0x222   :  { %v222_v38 = vpop.xlane.xlu1 %221 }
 0x223   :  { %v226_v39 = vmul.f32 0.03125, %v222_v38 }
 0x225   :  { %v228_v40 = vadd.f32 1e-05, %v226_v39 }
 0x226   :  { %v225_v41 = vpop.xlane.xlu1 %224 }
 0x227   :  { %3593 = vrsqrt.f32 %v228_v40  ;;  %v227_v42 = vmul.f32 0.03125, %v225_v41 }
 0x229   :  { %v229_v43 = vadd.f32 1e-05, %v227_v42 }
 0x22b   :  { %3595 = vrsqrt.f32 %v229_v43 }
 0x234   :  { %v3594_v44 = vpop.eup %3593 }
 0x235   :  { %v232_v45 = vmul.f32 %v3594_v44, %v216_v22 }
 0x237   :  { %v240_v49 = vmul.f32 %v2995_v46, %v232_v45 }
 0x238   :  { %v3596_v47 = vpop.eup %3595 }
 0x239   :  { %v233_v48 = vmul.f32 %v3596_v47, %v217_v26  ;;  %v248_v53 = vadd.f32 %v2996_v50, %v240_v49 }
 0x23b   :  { %v241_v51 = vmul.f32 %v2995_v46, %v233_v48 }
 0x23d   :  { %v249_v54 = vadd.f32 %v2996_v50, %v241_v51 }
 0x23f   :  { %v250_v55 = vpack.c.bf16 %v249_v54, %v248_v53 }
 0x241   :  { %3258 = vmatmul.mubr.msk.bf16.vlgmr.msra.gmra.mxu1 %vm206_vm2, %v250_v55  ;;  %3266 = vmatmul.mubr.msk.bf16.vlgmr.msra.gmra.mxu0 %vm206_vm2, %v250_v55 }
 0x242   :  { %3270 = vmatpush3.bf16.xpose.msra.mxu1 %v415_v56  ;;  %3273 = vmatprep.mubr.msk.bf16.mxu1 %vm3759_vm1, %v3758_v1 }
 0x243   :  { %3271 = vmatprep.subr.bf16.mxu1 %v3758_v1  ;;  %3279 = vmatprep.mubr.msk.bf16.mxu0 %vm3759_vm1, %v3758_v1 }
 0x24a   :  { %3272 = vmatpush3.bf16.xpose.msra.mxu1 %v412_v58 }
 0x24b   :  { %3283 = vmatprep.subr.bf16.mxu1 %v3758_v1 }
 0x251   :  { %3274 = vmatmul.mubr.msk.bf16.vlgmr.msra.gmra.mxu1 %vm206_vm2, %v250_v55 }
 0x252   :  { %3285 = vmatprep.mubr.msk.bf16.mxu1 %vm3759_vm1, %v3758_v1 }
 0x301   :  { %v315_v60 = vpop.f32.mrf.mxu1  ;;  %v383_v61 = vpop.f32.mrf.mxu0 }
 0x302   :  { %v384_v62 = vadd.f32 %v3001_v59, %v383_v61  ;;  %v316_v29 = vadd.f32 %v2997_v27, %v315_v60 }
 0x303   :  { %v3259_v63 = vpop.f32.mrf.mxu1  ;;  %v3267_v0 = vpop.f32.mrf.mxu0 }
 0x304   :  { %v466_v11 = vmul.f32 %v3975_v2, %v384_v62  ;;  %v555_v12 = vmul.f32 %v3978_v3, %v384_v62  ;;  %v3991_v16 = vmul.f32 %v3981_v6, %v384_v62  ;;  %v3997_v19 = vmul.f32 %v3984_v8, %v384_v62 }
 0x305   :  { %v318_v4 = vpop.f32.mrf.mxu1  ;;  %v386_v5 = vpop.f32.mrf.mxu0 }
 0x306   :  { %v387_v7 = vadd.f32 %v3001_v59, %v386_v5  ;;  %v319_v28 = vadd.f32 %v2997_v27, %v318_v4  ;;  %v4049_v59 = vld [vmem:[%s3789_s21 + $0x8] sm:$0xff] }
 0x307   :  { %v3260_v9 = vpop.f32.mrf.mxu1  ;;  %v3268_v10 = vpop.f32.mrf.mxu0 }
 0x308   :  { %v467_v14 = vmul.f32 %v3975_v2, %v387_v7  ;;  %v556_v15 = vmul.f32 %v3978_v3, %v387_v7  ;;  %v3994_v17 = vmul.f32 %v3981_v6, %v387_v7  ;;  %v4000_v20 = vmul.f32 %v3984_v8, %v387_v7 }
 0x309   :  { %v4012_v32 = vpack.c.bf16 %v319_v28, %v316_v29 }
 0x30a   :  { %v468_v21 = vpack.c.bf16 %v467_v14, %v466_v11  ;;  %v557_v22 = vpack.c.bf16 %v556_v15, %v555_v12  ;;  %v730_v23 = vpack.c.bf16 %v3994_v17, %v3991_v16  ;;  %v861_v24 = vpack.c.bf16 %v4000_v20, %v3997_v19 }
 0x30c   :  { %v473_v25 = vsel %vm206_vm2, %v468_v21, 0  ;;  %v559_v26 = vsel %vm206_vm2, %v557_v22, 0 }
 0x30d   :  { %3278 = vmatpush3.bf16.xpose.msra.mxu0 %v473_v25  ;;  %3284 = vmatpush3.bf16.xpose.msra.mxu1 %v559_v26 }
 0x30e   :  { %3289 = vmatprep.subr.bf16.mxu0 %v3758_v1  ;;  %3295 = vmatprep.subr.bf16.mxu1 %v3758_v1 }
 0x311   :  { %v451_v31 = vpop.f32.mrf.mxu1 }
 0x312   :  { %v452_v33 = vadd.f32 %v3005_v30, %v451_v31 }
 0x313   :  { %v3275_v34 = vpop.f32.mrf.mxu1 }
 0x314   :  { %3280 = vmatmul.mubr.msk.bf16.vlgmr.msra.gmra.mxu0 %vm206_vm2, %v4012_v32  ;;  %3286 = vmatmul.mubr.msk.bf16.vlgmr.msra.gmra.mxu1 %vm206_vm2, %v4012_v32  ;;  %v543_v37 = vmul.f32 %v3975_v2, %v452_v33  ;;  %v628_v38 = vmul.f32 %v3978_v3, %v452_v33  ;;  %v4025_v39 = vmul.f32 %v3981_v6, %v452_v33 }
 0x315   :  { %v454_v35 = vpop.f32.mrf.mxu1  ;;  %3291 = vmatprep.mubr.msk.bf16.mxu0 %vm3759_vm1, %v3758_v1  ;;  %3297 = vmatprep.mubr.msk.bf16.mxu1 %vm3759_vm1, %v3758_v1  ;;  %v4028_v40 = vmul.f32 %v3984_v8, %v452_v33 }
 0x316   :  { %v455_v36 = vadd.f32 %v3005_v30, %v454_v35 }
 0x317   :  { %v3276_v41 = vpop.f32.mrf.mxu1 }
 0x318   :  { %v544_v42 = vmul.f32 %v3975_v2, %v455_v36  ;;  %v629_v43 = vmul.f32 %v3978_v3, %v455_v36  ;;  %v4033_v44 = vmul.f32 %v3981_v6, %v455_v36  ;;  %v4036_v45 = vmul.f32 %v3984_v8, %v455_v36 }
 0x319   :  { %v732_v41 = vsel %vm206_vm2, %v730_v23, 0 }
 0x31a   :  { %v630_v46 = vpack.c.bf16 %v629_v43, %v628_v38  ;;  %v545_v47 = vpack.c.bf16 %v544_v42, %v543_v37  ;;  %v803_v48 = vpack.c.bf16 %v4033_v44, %v4025_v39  ;;  %v934_v49 = vpack.c.bf16 %v4036_v45, %v4028_v40  ;;  %v3557_v45 = vld [vmem:[%s4490_s0 + $0x8] sm:$0xff]  }
 0x31b   :  { %v863_v42 = vsel %vm206_vm2, %v861_v24, 0 }
 0x31c   :  { %3290 = vmatpush3.bf16.msra.mxu0 %v630_v46  ;;  %3296 = vmatpush3.bf16.msra.mxu1 %v545_v47 }
 0x31d   :  { %3301 = vmatprep.subr.bf16.mxu0 %v3758_v1  ;;  %3307 = vmatprep.subr.bf16.mxu1 %v3758_v1 }
 0x3d4   :  { %v509_v50 = vpop.f32.mrf.mxu0  ;;  %v595_v51 = vpop.f32.mrf.mxu1 }
 0x3d5   :  { %v602_v53 = vmul.f32 0.35355338, %v595_v51  ;;  %v516_v14 = vmul.f32 0.35355338, %v509_v50 }
 0x3d6   :  { %v3281_v54 = vpop.f32.mrf.mxu0  ;;  %v3287_v55 = vpop.f32.mrf.mxu1 }
 0x3d7   :  { %v604_v57 = vadd.f32 %v602_v53, %v4045_v52  ;;  %v518_v25 = vadd.f32 %v516_v14, %v4045_v52 }
 0x3d8   :  { %v512_v56 = vpop.f32.mrf.mxu0  ;;  %v598_v58 = vpop.f32.mrf.mxu1 }
 0x3d9   :  { %v603_v60 = vmul.f32 0.35355338, %v598_v58  ;;  %v606_v62 = vsel %vm520_vm3, %v604_v57, -inf  ;;  %v517_v21 = vmul.f32 0.35355338, %v512_v56  ;;  %v521_v28 = vsel %vm520_vm3, %v518_v25, -inf }
 0x3da   :  { %v3282_v61 = vpop.f32.mrf.mxu0  ;;  %v3288_v63 = vpop.f32.mrf.mxu1  ;;  %607 = vmax.xlane.f32.xlu0 %v606_v62 }
 0x3db   :  { %v605_v0 = vadd.f32 %v603_v60, %v4049_v59  ;;  %v519_v29 = vadd.f32 %v517_v21, %v4049_v59 }
 0x3dd   :  { %v609_v4 = vsel %vm520_vm3, %v605_v0, -inf  ;;  %v524_v30 = vsel %vm520_vm3, %v519_v29, -inf }
 0x3de   :  { %610 = vmax.xlane.f32.xlu1 %v609_v4 }
 0x463   :  { %v608_v5 = vpop.xlane.xlu0 %607 }
 0x464   :  { %v612_v7 = vsub.f32 %v604_v57, %v608_v5 }
 0x466   :  { %v614_v9 = vmul.f32 1.442695, %v612_v7 }
 0x467   :  { %v611_v10 = vpop.xlane.xlu1 %610 }
 0x468   :  { %3597 = vpow2.f32 %v614_v9  ;;  %v613_v11 = vsub.f32 %v605_v0, %v611_v10 }
 0x46a   :  { %v616_v12 = vmul.f32 1.442695, %v613_v11 }
 0x46c   :  { %3599 = vpow2.f32 %v616_v12 }
 0x475   :  { %v3598_v15 = vpop.eup %3597 }
 0x476   :  { %v618_v22 = vsel %vm520_vm3, %v3598_v15, 0.0 }
 0x477   :  { %619 = vadd.xlane.f32.xlu0 %v618_v22 }
 0x479   :  { %v3600_v26 = vpop.eup %3599 }
 0x47a   :  { %v621_v27 = vsel %vm520_vm3, %v3600_v26, 0.0 }
 0x47b   :  { %622 = vadd.xlane.f32.xlu1 %v621_v27  ;;  %522 = vmax.xlane.f32.xlu0 %v521_v28 }
 0x47f   :  { %525 = vmax.xlane.f32.xlu1 %v524_v30 }
 0x500   :  { %v620_v31 = vpop.xlane.xlu0 %619 }
 0x501   :  { %3601 = vrcp.f32 %v620_v31 }
 0x504   :  { %v623_v33 = vpop.xlane.xlu1 %622  ;;  %v523_v16 = vpop.xlane.xlu0 %522 }
 0x505   :  { %3603 = vrcp.f32 %v623_v33  ;;  %v527_v23 = vsub.f32 %v518_v25, %v523_v16 }
 0x507   :  { %v529_v24 = vmul.f32 1.442695, %v527_v23 }
 0x508   :  { %v526_v43 = vpop.xlane.xlu1 %525 }
 0x509   :  { %v528_v46 = vsub.f32 %v519_v29, %v526_v43  ;;  %3605 = vpow2.f32 %v529_v24 }
 0x50b   :  { %v531_v51 = vmul.f32 1.442695, %v528_v46 }
 0x50d   :  { %3607 = vpow2.f32 %v531_v51 }
 0x50e   :  { %v3602_v34 = vpop.eup %3601 }
 0x50f   :  { %v626_v36 = vmul.f32 %v3602_v34, %v3598_v15 }
 0x512   :  { %v3604_v35 = vpop.eup %3603 }
 0x513   :  { %v627_v37 = vmul.f32 %v3604_v35, %v3600_v26 }
 0x515   :  { %v631_v38 = vpack.c.bf16 %v627_v37, %v626_v36 }
 0x516   :  { %v3606_v10 = vpop.eup %3605 }
 0x517   :  { %3292 = vmatmul.mubr.msk.bf16.vlgmr.msra.gmra.mxu0 %vm520_vm3, %v631_v38  ;;  %v533_v15 = vsel %vm520_vm3, %v3606_v10, 0.0 }
 0x518   :  { %3302 = vmatpush3.bf16.xpose.msra.mxu0 %v732_v41  ;;  %3303 = vmatprep.mubr.msk.bf16.mxu0 %vm3759_vm1, %v3758_v1 }
 0x519   :  { %3313 = vmatprep.subr.bf16.mxu0 %v3758_v1 }
 0x51a   :  { %v3608_v21 = vpop.eup %3607 }
 0x51b   :  { %v536_v22 = vsel %vm520_vm3, %v3608_v21, 0.0 }
 0x51f   :  { %3304 = vmatmul.mubr.msk.bf16.vlgmr.msra.gmra.mxu0 %vm206_vm2, %v4012_v32 }
 0x520   :  { %3314 = vmatpush3.bf16.xpose.msra.mxu0 %v863_v42  ;;  %3315 = vmatprep.mubr.msk.bf16.mxu0 %vm3759_vm1, %v3758_v1 }
 0x521   :  { %3325 = vmatprep.subr.bf16.mxu0 %v3758_v1 }
 0x527   :  { %3316 = vmatmul.mubr.msk.bf16.vlgmr.msra.gmra.mxu0 %vm206_vm2, %v4012_v32 }
 0x528   :  { %3329 = vmatprep.mubr.msk.bf16.mxu0 %vm3759_vm1, %v3758_v1 }
 0x5d7   :  { %v4081_v17 = vpop.f32.mrf.mxu0 }
 0x5d9   :  { %v3293_v19 = vpop.f32.mrf.mxu0 }
 0x5db   :  { %v4083_v20 = vpop.f32.mrf.mxu0 }
 0x5dd   :  { %v3294_v47 = vpop.f32.mrf.mxu0 }
 0x5df   :  { %v768_v50 = vpop.f32.mrf.mxu0 }
 0x5e0   :  { %v775_v53 = vmul.f32 0.35355338, %v768_v50 }
 0x5e1   :  { %v3305_v54 = vpop.f32.mrf.mxu0 }
 0x5e2   :  { %v777_v32 = vadd.f32 %v775_v53, %v4045_v52 }
 0x5e3   :  { %v771_v55 = vpop.f32.mrf.mxu0 }
 0x5e4   :  { %v776_v56 = vmul.f32 0.35355338, %v771_v55  ;;  %v779_v57 = vsel %vm520_vm3, %v777_v32, -inf }
 0x5e5   :  { %v3306_v58 = vpop.f32.mrf.mxu0  ;;  %780 = vmax.xlane.f32.xlu0 %v779_v57 }
 0x5e6   :  { %v778_v60 = vadd.f32 %v776_v56, %v4049_v59 }
 0x5e7   :  { %v899_v61 = vpop.f32.mrf.mxu0 }
 0x5e8   :  { %v906_v62 = vmul.f32 0.35355338, %v899_v61  ;;  %v782_v63 = vsel %vm520_vm3, %v778_v60, -inf }
 0x5e9   :  { %783 = vmax.xlane.f32.xlu1 %v782_v63  ;;  %v3317_v0 = vpop.f32.mrf.mxu0 }
 0x5ea   :  { %v908_v4 = vadd.f32 %v906_v62, %v4045_v52 }
 0x5eb   :  { %v902_v5 = vpop.f32.mrf.mxu0 }
 0x5ec   :  { %v907_v7 = vmul.f32 0.35355338, %v902_v5  ;;  %v910_v9 = vsel %vm520_vm3, %v908_v4, -inf }
 0x5ed   :  { %v3318_v11 = vpop.f32.mrf.mxu0  ;;  %911 = vmax.xlane.f32.xlu0 %v910_v9 }
 0x5ee   :  { %v909_v12 = vadd.f32 %v907_v7, %v4049_v59  ;;  %v3558_v11 = vld [vmem:[%s4490_s0] sm:$0xff]  }
 0x5f0   :  { %v913_v14 = vsel %vm520_vm3, %v909_v12, -inf }
 0x5f1   :  { %914 = vmax.xlane.f32.xlu1 %v913_v14  ;;  %534 = vadd.xlane.f32.xlu0 %v533_v15 }
 0x5f5   :  { %537 = vadd.xlane.f32.xlu1 %v536_v22 }
 0x66e   :  { %v781_v25 = vpop.xlane.xlu0 %780 }
 0x66f   :  { %v785_v26 = vsub.f32 %v777_v32, %v781_v25 }
 0x671   :  { %v787_v27 = vmul.f32 1.442695, %v785_v26 }
 0x672   :  { %v784_v28 = vpop.xlane.xlu1 %783 }
 0x673   :  { %3609 = vpow2.f32 %v787_v27  ;;  %v786_v29 = vsub.f32 %v778_v60, %v784_v28 }
 0x675   :  { %v789_v30 = vmul.f32 1.442695, %v786_v29 }
 0x676   :  { %v912_v31 = vpop.xlane.xlu0 %911 }
 0x677   :  { %3611 = vpow2.f32 %v789_v30  ;;  %v916_v33 = vsub.f32 %v908_v4, %v912_v31 }
 0x679   :  { %v918_v34 = vmul.f32 1.442695, %v916_v33 }
 0x67a   :  { %v915_v35 = vpop.xlane.xlu1 %914  ;;  %v535_v37 = vpop.xlane.xlu0 %534 }
 0x67b   :  { %3613 = vpow2.f32 %v918_v34  ;;  %v917_v36 = vsub.f32 %v909_v12, %v915_v35  ;;  %v1008_v12 = vsel %vm206_vm2, %v3558_v11, 0 }
 0x67c   :  { %3615 = vrcp.f32 %v535_v37  ;;  %v3024_v37 = vld [vmem:[%s4491_s5] ss:$0 sm:$0xff] }
 0x67d   :  { %v920_v38 = vmul.f32 1.442695, %v917_v36 }
 0x67e   :  { %v538_v41 = vpop.xlane.xlu1 %537 }
 0x67f   :  { %3617 = vpow2.f32 %v920_v38 }
 0x680   :  { %v3610_v42 = vpop.eup %3609  ;;  %3619 = vrcp.f32 %v538_v41 }
 0x681   :  { %v791_v16 = vsel %vm520_vm3, %v3610_v42, 0.0 }
 0x682   :  { %792 = vadd.xlane.f32.xlu0 %v791_v16 }
 0x684   :  { %v3612_v23 = vpop.eup %3611 }
 0x685   :  { %v794_v43 = vsel %vm520_vm3, %v3612_v23, 0.0 }
 0x686   :  { %795 = vadd.xlane.f32.xlu1 %v794_v43 }
 0x688   :  { %v3614_v19 = vpop.eup %3613 }
 0x689   :  { %v922_v24 = vsel %vm520_vm3, %v3614_v19, 0.0  ;;  %v3616_v46 = vpop.eup %3615 }
 0x68a   :  { %923 = vadd.xlane.f32.xlu0 %v922_v24  ;;  %v541_v53 = vmul.f32 %v3616_v46, %v3606_v10  ;;  %v3559_v46 = vld [vmem:[%s4492_s9 + $0x38] sm:$0xff]  }
 0x68c   :  { %v3618_v47 = vpop.eup %3617 }
 0x68d   :  { %v3620_v50 = vpop.eup %3619  ;;  %v925_v51 = vsel %vm520_vm3, %v3618_v47, 0.0 }
 0x68e   :  { %926 = vadd.xlane.f32.xlu1 %v925_v51  ;;  %v542_v54 = vmul.f32 %v3620_v50, %v3608_v21  ;;  %v3561_v51 = vld [vmem:[%s4492_s9 + $0x28] sm:$0xff]  }
 0x690   :  { %v546_v32 = vpack.c.bf16 %v542_v54, %v541_v53  ;;  %v3562_v53 = vld [vmem:[%s4492_s9 + $0x20] sm:$0xff]  }
 0x691   :  { %v1180_v54 = vsel %vm206_vm2, %v3562_v53, 0 }
 0x692   :  { %3298 = vmatmul.mubr.msk.bf16.vlgmr.msra.gmra.mxu1 %vm520_vm3, %v546_v32  ;;  %v3563_v32 = vld [vmem:[%s4492_s9 + $0x18] sm:$0xff]  }
 0x693   :  { %3308 = vmatpush3.bf16.msra.mxu1 %v803_v48  ;;  %3309 = vmatprep.mubr.msk.bf16.mxu1 %vm3759_vm1, %v3758_v1 }
 0x694   :  { %3319 = vmatprep.subr.bf16.mxu1 %v3758_v1 }
 0x70b   :  { %v793_v55 = vpop.xlane.xlu0 %792 }
 0x70c   :  { %3621 = vrcp.f32 %v793_v55  ;;  %v1177_v55 = vsel %vm206_vm2, %v3563_v32, 0 }
 0x70f   :  { %v796_v56 = vpop.xlane.xlu1 %795 }
 0x710   :  { %3623 = vrcp.f32 %v796_v56 }
 0x713   :  { %v924_v57 = vpop.xlane.xlu0 %923 }
 0x714   :  { %3625 = vrcp.f32 %v924_v57 }
 0x717   :  { %v927_v58 = vpop.xlane.xlu1 %926 }
 0x718   :  { %3627 = vrcp.f32 %v927_v58 }
 0x719   :  { %v3622_v60 = vpop.eup %3621 }
 0x71a   :  { %v799_v62 = vmul.f32 %v3622_v60, %v3610_v42 }
 0x71d   :  { %v3624_v61 = vpop.eup %3623 }
 0x71e   :  { %v800_v63 = vmul.f32 %v3624_v61, %v3612_v23 }
 0x720   :  { %v804_v0 = vpack.c.bf16 %v800_v63, %v799_v62 }
 0x721   :  { %v3626_v39 = vpop.eup %3625 }
 0x722   :  { %3310 = vmatmul.mubr.msk.bf16.vlgmr.msra.gmra.mxu1 %vm520_vm3, %v804_v0  ;;  %v930_v48 = vmul.f32 %v3626_v39, %v3614_v19 }
 0x723   :  { %3320 = vmatpush3.bf16.msra.mxu1 %v934_v49  ;;  %3321 = vmatprep.mubr.msk.bf16.mxu1 %vm3759_vm1, %v3758_v1  ;;  %v1011_v49 = vsel %vm206_vm2, %v3557_v45, 0 }
 0x724   :  { %3333 = vmatprep.subr.bf16.mxu1 %v3758_v1  ;;  %3326 = vmatpush3.bf16.xpose.msra.mxu0 %v1011_v49 }
 0x725   :  { %v3628_v44 = vpop.eup %3627  ;;  %3327 = vmatprep.subr.bf16.mxu0 %v3758_v1 }
 0x726   :  { %v931_v4 = vmul.f32 %v3628_v44, %v3618_v47  ;;  %v3560_v47 = vld [vmem:[%s4492_s9 + $0x30] sm:$0xff]  }
 0x727   :  { %v1186_v50 = vsel %vm206_vm2, %v3560_v47, 0 }
 0x728   :  { %v935_v5 = vpack.c.bf16 %v931_v4, %v930_v48  ;;  %v3564_v48 = vld [vmem:[%s4492_s9 + $0x10] sm:$0xff]  }
 0x729   :  { %v1174_v4 = vsel %vm206_vm2, %v3564_v48, 0 }
 0x72a   :  { %3322 = vmatmul.mubr.msk.bf16.vlgmr.msra.gmra.mxu1 %vm520_vm3, %v935_v5  ;;  %v3565_v5 = vld [vmem:[%s4492_s9 + $0x8] sm:$0xff]  }
 0x72b   :  { %3349 = vmatprep.mubr.msk.bf16.mxu1 %vm3759_vm1, %v3758_v1 }
 0x72c   :  { %3328 = vmatpush3.bf16.xpose.msra.mxu0 %v1008_v12 }
 0x72d   :  { %3353 = vmatprep.subr.bf16.mxu0 %v3758_v1 }
 0x752   :  { %v713_v7 = vpop.f32.mrf.mxu1 }
 0x753   :  { %v714_v26 = vadd.f32 %v713_v7, %v4081_v17  ;;  %v1171_v7 = vsel %vm206_vm2, %v3565_v5, 0 }
 0x754   :  { %v3299_v9 = vpop.f32.mrf.mxu1 }
 0x755   :  { %v3566_v9 = vld [vmem:[%s4492_s9] sm:$0xff]  }
 0x756   :  { %v716_v10 = vpop.f32.mrf.mxu1 }
 0x757   :  { %v717_v27 = vadd.f32 %v716_v10, %v4083_v20  ;;  %v1168_v10 = vsel %vm206_vm2, %v3566_v9, 0 }
 0x758   :  { %v3300_v40 = vpop.f32.mrf.mxu1 }
 0x7e2   :  { %v842_v14 = vpop.f32.mrf.mxu1 }
 0x7e3   :  { %v849_v29 = vadd.f32 %v842_v14, %v714_v26 }
 0x7e4   :  { %v3311_v15 = vpop.f32.mrf.mxu1 }
 0x7e6   :  { %v845_v21 = vpop.f32.mrf.mxu1 }
 0x7e7   :  { %v850_v30 = vadd.f32 %v845_v21, %v717_v27 }
 0x7e8   :  { %v3312_v22 = vpop.f32.mrf.mxu1 }
 0x7e9   :  { %v3028_v22 = vld [vmem:[%s4493_s13] ss:$0 sm:$0xff] }
 0x7ea   :  { %v973_v25 = vpop.f32.mrf.mxu1 }
 0x7eb   :  { %v980_v33 = vadd.f32 %v973_v25, %v849_v29 }
 0x7ec   :  { %v3323_v28 = vpop.f32.mrf.mxu1 }
 0x7ed   :  { %v3029_v28 = vld [vmem:[%s4494_s17] ss:$0 sm:$0xff] }
 0x7ee   :  { %v976_v31 = vpop.f32.mrf.mxu1 }
 0x7ef   :  { %v981_v34 = vadd.f32 %v976_v31, %v850_v30 }
 0x7f0   :  { %v3324_v35 = vpop.f32.mrf.mxu1 }
 0x7f1   :  { %v982_v36 = vpack.c.bf16 %v981_v34, %v980_v33  ;;  %v3567_v34 = vld [vmem:[%s4495_s7 + $0x8] sm:$0xff]   ;;  %v3568_v35 = vld [vmem:[%s4495_s7] sm:$0xff]  }
 0x7f3   :  { %3330 = vmatmul.mubr.msk.bf16.vlgmr.msra.gmra.mxu0 %vm206_vm2, %v982_v36  ;;  %v3030_v36 = vld [vmem:[%s4496_s10] ss:$0 sm:$0xff] }
 0x7f4   :  { %3357 = vmatprep.mubr.msk.bf16.mxu0 %vm3759_vm1, %v3758_v1  ;;  %3354 = vmatpush3.bf16.xpose.msra.mxu0 %v3567_v34 }
 0x7f5   :  { %3355 = vmatprep.subr.bf16.mxu0 %v3758_v1 }
 0x7fc   :  { %3356 = vmatpush3.bf16.xpose.msra.mxu0 %v3568_v35 }
 0x7fd   :  { %3361 = vmatprep.subr.bf16.mxu0 %v3758_v1 }
 0x8b3   :  { %v1047_v38 = vpop.f32.mrf.mxu0 }
 0x8b4   :  { %v1048_v17 = vadd.f32 %v3024_v37, %v1047_v38 }
 0x8b5   :  { %v3331_v41 = vpop.f32.mrf.mxu0 }
 0x8b6   :  { %v4129_v20 = vadd.f32 %v1048_v17, %v3932_v13  ;;  %v1189_v13 = vsel %vm206_vm2, %v3559_v46, 0 }
 0x8b7   :  { %v1050_v42 = vpop.f32.mrf.mxu0  ;;  %3334 = vmatpush3.bf16.xpose.msra.mxu1 %v1189_v13 }
 0x8b8   :  { %v1051_v16 = vadd.f32 %v3024_v37, %v1050_v42  ;;  %v1058_v23 = vsel %vm206_vm2, %v4129_v20, 0.0  ;;  %3335 = vmatprep.subr.bf16.mxu1 %v3758_v1 }
 0x8b9   :  { %1059 = vadd.xlane.f32.xlu0 %v1058_v23  ;;  %v3332_v43 = vpop.f32.mrf.mxu0 }
 0x8ba   :  { %v4134_v19 = vadd.f32 %v1051_v16, %v3936_v18  ;;  %v1183_v18 = vsel %vm206_vm2, %v3561_v51, 0 }
 0x8bc   :  { %v1061_v24 = vsel %vm206_vm2, %v4134_v19, 0.0 }
 0x8bd   :  { %1062 = vadd.xlane.f32.xlu1 %v1061_v24 }
 0x8bf   :  { %3336 = vmatpush3.bf16.xpose.msra.mxu1 %v1186_v50 }
 0x8c0   :  { %3337 = vmatprep.subr.bf16.mxu1 %v3758_v1 }
 0x8c7   :  { %3338 = vmatpush3.bf16.xpose.msra.mxu1 %v1183_v18 }
 0x8c8   :  { %3339 = vmatprep.subr.bf16.mxu1 %v3758_v1 }
 0x8cf   :  { %3340 = vmatpush3.bf16.xpose.msra.mxu1 %v1180_v54 }
 0x8d0   :  { %3341 = vmatprep.subr.bf16.mxu1 %v3758_v1 }
 0x8d7   :  { %3342 = vmatpush3.bf16.xpose.msra.mxu1 %v1177_v55 }
 0x8d8   :  { %3343 = vmatprep.subr.bf16.mxu1 %v3758_v1 }
 0x8df   :  { %3344 = vmatpush3.bf16.xpose.msra.mxu1 %v1174_v4 }
 0x8e0   :  { %3345 = vmatprep.subr.bf16.mxu1 %v3758_v1 }
 0x8e7   :  { %3346 = vmatpush3.bf16.xpose.msra.mxu1 %v1171_v7 }
 0x8e8   :  { %3347 = vmatprep.subr.bf16.mxu1 %v3758_v1 }
 0x8ef   :  { %3348 = vmatpush3.bf16.xpose.msra.mxu1 %v1168_v10 }
 0x8f0   :  { %3385 = vmatprep.subr.bf16.mxu1 %v3758_v1 }
 0x942   :  { %v1060_v56 = vpop.xlane.xlu0 %1059 }
 0x943   :  { %v1064_v57 = vmul.f32 0.03125, %v1060_v56 }
 0x945   :  { %v1066_v58 = vsub.f32 %v4129_v20, %v1064_v57 }
 0x946   :  { %v1063_v60 = vpop.xlane.xlu1 %1062 }
 0x947   :  { %v1065_v61 = vmul.f32 0.03125, %v1063_v60  ;;  %v1068_v62 = vmul.f32 %v1066_v58, %v1066_v58 }
 0x949   :  { %v1067_v63 = vsub.f32 %v4134_v19, %v1065_v61  ;;  %v1070_v0 = vsel %vm206_vm2, %v1068_v62, 0.0 }
 0x94a   :  { %1071 = vadd.xlane.f32.xlu0 %v1070_v0 }
 0x94b   :  { %v1069_v39 = vmul.f32 %v1067_v63, %v1067_v63 }
 0x94d   :  { %v1073_v44 = vsel %vm206_vm2, %v1069_v39, 0.0 }
 0x94e   :  { %1074 = vadd.xlane.f32.xlu1 %v1073_v44 }
 0x9d3   :  { %v1072_v40 = vpop.xlane.xlu0 %1071 }
 0x9d4   :  { %v1076_v45 = vmul.f32 0.03125, %v1072_v40 }
 0x9d6   :  { %v1078_v49 = vadd.f32 1e-05, %v1076_v45 }
 0x9d7   :  { %v1075_v11 = vpop.xlane.xlu1 %1074 }
 0x9d8   :  { %3629 = vrsqrt.f32 %v1078_v49  ;;  %v1077_v12 = vmul.f32 0.03125, %v1075_v11 }
 0x9da   :  { %v1079_v14 = vadd.f32 1e-05, %v1077_v12 }
 0x9dc   :  { %3631 = vrsqrt.f32 %v1079_v14 }
 0x9e5   :  { %v3630_v15 = vpop.eup %3629 }
 0x9e6   :  { %v1082_v21 = vmul.f32 %v3630_v15, %v1066_v58 }
 0x9e8   :  { %v1090_v27 = vmul.f32 %v3028_v22, %v1082_v21 }
 0x9e9   :  { %v3632_v25 = vpop.eup %3631 }
 0x9ea   :  { %v1083_v26 = vmul.f32 %v3632_v25, %v1067_v63  ;;  %v1098_v30 = vadd.f32 %v3029_v28, %v1090_v27 }
 0x9ec   :  { %v1091_v29 = vmul.f32 %v3028_v22, %v1083_v26 }
 0x9ee   :  { %v1099_v31 = vadd.f32 %v3029_v28, %v1091_v29 }
 0x9f0   :  { %v1100_v33 = vpack.c.bf16 %v1099_v31, %v1098_v30 }
 0x9f2   :  { %3350 = vmatmul.mubr.msk.bf16.vlgmr.msra.gmra.mxu1 %vm206_vm2, %v1100_v33 }
 0x9f3   :  { %3387 = vmatprep.mubr.msk.bf16.mxu1 %vm3759_vm1, %v3758_v1 }
 0xab2   :  { %v1225_v37 = vpop.f32.mrf.mxu1 }
 0xab3   :  { %v1226_v38 = vadd.f32 %v3030_v36, %v1225_v37 }
 0xab4   :  { %v3351_v17 = vpop.f32.mrf.mxu1 }
 0xab5   :  { %v1234_v41 = vmul.f32 0.70710677, %v1226_v38  ;;  %v1232_v33 = vmul.f32 0.5, %v1226_v38 }
 0xab6   :  { %v1228_v42 = vpop.f32.mrf.mxu1 }
 0xab7   :  { %v1236_v16 = vand.u32 2147483647, %v1234_v41  ;;  %v1229_v23 = vadd.f32 %v3030_v36, %v1228_v42  ;;  %vm1276_vm4 = vcmp.ge.f32.partialorder %v1234_v41, 0.0  ;;  %v3040_v42 = vld [vmem:[%s4497_s11] ss:$0 sm:$0xff] }
 0xab8   :  { %v3352_v43 = vpop.f32.mrf.mxu1 }
 0xab9   :  { %v1238_v24 = vmul.f32 0.3275911, %v1236_v16  ;;  %v1235_v46 = vmul.f32 0.70710677, %v1229_v23  ;;  %v1264_v18 = vsub.f32 0.0, %v1236_v16  ;;  %v1233_v34 = vmul.f32 0.5, %v1229_v23 }
 0xabb   :  { %v1240_v13 = vadd.f32 1.0, %v1238_v24  ;;  %v1237_v47 = vand.u32 2147483647, %v1235_v46  ;;  %v1266_v53 = vmul.f32 %v1264_v18, %v1236_v16  ;;  %vm1277_vm5 = vcmp.ge.f32.partialorder %v1235_v46, 0.0 }
 0xabd   :  { %3633 = vrcp.f32 %v1240_v13  ;;  %v1239_v50 = vmul.f32 0.3275911, %v1237_v47  ;;  %v1265_v54 = vsub.f32 0.0, %v1237_v47  ;;  %v1268_v56 = vmul.f32 1.442695, %v1266_v53 }
 0xabf   :  { %v1241_v51 = vadd.f32 1.0, %v1239_v50  ;;  %v1267_v57 = vmul.f32 %v1265_v54, %v1237_v47 }
 0xac1   :  { %3635 = vrcp.f32 %v1241_v51  ;;  %v1270_v63 = vmul.f32 1.442695, %v1267_v57 }
 0xac2   :  { %3637 = vpow2.f32 %v1268_v56 }
 0xac3   :  { %3639 = vpow2.f32 %v1270_v63 }
 0xaca   :  { %v3634_v32 = vpop.eup %3633 }
 0xacb   :  { %v1246_v55 = vmul.f32 1.0614054, %v3634_v32 }
 0xacd   :  { %v1248_v58 = vadd.f32 -1.4531521, %v1246_v55 }
 0xace   :  { %v3636_v60 = vpop.eup %3635 }
 0xacf   :  { %v1250_v61 = vmul.f32 %v3634_v32, %v1248_v58  ;;  %v1247_v62 = vmul.f32 1.0614054, %v3636_v60  ;;  %v3638_v11 = vpop.eup %3637  ;;  %v3569_v58 = vld [vmem:[%s3809_s8 + $0x18] sm:$0xff]  }
 0xad0   :  { %v3640_v22 = vpop.eup %3639 }
 0xad1   :  { %v1252_v0 = vadd.f32 1.4214138, %v1250_v61  ;;  %v1249_v39 = vadd.f32 -1.4531521, %v1247_v62  ;;  %v3570_v61 = vld [vmem:[%s3809_s8 + $0x10] sm:$0xff]   ;;  %s3760_s8 = smov [#allocation2]  }
 0xad2   :  { %v1427_v62 = vsel %vm206_vm2, %v3570_v61, 0 }
 0xad3   :  { %v1254_v44 = vmul.f32 %v3634_v32, %v1252_v0  ;;  %v1251_v48 = vmul.f32 %v3636_v60, %v1249_v39 }
 0xad5   :  { %v1256_v4 = vadd.f32 -0.28449672, %v1254_v44  ;;  %v1253_v5 = vadd.f32 1.4214138, %v1251_v48 }
 0xad7   :  { %v1258_v7 = vmul.f32 %v3634_v32, %v1256_v4  ;;  %v1255_v9 = vmul.f32 %v3636_v60, %v1253_v5 }
 0xad9   :  { %v1260_v10 = vadd.f32 0.2548296, %v1258_v7  ;;  %v1257_v40 = vadd.f32 -0.28449672, %v1255_v9  ;;  %v3045_v9 = vld [vmem:[%s3799_s29 + $0x1] ss:$0 sm:$0xff] }
 0xada   :  { %s4500_s29 = sld [smem:[#allocation14_spill]] }
 0xadb   :  { %v1262_v45 = vmul.f32 %v3634_v32, %v1260_v10  ;;  %v1259_v49 = vmul.f32 %v3636_v60, %v1257_v40 }
 0xadd   :  { %v1272_v12 = vmul.f32 %v3638_v11, %v1262_v45  ;;  %v1261_v14 = vadd.f32 0.2548296, %v1259_v49  ;;  %v3046_v49 = vld [vmem:[%s3804_s3 + $0x1] ss:$0 sm:$0xff]  ;;  %s4501_s3 = sld [smem:[#allocation15_spill]] }
 0xadf   :  { %v1274_v15 = vsub.f32 1.0, %v1272_v12  ;;  %v1263_v21 = vmul.f32 %v3636_v60, %v1261_v14  ;;  %v1430_v60 = vsel %vm206_vm2, %v3569_v58, 0  ;;  %v3571_v12 = vld [vmem:[%s3814_s14 + $0x18] sm:$0xff]  }
 0xae1   :  { %v1278_v25 = vsub.f32 0.0, %v1274_v15  ;;  %v1273_v26 = vmul.f32 %v3640_v22, %v1263_v21  ;;  %v1500_v22 = vsel %vm206_vm2, %v3571_v12, 0 }
 0xae3   :  { %v1280_v27 = vsel %vm1276_vm4, %v1274_v15, %v1278_v25  ;;  %v1275_v28 = vsub.f32 1.0, %v1273_v26  ;;  %v3572_v25 = vld [vmem:[%s3814_s14 + $0x10] sm:$0xff]   ;;  %s2954_s14 = sshll.u32 %s3760_s8, 4  ;;  %s2955_s14 = int_to_ptr.vmem [resolvable:$true] %s2954_s14 }
 0xae4   :  { %v1282_v30 = vadd.f32 1.0, %v1280_v27  ;;  %v1497_v26 = vsel %vm206_vm2, %v3572_v25, 0  ;;  %v3573_v27 = vld [vmem:[%s3819_s19 + $0x18] sm:$0xff]   ;;  %p3712_p1 = scmp.lt.s32.totalorder %s2955_s14, %s2955_s14 }
 0xae5   :  { %v1279_v29 = vsub.f32 0.0, %v1275_v28 }
 0xae6   :  { %v1284_v36 = vmul.f32 %v1282_v30, %v1232_v33 }
 0xae7   :  { %v1281_v31 = vsel %vm1277_vm5, %v1275_v28, %v1279_v29  ;;  %v1570_v28 = vsel %vm206_vm2, %v3573_v27, 0  ;;  %v3574_v29 = vld [vmem:[%s3819_s19 + $0x10] sm:$0xff]   ;;  %s3707_s19 = scalar_lea.vmem %s2955_s14, 32 }
 0xae8   :  { %v1283_v35 = vadd.f32 1.0, %v1281_v31  ;;  %v1567_v30 = vsel %vm206_vm2, %v3574_v29, 0  ;;  %p3708_p0 = scmp.ne.s32.totalorder %s2955_s14, %s3707_s19  ;;  %p3713_p2 = scmp.lt.s32.totalorder %s3707_s19, %s3707_s19 }
 0xaea   :  { %v1285_v37 = vmul.f32 %v1283_v35, %v1233_v34  ;;  %p3714_p3 = por %p3713_p2, %p3712_p1 }
 0xaec   :  { %v1286_v17 = vpack.c.bf16 %v1285_v37, %v1284_v36  ;;  %v3061_v36 = vld [vmem:[%s3829_s30 + $0x1] ss:$0 sm:$0xff]  ;;  %p3715_p4 = pnand %p3714_p3, %p3708_p0 }
 0xaee   :  { %3358 = vmatmul.mubr.bf16.vlgmr.msra.gmra.mxu0 %v1286_v17 }
 0xaef   :  { %3365 = vmatprep.mubr.msk.bf16.mxu0 %vm3759_vm1, %v3758_v1  ;;  %3362 = vmatpush3.bf16.xpose.msra.mxu0 %v1430_v60 }
 0xaf0   :  { %3363 = vmatprep.subr.bf16.mxu0 %v3758_v1 }
 0xaf7   :  { %3364 = vmatpush3.bf16.xpose.msra.mxu0 %v1427_v62 }
 0xaf8   :  { %3369 = vmatprep.subr.bf16.mxu0 %v3758_v1 }
 0xbae   :  { %v1344_v16 = vpop.f32.mrf.mxu0 }
 0xbaf   :  { %v1345_v43 = vadd.f32 %v3040_v42, %v1344_v16 }
 0xbb0   :  { %v3359_v41 = vpop.f32.mrf.mxu0 }
 0xbb1   :  { %v4180_v24 = vadd.f32 %v1345_v43, %v4129_v20 }
 0xbb2   :  { %v1347_v13 = vpop.f32.mrf.mxu0 }
 0xbb3   :  { %v1348_v46 = vadd.f32 %v3040_v42, %v1347_v13  ;;  %v1357_v38 = vsel %vm206_vm2, %v4180_v24, 0.0 }
 0xbb4   :  { %1358 = vadd.xlane.f32.xlu0 %v1357_v38  ;;  %v3360_v23 = vpop.f32.mrf.mxu0 }
 0xbb5   :  { %v4185_v47 = vadd.f32 %v1348_v46, %v4134_v19 }
 0xbb7   :  { %v1360_v50 = vsel %vm206_vm2, %v4185_v47, 0.0 }
 0xbb8   :  { %1361 = vadd.xlane.f32.xlu1 %v1360_v50 }
 0xc3d   :  { %v1359_v51 = vpop.xlane.xlu0 %1358 }
 0xc3e   :  { %v1363_v18 = vmul.f32 0.03125, %v1359_v51 }
 0xc40   :  { %v1365_v20 = vsub.f32 %v4180_v24, %v1363_v18 }
 0xc41   :  { %v1362_v53 = vpop.xlane.xlu1 %1361 }
 0xc42   :  { %v1364_v54 = vmul.f32 0.03125, %v1362_v53  ;;  %v1367_v32 = vmul.f32 %v1365_v20, %v1365_v20 }
 0xc44   :  { %v1366_v55 = vsub.f32 %v4185_v47, %v1364_v54  ;;  %v1369_v56 = vsel %vm206_vm2, %v1367_v32, 0.0  ;;  %v3052_v32 = vld [vmem:[%s3824_s24 + $0x1] ss:$0 sm:$0xff] }
 0xc45   :  { %1370 = vadd.xlane.f32.xlu0 %v1369_v56  ;;  %v3070_v56 = vld [vmem:[%s3834_s6 + $0x1] ss:$0 sm:$0xff] }
 0xc46   :  { %v1368_v57 = vmul.f32 %v1366_v55, %v1366_v55 }
 0xc48   :  { %v1372_v19 = vsel %vm206_vm2, %v1368_v57, 0.0 }
 0xc49   :  { %1373 = vadd.xlane.f32.xlu1 %v1372_v19 }
 0xcce   :  { %v1371_v63 = vpop.xlane.xlu0 %1370 }
 0xccf   :  { %v1375_v0 = vmul.f32 0.03125, %v1371_v63 }
 0xcd1   :  { %v1377_v39 = vadd.f32 1e-05, %v1375_v0  ;;  %v3701_v0 = vld [vmem:[%s3794_s25] ss:$0 sm:$0xff] }
 0xcd2   :  { %v1374_v44 = vpop.xlane.xlu1 %1373 }
 0xcd3   :  { %3641 = vrsqrt.f32 %v1377_v39  ;;  %v1376_v48 = vmul.f32 0.03125, %v1374_v44  ;;  %v3702_v44 = vld [vmem:[%s3794_s25 + $0x1] ss:$0 sm:$0xff] }
 0xcd5   :  { %v1378_v4 = vadd.f32 1e-05, %v1376_v48 }
 0xcd7   :  { %3643 = vrsqrt.f32 %v1378_v4  ;;  %v3703_v4 = vld [vmem:[%s3794_s25 + $0x2] ss:$0 sm:$0xff] }
 0xce0   :  { %v3642_v5 = vpop.eup %3641 }
 0xce1   :  { %v1381_v7 = vmul.f32 %v3642_v5, %v1365_v20 }
 0xce3   :  { %v1389_v45 = vmul.f32 %v3045_v9, %v1381_v7  ;;  %v3704_v7 = vld [vmem:[%s3794_s25 + $0x3] ss:$0 sm:$0xff]  ;;  %s4499_s25 = sld [smem:[#allocation13_spill]] }
 0xce4   :  { %v3644_v10 = vpop.eup %3643 }
 0xce5   :  { %v1382_v40 = vmul.f32 %v3644_v10, %v1366_v55  ;;  %v1397_v14 = vadd.f32 %v3046_v49, %v1389_v45 }
 0xce7   :  { %v1390_v11 = vmul.f32 %v3045_v9, %v1382_v40 }
 0xce9   :  { %v1398_v15 = vadd.f32 %v3046_v49, %v1390_v11 }
 0xceb   :  { %v1399_v21 = vpack.c.bf16 %v1398_v15, %v1397_v14 }
 0xced   :  { %3366 = vmatmul.mubr.msk.bf16.vlgmr.msra.gmra.mxu0 %vm206_vm2, %v1399_v21 }
 0xcee   :  { %3370 = vmatpush3.bf16.xpose.msra.mxu0 %v1500_v22  ;;  %3373 = vmatprep.mubr.msk.bf16.mxu0 %vm3759_vm1, %v3758_v1 }
 0xcef   :  { %3371 = vmatprep.subr.bf16.mxu0 %v3758_v1 }
 0xcf6   :  { %3372 = vmatpush3.bf16.xpose.msra.mxu0 %v1497_v26 }
 0xcf7   :  { %3377 = vmatprep.subr.bf16.mxu0 %v3758_v1 }
 0xcfd   :  { %3374 = vmatmul.mubr.msk.bf16.vlgmr.msra.gmra.mxu0 %vm206_vm2, %v1399_v21 }
 0xcfe   :  { %3378 = vmatpush3.bf16.xpose.msra.mxu0 %v1570_v28  ;;  %3381 = vmatprep.mubr.msk.bf16.mxu0 %vm3759_vm1, %v3758_v1 }
 0xcff   :  { %3379 = vmatprep.subr.bf16.mxu0 %v3758_v1 }
 0xd06   :  { %3380 = vmatpush3.bf16.xpose.msra.mxu0 %v1567_v30 }
 0xd07   :  { %3397 = vmatprep.subr.bf16.mxu0 %v3758_v1 }
 0xd0d   :  { %3382 = vmatmul.mubr.msk.bf16.vlgmr.msra.gmra.mxu0 %vm206_vm2, %v1399_v21 }
 0xd0e   :  { %3399 = vmatprep.mubr.msk.bf16.mxu0 %vm3759_vm1, %v3758_v1 }
 0xdad   :  { %v1466_v31 = vpop.f32.mrf.mxu0 }
 0xdae   :  { %v1467_v55 = vadd.f32 %v3052_v32, %v1466_v31 }
 0xdaf   :  { %v3367_v33 = vpop.f32.mrf.mxu0 }
 0xdb1   :  { %v1469_v34 = vpop.f32.mrf.mxu0 }
 0xdb3   :  { %v3368_v35 = vpop.f32.mrf.mxu0 }
 0xdbd   :  { %v1536_v37 = vpop.f32.mrf.mxu0 }
 0xdbe   :  { %v1537_v17 = vadd.f32 %v3061_v36, %v1536_v37 }
 0xdbf   :  { %v3375_v42 = vpop.f32.mrf.mxu0 }
 0xdc0   :  { %v1614_v13 = vmul.f32 %v3975_v2, %v1537_v17  ;;  %v4225_v46 = vmul.f32 %v3981_v6, %v1537_v17  ;;  %v4232_v50 = vmul.f32 %v3984_v8, %v1537_v17 }
 0xdc1   :  { %v1539_v16 = vpop.f32.mrf.mxu0 }
 0xdc2   :  { %v1540_v43 = vadd.f32 %v3061_v36, %v1539_v16 }
 0xdc3   :  { %v3376_v41 = vpop.f32.mrf.mxu0 }
 0xdc4   :  { %v1615_v38 = vmul.f32 %v3975_v2, %v1540_v43  ;;  %v4229_v23 = vmul.f32 %v3981_v6, %v1540_v43  ;;  %v4235_v51 = vmul.f32 %v3984_v8, %v1540_v43  ;;  %v1695_v2 = vmul.f32 %v3978_v3, %v1540_v43 }
 0xdc5   :  { %v1470_v6 = vadd.f32 %v3052_v32, %v1469_v34  ;;  %v1694_v8 = vmul.f32 %v3978_v3, %v1537_v17 }
 0xdc6   :  { %v1616_v18 = vpack.c.bf16 %v1615_v38, %v1614_v13  ;;  %v1861_v20 = vpack.c.bf16 %v4229_v23, %v4225_v46  ;;  %v1984_v53 = vpack.c.bf16 %v4235_v51, %v4232_v50 }
 0xdc7   :  { %v1696_v57 = vpack.c.bf16 %v1695_v2, %v1694_v8  ;;  %v4247_v58 = vpack.c.bf16 %v1470_v6, %v1467_v55 }
 0xdc8   :  { %v1621_v54 = vsel %vm206_vm2, %v1616_v18, 0 }
 0xdc9   :  { %3386 = vmatpush3.bf16.xpose.msra.mxu1 %v1621_v54  ;;  %v1698_v62 = vsel %vm206_vm2, %v1696_v57, 0 }
 0xdca   :  { %3391 = vmatprep.subr.bf16.mxu1 %v3758_v1 }
 0xdcd   :  { %v1606_v19 = vpop.f32.mrf.mxu0 }
 0xdce   :  { %v1607_v60 = vadd.f32 %v3070_v56, %v1606_v19 }
 0xdcf   :  { %v3383_v61 = vpop.f32.mrf.mxu0 }
 0xdd0   :  { %3388 = vmatmul.mubr.msk.bf16.vlgmr.msra.gmra.mxu1 %vm206_vm2, %v4247_v58  ;;  %v1690_v39 = vmul.f32 %v3701_v0, %v1607_v60  ;;  %v1767_v48 = vmul.f32 %v3702_v44, %v1607_v60  ;;  %v4258_v5 = vmul.f32 %v3703_v4, %v1607_v60  ;;  %v4261_v9 = vmul.f32 %v3704_v7, %v1607_v60 }
 0xdd1   :  { %v1609_v63 = vpop.f32.mrf.mxu0  ;;  %3392 = vmatpush3.bf16.xpose.msra.mxu1 %v1698_v62  ;;  %3393 = vmatprep.mubr.msk.bf16.mxu1 %vm3759_vm1, %v3758_v1 }
 0xdd2   :  { %v1610_v3 = vadd.f32 %v3070_v56, %v1609_v63  ;;  %3403 = vmatprep.subr.bf16.mxu1 %v3758_v1 }
 0xdd3   :  { %v3384_v10 = vpop.f32.mrf.mxu0 }
 0xdd4   :  { %v1691_v40 = vmul.f32 %v3701_v0, %v1610_v3  ;;  %v1768_v45 = vmul.f32 %v3702_v44, %v1610_v3  ;;  %v4263_v49 = vmul.f32 %v3703_v4, %v1610_v3  ;;  %v4265_v11 = vmul.f32 %v3704_v7, %v1610_v3 }
 0xdd6   :  { %v1769_v12 = vpack.c.bf16 %v1768_v45, %v1767_v48  ;;  %v1692_v14 = vpack.c.bf16 %v1691_v40, %v1690_v39  ;;  %v1934_v15 = vpack.c.bf16 %v4263_v49, %v4258_v5  ;;  %v2057_v21 = vpack.c.bf16 %v4265_v11, %v4261_v9  ;;  %v3705_v45 = vld [vmem:[%s3789_s21] sm:$0xff]  ;;  %v3575_v11 = vld [vmem:[%s4490_s0 + $0x18] sm:$0xff]  }
 0xdd7   :  { %v1986_v39 = vsel %vm206_vm2, %v1984_v53, 0 }
 0xdd8   :  { %3394 = vmatmul.mubr.msk.bf16.vlgmr.msra.gmra.mxu1 %vm206_vm2, %v4247_v58  ;;  %3398 = vmatpush3.bf16.msra.mxu0 %v1769_v12 }
 0xdd9   :  { %3404 = vmatpush3.bf16.msra.mxu1 %v1692_v14  ;;  %3409 = vmatprep.subr.bf16.mxu0 %v3758_v1 }
 0xdda   :  { %3405 = vmatprep.mubr.msk.bf16.mxu1 %vm3759_vm1, %v3758_v1  ;;  %3415 = vmatprep.subr.bf16.mxu1 %v3758_v1 }
 0xe90   :  { %v1657_v22 = vpop.f32.mrf.mxu1 }
 0xe91   :  { %v1664_v18 = vmul.f32 0.35355338, %v1657_v22 }
 0xe92   :  { %v3389_v25 = vpop.f32.mrf.mxu1 }
 0xe93   :  { %v1666_v6 = vadd.f32 %v1664_v18, %v4045_v52 }
 0xe94   :  { %v1660_v26 = vpop.f32.mrf.mxu1 }
 0xe95   :  { %v1665_v2 = vmul.f32 0.35355338, %v1660_v26  ;;  %v1668_v55 = vsel %vm520_vm3, %v1666_v6, -inf }
 0xe96   :  { %v3390_v27 = vpop.f32.mrf.mxu1 }
 0xe97   :  { %v1667_v57 = vadd.f32 %v1665_v2, %v4049_v59  ;;  %v3706_v27 = vld [vmem:[%s3789_s21 + $0x8] sm:$0xff]  ;;  %s4498_s21 = sld [smem:[#allocation16_spill]] }
 0xe98   :  { %v1734_v28 = vpop.f32.mrf.mxu1 }
 0xe99   :  { %v1741_v29 = vmul.f32 0.35355338, %v1734_v28  ;;  %v1671_v19 = vsel %vm520_vm3, %v1667_v57, -inf }
 0xe9a   :  { %v3395_v30 = vpop.f32.mrf.mxu1 }
 0xe9b   :  { %v1743_v31 = vadd.f32 %v1741_v29, %v4045_v52 }
 0xe9c   :  { %v1737_v33 = vpop.f32.mrf.mxu1 }
 0xe9d   :  { %v1742_v34 = vmul.f32 0.35355338, %v1737_v33  ;;  %v1745_v35 = vsel %vm520_vm3, %v1743_v31, -inf }
 0xe9e   :  { %1746 = vmax.xlane.f32.xlu0 %v1745_v35  ;;  %v3396_v36 = vpop.f32.mrf.mxu1 }
 0xe9f   :  { %v1744_v37 = vadd.f32 %v1742_v34, %v4049_v59  ;;  %v1863_v59 = vsel %vm206_vm2, %v1861_v20, 0 }
 0xea1   :  { %v1748_v17 = vsel %vm520_vm3, %v1744_v37, -inf }
 0xea2   :  { %1749 = vmax.xlane.f32.xlu1 %v1748_v17 }
 0xf27   :  { %v1747_v42 = vpop.xlane.xlu0 %1746 }
 0xf28   :  { %v1751_v16 = vsub.f32 %v1743_v31, %v1747_v42 }
 0xf2a   :  { %v1753_v43 = vmul.f32 1.442695, %v1751_v16 }
 0xf2b   :  { %v1750_v41 = vpop.xlane.xlu1 %1749 }
 0xf2c   :  { %3645 = vpow2.f32 %v1753_v43  ;;  %v1752_v13 = vsub.f32 %v1744_v37, %v1750_v41 }
 0xf2e   :  { %v1755_v38 = vmul.f32 1.442695, %v1752_v13 }
 0xf30   :  { %3647 = vpow2.f32 %v1755_v38 }
 0xf39   :  { %v3646_v54 = vpop.eup %3645 }
 0xf3a   :  { %v1757_v32 = vsel %vm520_vm3, %v3646_v54, 0.0 }
 0xf3b   :  { %1758 = vadd.xlane.f32.xlu0 %v1757_v32 }
 0xf3d   :  { %v3648_v8 = vpop.eup %3647 }
 0xf3e   :  { %v1760_v56 = vsel %vm520_vm3, %v3648_v8, 0.0 }
 0xf3f   :  { %1669 = vmax.xlane.f32.xlu0 %v1668_v55  ;;  %1761 = vadd.xlane.f32.xlu1 %v1760_v56 }
 0xf43   :  { %1672 = vmax.xlane.f32.xlu1 %v1671_v19 }
 0xfc4   :  { %v1759_v60 = vpop.xlane.xlu0 %1758 }
 0xfc5   :  { %3649 = vrcp.f32 %v1759_v60 }
 0xfc8   :  { %v1762_v61 = vpop.xlane.xlu1 %1761  ;;  %v1670_v46 = vpop.xlane.xlu0 %1669 }
 0xfc9   :  { %3651 = vrcp.f32 %v1762_v61  ;;  %v1674_v20 = vsub.f32 %v1666_v6, %v1670_v46 }
 0xfcb   :  { %v1676_v44 = vmul.f32 1.442695, %v1674_v20 }
 0xfcc   :  { %v1673_v50 = vpop.xlane.xlu1 %1672 }
 0xfcd   :  { %v1675_v48 = vsub.f32 %v1667_v57, %v1673_v50  ;;  %3653 = vpow2.f32 %v1676_v44 }
 0xfcf   :  { %v1678_v10 = vmul.f32 1.442695, %v1675_v48 }
 0xfd1   :  { %3655 = vpow2.f32 %v1678_v10 }
 0xfd2   :  { %v3650_v62 = vpop.eup %3649 }
 0xfd3   :  { %v1765_v52 = vmul.f32 %v3650_v62, %v3646_v54 }
 0xfd6   :  { %v3652_v63 = vpop.eup %3651 }
 0xfd7   :  { %v1766_v3 = vmul.f32 %v3652_v63, %v3648_v8 }
 0xfd9   :  { %v1770_v0 = vpack.c.bf16 %v1766_v3, %v1765_v52 }
 0xfda   :  { %v3654_v17 = vpop.eup %3653 }
 0xfdb   :  { %3400 = vmatmul.mubr.msk.bf16.vlgmr.msra.gmra.mxu0 %vm520_vm3, %v1770_v0  ;;  %v1680_v43 = vsel %vm520_vm3, %v3654_v17, 0.0 }
 0xfdc   :  { %3410 = vmatpush3.bf16.xpose.msra.mxu0 %v1863_v59  ;;  %3411 = vmatprep.mubr.msk.bf16.mxu0 %vm3759_vm1, %v3758_v1 }
 0xfdd   :  { %3421 = vmatprep.subr.bf16.mxu0 %v3758_v1 }
 0xfde   :  { %v3656_v13 = vpop.eup %3655 }
 0xfdf   :  { %v1683_v38 = vsel %vm520_vm3, %v3656_v13, 0.0 }
 0xfe3   :  { %3412 = vmatmul.mubr.msk.bf16.vlgmr.msra.gmra.mxu0 %vm206_vm2, %v4247_v58 }
 0xfe4   :  { %3422 = vmatpush3.bf16.xpose.msra.mxu0 %v1986_v39  ;;  %3423 = vmatprep.mubr.msk.bf16.mxu0 %vm3759_vm1, %v3758_v1 }
 0xfe5   :  { %3433 = vmatprep.subr.bf16.mxu0 %v3758_v1 }
 0xfeb   :  { %3424 = vmatmul.mubr.msk.bf16.vlgmr.msra.gmra.mxu0 %vm206_vm2, %v4247_v58 }
 0xfec   :  { %3437 = vmatprep.mubr.msk.bf16.mxu0 %vm3759_vm1, %v3758_v1 }
0x109b   :  { %v4308_v23 = vpop.f32.mrf.mxu0 }
0x109d   :  { %v3401_v51 = vpop.f32.mrf.mxu0 }
0x109f   :  { %v4310_v53 = vpop.f32.mrf.mxu0 }
0x10a1   :  { %v3402_v4 = vpop.f32.mrf.mxu0 }
0x10a3   :  { %v1899_v7 = vpop.f32.mrf.mxu0 }
0x10a4   :  { %v1906_v58 = vmul.f32 0.35355338, %v1899_v7 }
0x10a5   :  { %v3413_v40 = vpop.f32.mrf.mxu0 }
0x10a6   :  { %v1908_v12 = vadd.f32 %v3705_v45, %v1906_v58 }
0x10a7   :  { %v1902_v14 = vpop.f32.mrf.mxu0 }
0x10a8   :  { %v1907_v22 = vmul.f32 0.35355338, %v1902_v14  ;;  %v1910_v25 = vsel %vm520_vm3, %v1908_v12, -inf }
0x10a9   :  { %1911 = vmax.xlane.f32.xlu0 %v1910_v25  ;;  %v3414_v26 = vpop.f32.mrf.mxu0 }
0x10aa   :  { %v1909_v28 = vadd.f32 %v3706_v27, %v1907_v22 }
0x10ab   :  { %v2022_v29 = vpop.f32.mrf.mxu0 }
0x10ac   :  { %v2029_v30 = vmul.f32 0.35355338, %v2022_v29  ;;  %v1913_v31 = vsel %vm520_vm3, %v1909_v28, -inf }
0x10ad   :  { %1914 = vmax.xlane.f32.xlu1 %v1913_v31  ;;  %v3425_v33 = vpop.f32.mrf.mxu0 }
0x10ae   :  { %v2031_v34 = vadd.f32 %v3705_v45, %v2029_v30  ;;  %v3576_v33 = vld [vmem:[%s4490_s0 + $0x10] sm:$0xff]  }
0x10af   :  { %v2025_v35 = vpop.f32.mrf.mxu0 }
0x10b0   :  { %v2030_v36 = vmul.f32 0.35355338, %v2025_v35  ;;  %v2033_v37 = vsel %vm520_vm3, %v2031_v34, -inf }
0x10b1   :  { %2034 = vmax.xlane.f32.xlu0 %v2033_v37  ;;  %v3426_v42 = vpop.f32.mrf.mxu0 }
0x10b2   :  { %v2032_v16 = vadd.f32 %v3706_v27, %v2030_v36 }
0x10b4   :  { %v2036_v41 = vsel %vm520_vm3, %v2032_v16, -inf }
0x10b5   :  { %1681 = vadd.xlane.f32.xlu0 %v1680_v43  ;;  %2037 = vmax.xlane.f32.xlu1 %v2036_v41 }
0x10b9   :  { %1684 = vadd.xlane.f32.xlu1 %v1683_v38 }
0x1132   :  { %v1912_v18 = vpop.xlane.xlu0 %1911 }
0x1133   :  { %v1916_v54 = vsub.f32 %v1908_v12, %v1912_v18 }
0x1135   :  { %v1918_v2 = vmul.f32 1.442695, %v1916_v54 }
0x1136   :  { %v1915_v32 = vpop.xlane.xlu1 %1914 }
0x1137   :  { %3657 = vpow2.f32 %v1918_v2  ;;  %v1917_v6 = vsub.f32 %v1909_v28, %v1915_v32 }
0x1139   :  { %v1920_v8 = vmul.f32 1.442695, %v1917_v6 }
0x113a   :  { %v2035_v55 = vpop.xlane.xlu0 %2034 }
0x113b   :  { %3659 = vpow2.f32 %v1920_v8  ;;  %v2039_v56 = vsub.f32 %v2031_v34, %v2035_v55  ;;  %v2133_v34 = vsel %vm206_vm2, %v3576_v33, 0  ;;  %v3087_v8 = vld [vmem:[%s4491_s5 + $0x1] ss:$0 sm:$0xff] }
0x113d   :  { %v2041_v57 = vmul.f32 1.442695, %v2039_v56 }
0x113e   :  { %v2038_v19 = vpop.xlane.xlu1 %2037  ;;  %v1682_v60 = vpop.xlane.xlu0 %1681 }
0x113f   :  { %3661 = vpow2.f32 %v2041_v57  ;;  %v2040_v61 = vsub.f32 %v2032_v16, %v2038_v19 }
0x1140   :  { %3663 = vrcp.f32 %v1682_v60 }
0x1141   :  { %v2043_v62 = vmul.f32 1.442695, %v2040_v61 }
0x1142   :  { %v1685_v63 = vpop.xlane.xlu1 %1684 }
0x1143   :  { %3665 = vpow2.f32 %v2043_v62 }
0x1144   :  { %v3658_v52 = vpop.eup %3657  ;;  %3667 = vrcp.f32 %v1685_v63 }
0x1145   :  { %v1922_v3 = vsel %vm520_vm3, %v3658_v52, 0.0 }
0x1146   :  { %1923 = vadd.xlane.f32.xlu0 %v1922_v3  ;;  %v3578_v3 = vld [vmem:[%s4492_s9 + $0x70] sm:$0xff]  }
0x1148   :  { %v3660_v0 = vpop.eup %3659 }
0x1149   :  { %v1925_v59 = vsel %vm520_vm3, %v3660_v0, 0.0 }
0x114a   :  { %1926 = vadd.xlane.f32.xlu1 %v1925_v59  ;;  %v3579_v59 = vld [vmem:[%s4492_s9 + $0x68] sm:$0xff]  }
0x114c   :  { %v3662_v39 = vpop.eup %3661 }
0x114d   :  { %v2045_v46 = vsel %vm520_vm3, %v3662_v39, 0.0  ;;  %v3664_v20 = vpop.eup %3663 }
0x114e   :  { %2046 = vadd.xlane.f32.xlu0 %v2045_v46  ;;  %v1688_v48 = vmul.f32 %v3664_v20, %v3654_v17  ;;  %v3581_v20 = vld [vmem:[%s4492_s9 + $0x58] sm:$0xff]  }
0x1150   :  { %v3666_v50 = vpop.eup %3665 }
0x1151   :  { %v3668_v51 = vpop.eup %3667  ;;  %v2048_v44 = vsel %vm520_vm3, %v3666_v50, 0.0 }
0x1152   :  { %2049 = vadd.xlane.f32.xlu1 %v2048_v44  ;;  %v1689_v4 = vmul.f32 %v3668_v51, %v3656_v13 }
0x1154   :  { %v1693_v7 = vpack.c.bf16 %v1689_v4, %v1688_v48 }
0x1156   :  { %3406 = vmatmul.mubr.msk.bf16.vlgmr.msra.gmra.mxu1 %vm520_vm3, %v1693_v7 }
0x1157   :  { %3416 = vmatpush3.bf16.msra.mxu1 %v1934_v15  ;;  %3417 = vmatprep.mubr.msk.bf16.mxu1 %vm3759_vm1, %v3758_v1 }
0x1158   :  { %3427 = vmatprep.subr.bf16.mxu1 %v3758_v1 }
0x11cf   :  { %v1924_v10 = vpop.xlane.xlu0 %1923 }
0x11d0   :  { %3669 = vrcp.f32 %v1924_v10 }
0x11d3   :  { %v1927_v58 = vpop.xlane.xlu1 %1926 }
0x11d4   :  { %3671 = vrcp.f32 %v1927_v58 }
0x11d7   :  { %v2047_v40 = vpop.xlane.xlu0 %2046 }
0x11d8   :  { %3673 = vrcp.f32 %v2047_v40 }
0x11db   :  { %v2050_v45 = vpop.xlane.xlu1 %2049 }
0x11dc   :  { %3675 = vrcp.f32 %v2050_v45 }
0x11dd   :  { %v3670_v12 = vpop.eup %3669 }
0x11de   :  { %v1930_v22 = vmul.f32 %v3670_v12, %v3658_v52  ;;  %v3577_v52 = vld [vmem:[%s4492_s9 + $0x78] sm:$0xff]  }
0x11e1   :  { %v3672_v14 = vpop.eup %3671 }
0x11e2   :  { %v1931_v25 = vmul.f32 %v3672_v14, %v3660_v0  ;;  %v2315_v0 = vsel %vm206_vm2, %v3578_v3, 0  ;;  %v3582_v14 = vld [vmem:[%s4492_s9 + $0x50] sm:$0xff]  }
0x11e4   :  { %v1935_v26 = vpack.c.bf16 %v1931_v25, %v1930_v22  ;;  %v2303_v22 = vsel %vm206_vm2, %v3582_v14, 0  ;;  %v3583_v25 = vld [vmem:[%s4492_s9 + $0x48] sm:$0xff]  }
0x11e5   :  { %v3674_v5 = vpop.eup %3673 }
0x11e6   :  { %3418 = vmatmul.mubr.msk.bf16.vlgmr.msra.gmra.mxu1 %vm520_vm3, %v1935_v26  ;;  %v2053_v15 = vmul.f32 %v3674_v5, %v3662_v39  ;;  %v3580_v39 = vld [vmem:[%s4492_s9 + $0x60] sm:$0xff]   ;;  %v2300_v26 = vsel %vm206_vm2, %v3583_v25, 0 }
0x11e7   :  { %3428 = vmatpush3.bf16.msra.mxu1 %v2057_v21  ;;  %3429 = vmatprep.mubr.msk.bf16.mxu1 %vm3759_vm1, %v3758_v1  ;;  %v2136_v21 = vsel %vm206_vm2, %v3575_v11, 0  ;;  %v2309_v46 = vsel %vm206_vm2, %v3580_v39, 0  ;;  %v3584_v5 = vld [vmem:[%s4492_s9 + $0x40] sm:$0xff]  }
0x11e8   :  { %3441 = vmatprep.subr.bf16.mxu1 %v3758_v1  ;;  %3434 = vmatpush3.bf16.xpose.msra.mxu0 %v2136_v21  ;;  %v3093_v21 = vld [vmem:[%s4493_s13 + $0x1] ss:$0 sm:$0xff] }
0x11e9   :  { %v3676_v49 = vpop.eup %3675  ;;  %3435 = vmatprep.subr.bf16.mxu0 %v3758_v1 }
0x11ea   :  { %v2054_v27 = vmul.f32 %v3676_v49, %v3666_v50  ;;  %v2306_v50 = vsel %vm206_vm2, %v3581_v20, 0  ;;  %v2297_v49 = vsel %vm206_vm2, %v3584_v5, 0 }
0x11ec   :  { %v2058_v28 = vpack.c.bf16 %v2054_v27, %v2053_v15 }
0x11ee   :  { %3430 = vmatmul.mubr.msk.bf16.vlgmr.msra.gmra.mxu1 %vm520_vm3, %v2058_v28 }
0x11ef   :  { %3457 = vmatprep.mubr.msk.bf16.mxu1 %vm3759_vm1, %v3758_v1 }
0x11f0   :  { %3436 = vmatpush3.bf16.xpose.msra.mxu0 %v2133_v34 }
0x11f1   :  { %3461 = vmatprep.subr.bf16.mxu0 %v3758_v1 }
0x1216   :  { %v1852_v29 = vpop.f32.mrf.mxu1 }
0x1217   :  { %v1853_v16 = vadd.f32 %v1852_v29, %v4308_v23 }
0x1218   :  { %v3407_v30 = vpop.f32.mrf.mxu1 }
0x121a   :  { %v1855_v31 = vpop.f32.mrf.mxu1 }
0x121b   :  { %v1856_v43 = vadd.f32 %v1855_v31, %v4310_v53 }
0x121c   :  { %v3408_v9 = vpop.f32.mrf.mxu1 }
0x12a6   :  { %v1973_v35 = vpop.f32.mrf.mxu1 }
0x12a7   :  { %v1980_v13 = vadd.f32 %v1973_v35, %v1853_v16 }
0x12a8   :  { %v3419_v36 = vpop.f32.mrf.mxu1 }
0x12a9   :  { %v3094_v36 = vld [vmem:[%s4494_s17 + $0x1] ss:$0 sm:$0xff] }
0x12aa   :  { %v1976_v37 = vpop.f32.mrf.mxu1 }
0x12ab   :  { %v1981_v38 = vadd.f32 %v1976_v37, %v1856_v43  ;;  %v3585_v43 = vld [vmem:[%s4495_s7 + $0x18] sm:$0xff]  }
0x12ac   :  { %v3420_v17 = vpop.f32.mrf.mxu1 }
0x12ae   :  { %v2096_v42 = vpop.f32.mrf.mxu1 }
0x12af   :  { %v2103_v54 = vadd.f32 %v2096_v42, %v1980_v13  ;;  %v3112_v13 = vld [vmem:[%s4496_s10 + $0x1] ss:$0 sm:$0xff] }
0x12b0   :  { %v3431_v41 = vpop.f32.mrf.mxu1 }
0x12b1   :  { %v3586_v41 = vld [vmem:[%s4495_s7 + $0x10] sm:$0xff]  }
0x12b2   :  { %v2099_v18 = vpop.f32.mrf.mxu1 }
0x12b3   :  { %v2104_v2 = vadd.f32 %v2099_v18, %v1981_v38 }
0x12b4   :  { %v3432_v32 = vpop.f32.mrf.mxu1 }
0x12b5   :  { %v2105_v6 = vpack.c.bf16 %v2104_v2, %v2103_v54 }
0x12b7   :  { %3438 = vmatmul.mubr.msk.bf16.vlgmr.msra.gmra.mxu0 %vm206_vm2, %v2105_v6 }
0x12b8   :  { %3465 = vmatprep.mubr.msk.bf16.mxu0 %vm3759_vm1, %v3758_v1  ;;  %3462 = vmatpush3.bf16.xpose.msra.mxu0 %v3585_v43 }
0x12b9   :  { %3463 = vmatprep.subr.bf16.mxu0 %v3758_v1 }
0x12c0   :  { %3464 = vmatpush3.bf16.xpose.msra.mxu0 %v3586_v41 }
0x12c1   :  { %3469 = vmatprep.subr.bf16.mxu0 %v3758_v1 }
0x1377   :  { %v2172_v55 = vpop.f32.mrf.mxu0 }
0x1378   :  { %v2173_v23 = vadd.f32 %v3087_v8, %v2172_v55 }
0x1379   :  { %v3439_v56 = vpop.f32.mrf.mxu0 }
0x137a   :  { %v4354_v53 = vadd.f32 %v2173_v23, %v4180_v24  ;;  %v2318_v24 = vsel %vm206_vm2, %v3577_v52, 0 }
0x137b   :  { %v2175_v57 = vpop.f32.mrf.mxu0  ;;  %3442 = vmatpush3.bf16.xpose.msra.mxu1 %v2318_v24 }
0x137c   :  { %v2176_v19 = vadd.f32 %v3087_v8, %v2175_v57  ;;  %v2185_v60 = vsel %vm206_vm2, %v4354_v53, 0.0  ;;  %3443 = vmatprep.subr.bf16.mxu1 %v3758_v1 }
0x137d   :  { %2186 = vadd.xlane.f32.xlu0 %v2185_v60  ;;  %v3440_v61 = vpop.f32.mrf.mxu0 }
0x137e   :  { %v4359_v62 = vadd.f32 %v2176_v19, %v4185_v47  ;;  %v2312_v47 = vsel %vm206_vm2, %v3579_v59, 0 }
0x1380   :  { %v2188_v63 = vsel %vm206_vm2, %v4359_v62, 0.0 }
0x1381   :  { %2189 = vadd.xlane.f32.xlu1 %v2188_v63 }
0x1383   :  { %3444 = vmatpush3.bf16.xpose.msra.mxu1 %v2315_v0 }
0x1384   :  { %3445 = vmatprep.subr.bf16.mxu1 %v3758_v1 }
0x138b   :  { %3446 = vmatpush3.bf16.xpose.msra.mxu1 %v2312_v47 }
0x138c   :  { %3447 = vmatprep.subr.bf16.mxu1 %v3758_v1 }
0x1393   :  { %3448 = vmatpush3.bf16.xpose.msra.mxu1 %v2309_v46 }
0x1394   :  { %3449 = vmatprep.subr.bf16.mxu1 %v3758_v1 }
0x139b   :  { %3450 = vmatpush3.bf16.xpose.msra.mxu1 %v2306_v50 }
0x139c   :  { %3451 = vmatprep.subr.bf16.mxu1 %v3758_v1 }
0x13a3   :  { %3452 = vmatpush3.bf16.xpose.msra.mxu1 %v2303_v22 }
0x13a4   :  { %3453 = vmatprep.subr.bf16.mxu1 %v3758_v1 }
0x13ab   :  { %3454 = vmatpush3.bf16.xpose.msra.mxu1 %v2300_v26 }
0x13ac   :  { %3455 = vmatprep.subr.bf16.mxu1 %v3758_v1 }
0x13b3   :  { %3456 = vmatpush3.bf16.xpose.msra.mxu1 %v2297_v49 }
0x13b4   :  { %3493 = vmatprep.subr.bf16.mxu1 %v3758_v1 }
0x1406   :  { %v2187_v51 = vpop.xlane.xlu0 %2186 }
0x1407   :  { %v2191_v44 = vmul.f32 0.03125, %v2187_v51 }
0x1409   :  { %v2193_v48 = vsub.f32 %v4354_v53, %v2191_v44 }
0x140a   :  { %v2190_v4 = vpop.xlane.xlu1 %2189 }
0x140b   :  { %v2192_v7 = vmul.f32 0.03125, %v2190_v4  ;;  %v2195_v10 = vmul.f32 %v2193_v48, %v2193_v48 }
0x140d   :  { %v2194_v58 = vsub.f32 %v4359_v62, %v2192_v7  ;;  %v2197_v40 = vsel %vm206_vm2, %v2195_v10, 0.0 }
0x140e   :  { %2198 = vadd.xlane.f32.xlu0 %v2197_v40 }
0x140f   :  { %v2196_v45 = vmul.f32 %v2194_v58, %v2194_v58 }
0x1411   :  { %v2200_v12 = vsel %vm206_vm2, %v2196_v45, 0.0 }
0x1412   :  { %2201 = vadd.xlane.f32.xlu1 %v2200_v12 }
0x1497   :  { %v2199_v15 = vpop.xlane.xlu0 %2198 }
0x1498   :  { %v2203_v27 = vmul.f32 0.03125, %v2199_v15 }
0x149a   :  { %v2205_v28 = vadd.f32 1e-05, %v2203_v27 }
0x149b   :  { %v2202_v29 = vpop.xlane.xlu1 %2201 }
0x149c   :  { %3677 = vrsqrt.f32 %v2205_v28  ;;  %v2204_v30 = vmul.f32 0.03125, %v2202_v29 }
0x149e   :  { %v2206_v31 = vadd.f32 1e-05, %v2204_v30 }
0x14a0   :  { %3679 = vrsqrt.f32 %v2206_v31 }
0x14a9   :  { %v3678_v9 = vpop.eup %3677 }
0x14aa   :  { %v2209_v11 = vmul.f32 %v3678_v9, %v2193_v48 }
0x14ac   :  { %v2217_v35 = vmul.f32 %v3093_v21, %v2209_v11 }
0x14ad   :  { %v3680_v33 = vpop.eup %3679 }
0x14ae   :  { %v2210_v34 = vmul.f32 %v3680_v33, %v2194_v58  ;;  %v2225_v17 = vadd.f32 %v3094_v36, %v2217_v35 }
0x14b0   :  { %v2218_v37 = vmul.f32 %v3093_v21, %v2210_v34 }
0x14b2   :  { %v2226_v42 = vadd.f32 %v3094_v36, %v2218_v37 }
0x14b4   :  { %v2227_v16 = vpack.c.bf16 %v2226_v42, %v2225_v17 }
0x14b6   :  { %3458 = vmatmul.mubr.msk.bf16.vlgmr.msra.gmra.mxu1 %vm206_vm2, %v2227_v16  ;;  %v3127_v16 = vld [vmem:[%s4497_s11 + $0x1] ss:$0 sm:$0xff] }
0x14b7   :  { %3497 = vmatprep.mubr.msk.bf16.mxu1 %vm3759_vm1, %v3758_v1 }
0x1576   :  { %v2354_v38 = vpop.f32.mrf.mxu1 }
0x1577   :  { %v2355_v18 = vadd.f32 %v3112_v13, %v2354_v38 }
0x1578   :  { %v3459_v54 = vpop.f32.mrf.mxu1 }
0x1579   :  { %v2363_v2 = vmul.f32 0.70710677, %v2355_v18  ;;  %v2361_v34 = vmul.f32 0.5, %v2355_v18 }
0x157a   :  { %v2357_v32 = vpop.f32.mrf.mxu1 }
0x157b   :  { %v2365_v6 = vand.u32 2147483647, %v2363_v2  ;;  %v2358_v8 = vadd.f32 %v3112_v13, %v2357_v32  ;;  %vm2405_vm6 = vcmp.ge.f32.partialorder %v2363_v2, 0.0 }
0x157c   :  { %v3460_v55 = vpop.f32.mrf.mxu1 }
0x157d   :  { %v2367_v23 = vmul.f32 0.3275911, %v2365_v6  ;;  %v2364_v56 = vmul.f32 0.70710677, %v2358_v8  ;;  %v2393_v63 = vsub.f32 0.0, %v2365_v6  ;;  %v2362_v35 = vmul.f32 0.5, %v2358_v8 }
0x157f   :  { %v2369_v57 = vadd.f32 1.0, %v2367_v23  ;;  %v2366_v19 = vand.u32 2147483647, %v2364_v56  ;;  %v2395_v52 = vmul.f32 %v2393_v63, %v2365_v6  ;;  %vm2406_vm7 = vcmp.ge.f32.partialorder %v2364_v56, 0.0 }
0x1581   :  { %3681 = vrcp.f32 %v2369_v57  ;;  %v2368_v60 = vmul.f32 0.3275911, %v2366_v19  ;;  %v2394_v24 = vsub.f32 0.0, %v2366_v19  ;;  %v2397_v59 = vmul.f32 1.442695, %v2395_v52 }
0x1583   :  { %v2370_v61 = vadd.f32 1.0, %v2368_v60  ;;  %v2396_v47 = vmul.f32 %v2394_v24, %v2366_v19  ;;  %v3587_v24 = vld [vmem:[%s4498_s21 + $0x8] sm:$0xff]  }
0x1585   :  { %3683 = vrcp.f32 %v2370_v61  ;;  %v2399_v51 = vmul.f32 1.442695, %v2396_v47 }
0x1586   :  { %3685 = vpow2.f32 %v2397_v59 }
0x1587   :  { %3687 = vpow2.f32 %v2399_v51 }
0x158e   :  { %v3682_v3 = vpop.eup %3681 }
0x158f   :  { %v2375_v0 = vmul.f32 1.0614054, %v3682_v3 }
0x1591   :  { %v2377_v39 = vadd.f32 -1.4531521, %v2375_v0 }
0x1592   :  { %v3684_v46 = vpop.eup %3683 }
0x1593   :  { %v2379_v20 = vmul.f32 %v3682_v3, %v2377_v39  ;;  %v2376_v50 = vmul.f32 1.0614054, %v3684_v46  ;;  %v3686_v26 = vpop.eup %3685 }
0x1594   :  { %v3688_v28 = vpop.eup %3687 }
0x1595   :  { %v2381_v44 = vadd.f32 1.4214138, %v2379_v20  ;;  %v2378_v48 = vadd.f32 -1.4531521, %v2376_v50 }
0x1597   :  { %v2383_v4 = vmul.f32 %v3682_v3, %v2381_v44  ;;  %v2380_v7 = vmul.f32 %v3684_v46, %v2378_v48  ;;  %v3130_v44 = vld [vmem:[%s4499_s25] ss:$0 sm:$0xff] }
0x1599   :  { %v2385_v10 = vadd.f32 -0.28449672, %v2383_v4  ;;  %v2382_v58 = vadd.f32 1.4214138, %v2380_v7  ;;  %v3131_v4 = vld [vmem:[%s4500_s29] ss:$0 sm:$0xff] }
0x159b   :  { %v2387_v40 = vmul.f32 %v3682_v3, %v2385_v10  ;;  %v2384_v45 = vmul.f32 %v3684_v46, %v2382_v58 }
0x159d   :  { %v2389_v12 = vadd.f32 0.2548296, %v2387_v40  ;;  %v2386_v14 = vadd.f32 -0.28449672, %v2384_v45 }
0x159f   :  { %v2391_v22 = vmul.f32 %v3682_v3, %v2389_v12  ;;  %v2388_v25 = vmul.f32 %v3684_v46, %v2386_v14  ;;  %v3588_v3 = vld [vmem:[%s4498_s21] sm:$0xff]  }
0x15a0   :  { %v2568_v0 = vsel %vm206_vm2, %v3588_v3, 0 }
0x15a1   :  { %v2401_v5 = vmul.f32 %v3686_v26, %v2391_v22  ;;  %v2390_v49 = vadd.f32 0.2548296, %v2388_v25 }
0x15a3   :  { %v2403_v15 = vsub.f32 1.0, %v2401_v5  ;;  %v2392_v27 = vmul.f32 %v3684_v46, %v2390_v49 }
0x15a5   :  { %v2407_v29 = vsub.f32 0.0, %v2403_v15  ;;  %v2402_v30 = vmul.f32 %v3688_v28, %v2392_v27 }
0x15a7   :  { %v2409_v31 = vsel %vm2405_vm6, %v2403_v15, %v2407_v29  ;;  %v2404_v9 = vsub.f32 1.0, %v2402_v30 }
0x15a8   :  { %v2411_v21 = vadd.f32 1.0, %v2409_v31 }
0x15a9   :  { %v2408_v11 = vsub.f32 0.0, %v2404_v9 }
0x15aa   :  { %v2413_v37 = vmul.f32 %v2411_v21, %v2361_v34 }
0x15ab   :  { %v2410_v33 = vsel %vm2406_vm7, %v2404_v9, %v2408_v11  ;;  %v3589_v9 = vld [vmem:[%s4501_s3 + $0x8] sm:$0xff]  }
0x15ac   :  { %v2412_v36 = vadd.f32 1.0, %v2410_v33 }
0x15ae   :  { %v2414_v17 = vmul.f32 %v2412_v36, %v2362_v35  ;;  %v4428_v36 = vsel %vm206_vm2, %v3589_v9, 0 }
0x15b0   :  { %v2415_v42 = vpack.c.bf16 %v2414_v17, %v2413_v37 }
0x15b2   :  { %3466 = vmatmul.mubr.bf16.vlgmr.msra.gmra.mxu0 %v2415_v42 }
0x15b3   :  { %3473 = vmatprep.mubr.msk.bf16.mxu0 %vm3759_vm1, %v3758_v1 }
0x1672   :  { %v2475_v43 = vpop.f32.mrf.mxu0 }
0x1673   :  { %v2476_v41 = vadd.f32 %v3127_v16, %v2475_v43  ;;  %v3590_v43 = vld [vmem:[%s4501_s3] sm:$0xff]  }
0x1674   :  { %v3467_v13 = vpop.f32.mrf.mxu0 }
0x1675   :  { %v2482_v38 = vadd.f32 %v2476_v41, %v4354_v53  ;;  %v4440_v13 = vsel %vm206_vm2, %v3590_v43, 0 }
0x1676   :  { %v2478_v54 = vpop.f32.mrf.mxu0 }
0x1677   :  { %v2479_v2 = vadd.f32 %v3127_v16, %v2478_v54  ;;  %v2486_v32 = vsel %vm206_vm2, %v2482_v38, 0.0 }
0x1678   :  { %2487 = vadd.xlane.f32.xlu0 %v2486_v32  ;;  %v3468_v18 = vpop.f32.mrf.mxu0  ;;  %v3591_v32 = vld [vmem:[%s3904_s20 + $0x8] sm:$0xff]  }
0x1679   :  { %v2483_v6 = vadd.f32 %v2479_v2, %v4359_v62  ;;  %v2571_v62 = vsel %vm206_vm2, %v3587_v24, 0  ;;  %v2724_v18 = vsel %vm206_vm2, %v3591_v32, 0 }
0x167a   :  { %3470 = vmatpush3.bf16.xpose.msra.mxu0 %v2571_v62  ;;  %3494 = vmatpush3.bf16.xpose.msra.mxu1 %v2571_v62 }
0x167b   :  { %v2489_v8 = vsel %vm206_vm2, %v2483_v6, 0.0  ;;  %3471 = vmatprep.subr.bf16.mxu0 %v3758_v1  ;;  %3495 = vmatprep.subr.bf16.mxu1 %v3758_v1 }
0x167c   :  { %2490 = vadd.xlane.f32.xlu0 %v2489_v8 }
0x1682   :  { %3472 = vmatpush3.bf16.xpose.msra.mxu0 %v2568_v0  ;;  %3496 = vmatpush3.bf16.xpose.msra.mxu1 %v2568_v0 }
0x1683   :  { %3477 = vmatprep.subr.bf16.mxu0 %v3758_v1  ;;  %3509 = vmatprep.subr.bf16.mxu1 %v3758_v1 }
0x1701   :  { %v2488_v55 = vpop.xlane.xlu0 %2487 }
0x1702   :  { %v2492_v23 = vmul.f32 0.03125, %v2488_v55 }
0x1704   :  { %v2494_v56 = vsub.f32 %v2482_v38, %v2492_v23 }
0x1705   :  { %v2491_v57 = vpop.xlane.xlu0 %2490 }
0x1706   :  { %v2493_v19 = vmul.f32 0.03125, %v2491_v57  ;;  %v2496_v60 = vmul.f32 %v2494_v56, %v2494_v56 }
0x1708   :  { %v2495_v53 = vsub.f32 %v2483_v6, %v2493_v19  ;;  %v2498_v61 = vsel %vm206_vm2, %v2496_v60, 0.0  ;;  %v3592_v6 = vld [vmem:[%s3904_s20] sm:$0xff]  }
0x1709   :  { %2499 = vadd.xlane.f32.xlu1 %v2498_v61  ;;  %v2721_v8 = vsel %vm206_vm2, %v3592_v6, 0 }
0x170a   :  { %v2497_v63 = vmul.f32 %v2495_v53, %v2495_v53 }
0x170c   :  { %v2501_v52 = vsel %vm206_vm2, %v2497_v63, 0.0 }
0x170d   :  { %2502 = vadd.xlane.f32.xlu1 %v2501_v52  ;;  %v2672_v52 = vld [vmem:[%s3899_s12] sm:$0x1] }
0x1792   :  { %v2500_v59 = vpop.xlane.xlu1 %2499 }
0x1793   :  { %v2504_v47 = vmul.f32 0.03125, %v2500_v59 }
0x1795   :  { %v2506_v39 = vadd.f32 1e-05, %v2504_v47 }
0x1796   :  { %v2503_v46 = vpop.xlane.xlu1 %2502 }
0x1797   :  { %3689 = vrsqrt.f32 %v2506_v39  ;;  %v2505_v20 = vmul.f32 0.03125, %v2503_v46 }
0x1799   :  { %v2507_v50 = vadd.f32 1e-05, %v2505_v20 }
0x179b   :  { %3691 = vrsqrt.f32 %v2507_v50 }
0x17a4   :  { %v3690_v51 = vpop.eup %3689 }
0x17a5   :  { %v2510_v48 = vmul.f32 %v3690_v51, %v2494_v56 }
0x17a7   :  { %v2518_v7 = vmul.f32 %v3130_v44, %v2510_v48 }
0x17a8   :  { %v3692_v10 = vpop.eup %3691 }
0x17a9   :  { %v2511_v58 = vmul.f32 %v3692_v10, %v2495_v53  ;;  %v2526_v40 = vadd.f32 %v3131_v4, %v2518_v7 }
0x17ab   :  { %v2519_v45 = vmul.f32 %v3130_v44, %v2511_v58  ;;  %v2537_v12 = vsel %vm206_vm2, %v2526_v40, -inf  ;;  %v2528_v14 = vsel %vm206_vm2, %v2526_v40, 0.0 }
0x17ac   :  { %v2538_v22 = vrot.slane %v2537_v12, 4  ;;  %v2529_v25 = vrot.slane %v2528_v14, 4 }
0x17ad   :  { %v4422_v26 = vadd.f32 %v3131_v4, %v2519_v45 }
0x17ae   :  { %v2539_v5 = vmax.f32 %v2537_v12, %v2538_v22  ;;  %v2530_v28 = vadd.f32 %v2529_v25, %v2528_v14 }
0x17af   :  { %v2774_v49 = vsel %vm206_vm2, %v4422_v26, -inf  ;;  %v2766_v22 = vsel %vm206_vm2, %v4422_v26, 0.0 }
0x17b0   :  { %v2540_v15 = vrot.slane %v2539_v5, 2  ;;  %v2775_v27 = vrot.slane %v2774_v49, 4  ;;  %v2531_v21 = vrot.slane %v2530_v28, 2 }
0x17b2   :  { %v2541_v29 = vmax.f32 %v2539_v5, %v2540_v15  ;;  %v2776_v30 = vmax.f32 %v2774_v49, %v2775_v27  ;;  %v2532_v17 = vadd.f32 %v2531_v21, %v2530_v28  ;;  %v2767_v49 = vrot.slane %v2766_v22, 4 }
0x17b4   :  { %v2542_v31 = vrot.slane %v2541_v29, 1  ;;  %v2777_v11 = vrot.slane %v2776_v30, 2  ;;  %v2533_v41 = vrot.slane %v2532_v17, 1  ;;  %v2768_v28 = vadd.f32 %v2767_v49, %v2766_v22 }
0x17b6   :  { %v2543_v33 = vmax.f32 %v2541_v29, %v2542_v31  ;;  %v2778_v34 = vmax.f32 %v2776_v30, %v2777_v11  ;;  %v2534_v38 = vadd.f32 %v2533_v41, %v2532_v17  ;;  %v2769_v11 = vrot.slane %v2768_v28, 2 }
0x17b8   :  { %v2549_v35 = vpack.c.bf16 %v2543_v33, %v2543_v33  ;;  %v2779_v37 = vrot.slane %v2778_v34, 1  ;;  %v2536_v54 = vmul.f32 0.125, %v2534_v38 }
0x17ba   :  { %3474 = vmatmul.mubr.msk.bf16.vlgmr.msra.gmra.mxu0 %vm206_vm2, %v2549_v35  ;;  %v2780_v42 = vmax.f32 %v2778_v34, %v2779_v37  ;;  %v2544_v2 = vpack.c.bf16 %v2536_v54, %v2536_v54  ;;  %v2770_v34 = vadd.f32 %v2769_v11, %v2768_v28 }
0x17bb   :  { %3478 = vmatpush3.bf16.xpose.msra.mxu0 %v4428_v36  ;;  %3481 = vmatprep.mubr.msk.bf16.mxu0 %vm3759_vm1, %v3758_v1 }
0x17bc   :  { %v2782_v16 = vpack.c.bf16 %v2780_v42, %v2780_v42  ;;  %3479 = vmatprep.subr.bf16.mxu0 %v3758_v1  ;;  %v2771_v26 = vrot.slane %v2770_v34, 1 }
0x17be   :  { %3498 = vmatmul.mubr.msk.bf16.vlgmr.msra.gmra.mxu1 %vm206_vm2, %v2782_v16  ;;  %v2772_v35 = vadd.f32 %v2771_v26, %v2770_v34 }
0x17bf   :  { %3513 = vmatprep.mubr.msk.bf16.mxu1 %vm3759_vm1, %v3758_v1  ;;  %3510 = vmatpush3.bf16.xpose.msra.mxu1 %v2724_v18 }
0x17c0   :  { %3511 = vmatprep.subr.bf16.mxu1 %v3758_v1  ;;  %v2773_v37 = vmul.f32 0.125, %v2772_v35 }
0x17c2   :  { %v2781_v17 = vpack.c.bf16 %v2773_v37, %v2773_v37 }
0x17c3   :  { %3480 = vmatpush3.bf16.xpose.msra.mxu0 %v4440_v13 }
0x17c4   :  { %3485 = vmatprep.subr.bf16.mxu0 %v3758_v1 }
0x17c7   :  { %3512 = vmatpush3.bf16.xpose.msra.mxu1 %v2721_v8 }
0x17ca   :  { %3482 = vmatmul.mubr.msk.bf16.vlgmr.msra.gmra.mxu0 %vm206_vm2, %v2544_v2 }
0x17cb   :  { %3489 = vmatprep.mubr.msk.bf16.mxu0 %vm3759_vm1, %v3758_v1  ;;  %3486 = vmatpush3.bf16.xpose.msra.mxu0 %v2724_v18 }
0x17cc   :  { %3487 = vmatprep.subr.bf16.mxu0 %v3758_v1 }
0x17d3   :  { %3488 = vmatpush3.bf16.xpose.msra.mxu0 %v2721_v8 }
0x17d4   :  { %3501 = vmatprep.subr.bf16.mxu0 %v3758_v1 }
0x187a   :  { %v2607_v55 = vpop.f32.mrf.mxu0 }
0x187c   :  { %v3475_v23 = vpop.f32.mrf.mxu0 }
0x187e   :  { %v2610_v56 = vpop.f32.mrf.mxu0  ;;  %v2820_v57 = vpop.f32.mrf.mxu1 }
0x1880   :  { %v3476_v19 = vpop.f32.mrf.mxu0  ;;  %v3499_v60 = vpop.f32.mrf.mxu1 }
0x1882   :  { %v2823_v53 = vpop.f32.mrf.mxu1 }
0x1884   :  { %v3500_v61 = vpop.f32.mrf.mxu1 }
0x188a   :  { %v2666_v63 = vpop.f32.mrf.mxu0 }
0x188b   :  { %v2667_v24 = vadd.f32 %v2666_v63, %v2607_v55 }
0x188c   :  { %v3483_v62 = vpop.f32.mrf.mxu0 }
0x188d   :  { %v2673_v3 = vadd.f32 %v2672_v52, %v2667_v24 }
0x188e   :  { %v2669_v0 = vpop.f32.mrf.mxu0 }
0x188f   :  { %v2675_v59 = vmul.f32 0.70710677, %v2673_v3  ;;  %v2674_v31 = vmul.f32 0.5, %v2673_v3 }
0x1890   :  { %v3484_v47 = vpop.f32.mrf.mxu0 }
0x1891   :  { %v2676_v39 = vand.u32 2147483647, %v2675_v59  ;;  %vm2696_vm8 = vcmp.ge.f32.partialorder %v2675_v59, 0.0 }
0x1893   :  { %v2677_v46 = vmul.f32 0.3275911, %v2676_v39  ;;  %v2690_v50 = vsub.f32 0.0, %v2676_v39 }
0x1895   :  { %v2678_v20 = vadd.f32 1.0, %v2677_v46  ;;  %v2691_v51 = vmul.f32 %v2690_v50, %v2676_v39 }
0x1897   :  { %3693 = vrcp.f32 %v2678_v20  ;;  %v2692_v4 = vmul.f32 1.442695, %v2691_v51 }
0x1899   :  { %3695 = vpow2.f32 %v2692_v4 }
0x18a4   :  { %v3694_v44 = vpop.eup %3693 }
0x18a5   :  { %v2681_v48 = vmul.f32 1.0614054, %v3694_v44 }
0x18a6   :  { %v3696_v5 = vpop.eup %3695 }
0x18a7   :  { %v2682_v7 = vadd.f32 -1.4531521, %v2681_v48  ;;  %v2706_v48 = vld [vmem:[%s3909_s27] sm:$0x1] }
0x18a9   :  { %v2683_v10 = vmul.f32 %v3694_v44, %v2682_v7 }
0x18ab   :  { %v2684_v58 = vadd.f32 1.4214138, %v2683_v10 }
0x18ad   :  { %v2685_v40 = vmul.f32 %v3694_v44, %v2684_v58 }
0x18af   :  { %v2686_v45 = vadd.f32 -0.28449672, %v2685_v40 }
0x18b1   :  { %v2687_v12 = vmul.f32 %v3694_v44, %v2686_v45 }
0x18b3   :  { %v2688_v14 = vadd.f32 0.2548296, %v2687_v12 }
0x18b5   :  { %v2689_v25 = vmul.f32 %v3694_v44, %v2688_v14 }
0x18b7   :  { %v2694_v15 = vmul.f32 %v3696_v5, %v2689_v25 }
0x18b9   :  { %v2695_v27 = vsub.f32 1.0, %v2694_v15 }
0x18bb   :  { %v2697_v29 = vsub.f32 0.0, %v2695_v27 }
0x18bd   :  { %v2698_v30 = vsel %vm2696_vm8, %v2695_v27, %v2697_v29 }
0x18be   :  { %v2699_v9 = vadd.f32 1.0, %v2698_v30 }
0x18c0   :  { %v2700_v21 = vmul.f32 %v2699_v9, %v2674_v31 }
0x18c2   :  { %v2701_v33 = vpack.c.bf16 %v2700_v21, %v2700_v21 }
0x18c4   :  { %3490 = vmatmul.mubr.msk.bf16.vlgmr.msra.gmra.mxu0 %vm206_vm2, %v2701_v33 }
0x18c5   :  { %3502 = vmatpush3.bf16.xpose.msra.mxu0 %v4428_v36  ;;  %3505 = vmatprep.mubr.msk.bf16.mxu0 %vm3759_vm1, %v3758_v1 }
0x18c6   :  { %3503 = vmatprep.subr.bf16.mxu0 %v3758_v1 }
0x18cd   :  { %3504 = vmatpush3.bf16.xpose.msra.mxu0 %v4440_v13 }
0x18d4   :  { %3506 = vmatmul.mubr.msk.bf16.vlgmr.msra.gmra.mxu0 %vm206_vm2, %v2781_v17 }
0x1984   :  { %v2760_v42 = vpop.f32.mrf.mxu0 }
0x1985   :  { %v2761_v58 = vadd.f32 %v2760_v42, %v2706_v48 }
0x1986   :  { %v3491_v16 = vpop.f32.mrf.mxu0 }
0x1988   :  { %v2763_v43 = vpop.f32.mrf.mxu0 }
0x198a   :  { %v3492_v41 = vpop.f32.mrf.mxu0 }
0x1994   :  { %v2863_v38 = vpop.f32.mrf.mxu0 }
0x1995   :  { %v2864_v54 = vadd.f32 %v2863_v38, %v2820_v57 }
0x1996   :  { %v3507_v36 = vpop.f32.mrf.mxu0 }
0x1997   :  { %v2869_v2 = vadd.f32 %v2864_v54, %v2672_v52 }
0x1998   :  { %v2866_v32 = vpop.f32.mrf.mxu0 }
0x1999   :  { %v2871_v18 = vmul.f32 0.70710677, %v2869_v2  ;;  %v2870_v20 = vmul.f32 0.5, %v2869_v2 }
0x199a   :  { %v3508_v6 = vpop.f32.mrf.mxu0 }
0x199b   :  { %v2872_v1 = vand.u32 2147483647, %v2871_v18  ;;  %vm2892_vm9 = vcmp.ge.f32.partialorder %v2871_v18, 0.0 }
0x199d   :  { %v2873_v8 = vmul.f32 0.3275911, %v2872_v1  ;;  %v2886_v13 = vsub.f32 0.0, %v2872_v1 }
0x199f   :  { %v2874_v55 = vadd.f32 1.0, %v2873_v8  ;;  %v2887_v23 = vmul.f32 %v2886_v13, %v2872_v1 }
0x19a1   :  { %3697 = vrcp.f32 %v2874_v55  ;;  %v2888_v60 = vmul.f32 1.442695, %v2887_v23 }
0x19a3   :  { %3699 = vpow2.f32 %v2888_v60 }
0x19ae   :  { %v3698_v56 = vpop.eup %3697 }
0x19af   :  { %v2877_v19 = vmul.f32 1.0614054, %v3698_v56 }
0x19b0   :  { %v3700_v0 = vpop.eup %3699 }
0x19b1   :  { %v2878_v53 = vadd.f32 -1.4531521, %v2877_v19 }
0x19b3   :  { %v2879_v61 = vmul.f32 %v3698_v56, %v2878_v53 }
0x19b5   :  { %v2880_v63 = vadd.f32 1.4214138, %v2879_v61 }
0x19b7   :  { %v2881_v24 = vmul.f32 %v3698_v56, %v2880_v63 }
0x19b9   :  { %v2882_v57 = vadd.f32 -0.28449672, %v2881_v24 }
0x19bb   :  { %v2883_v52 = vmul.f32 %v3698_v56, %v2882_v57 }
0x19bd   :  { %v2884_v62 = vadd.f32 0.2548296, %v2883_v52 }
0x19bf   :  { %v2885_v3 = vmul.f32 %v3698_v56, %v2884_v62 }
0x19c1   :  { %v2890_v59 = vmul.f32 %v3700_v0, %v2885_v3 }
0x19c3   :  { %v2891_v47 = vsub.f32 1.0, %v2890_v59 }
0x19c5   :  { %v2893_v39 = vsub.f32 0.0, %v2891_v47 }
0x19c7   :  { %v2894_v46 = vsel %vm2892_vm9, %v2891_v47, %v2893_v39 }
0x19c8   :  { %v2895_v50 = vadd.f32 1.0, %v2894_v46 }
0x19ca   :  { %v2896_v51 = vmul.f32 %v2895_v50, %v2870_v20 }
0x19cc   :  { %v2897_v44 = vpack.c.bf16 %v2896_v51, %v2896_v51 }
0x19ce   :  { %3514 = vmatmul.mubr.msk.bf16.vlgmr.msra.gmra.mxu1 %vm206_vm2, %v2897_v44 }
0x1a8e   :  { %v2935_v4 = vpop.f32.mrf.mxu1 }
0x1a8f   :  { %v2936_v7 = vadd.f32 %v2935_v4, %v2706_v48 }
0x1a90   :  { %v3515_v10 = vpop.f32.mrf.mxu1 }
0x1a91   :  { %v2942_v40 = vrot.slane %v2936_v7, 7 }
0x1a92   :  { %v2938_v45 = vpop.f32.mrf.mxu1 }
0x1a93   :  { %v2945_v12 = vsel %vm2944_vm10, %v2761_v58, %v2942_v40 }
0x1a94   :  { %v3516_v14 = vpop.f32.mrf.mxu1  ;;  %2947 = vst.msk [vmem:[#allocation2] sm:$0x3] %vm2946_vm11, %v2945_v12 }
0x1a95   :  { %3718 = shalt.err (!%p3715_p4)
}
0x1a96   :  { %2957 = dma.vmem_to_hbm [thread:$0]  %s2955_s14, 32, %s3914_s4, [#allocation3]  }
0x1a97   :  { %3727 = dma.done.wait [#allocation3], 32  }
0x1a98   :  { %3728 = vsyncadd [#allocation3], 4294967264 }
0x1a99   :  { %2961 = vsyncpa [#allocation3], 1 }

</bundles_post_ra>
